<compile_context>
chip_gen: v6e
topology: v6e:2x2x1
jax: 0.10.0
libtpu: 0.0.40
codegen_flags: <defaults>
</compile_context>

<pallas_src>
import functools
import math

import jax
import jax.numpy as jnp
from jax import lax
from jax.experimental import pallas as pl
from jax.experimental.pallas import tpu as pltpu

_REF_PREC = lax.Precision.HIGHEST   # pure-JAX reference (ground truth) only


# ---------------------------------------------------------------------------
# One-time weight preparation (hoisted OUT of the per-forward path).
# ---------------------------------------------------------------------------
def _band_weights(w, W):
    """Fold the KW taps + replicate padding along W into a banded
    (W*Cin, W*Cout) matrix per (kd, kh) tap."""
    KD, KH, KW, cin, cout = w.shape
    ar = jnp.arange(W)
    S = jnp.zeros((KW, W, W), w.dtype)
    for k in range(KW):
        wi = jnp.clip(ar + k - (KW // 2), 0, W - 1)
        S = S.at[k, wi, ar].add(1.0)
    band = jnp.einsum("kiw,dhkce->dhicwe", S, w)          # (KD,KH,W,cin,W,cout)
    return band.reshape(KD * KH, W * cin, W * cout)


def prepare_params(params, W):
    """Band the conv taps over W, fold the inference-mode BN scale into the
    band matrices, stack everything, cast weights to bf16.  Call once."""
    def banded_scaled(name):
        p = params[name]
        band = _band_weights(p["w"], W)                   # (taps, W*Cin, W*Cout)
        return band * jnp.tile(p["scale"], W)[None, None, :]

    b1a = banded_scaled("c1a")        # (9, WC, WC), tap t = kd*3 + kh
    b1b = banded_scaled("c1b")        # (9, WC, WC)
    b2a = banded_scaled("c2a")        # (3, WC, WC)
    b2b = banded_scaled("c2b")        # (3, WC, WC)
    bfu = banded_scaled("fus")        # (1, WC, WC)

    # 128-wide taps: [conv1a kd=0 | conv1a kd=2 | conv1b | conv2b | fusion]
    w128 = jnp.concatenate([b1a[0:3], b1a[6:9], b1b, b2b, bfu], axis=0)
    # 256-wide stage-A taps: conv1a kd=1 fused with conv2a along output dim.
    w256 = jnp.concatenate([b1a[3:6], b2a], axis=-1)

    shifts = jnp.stack([
        jnp.tile(params["c1a"]["shift"], W),
        jnp.tile(params["c2a"]["shift"], W),
        jnp.tile(params["c1b"]["shift"], W) + jnp.tile(params["c2b"]["shift"], W),
        jnp.tile(params["fus"]["shift"], W),
    ])[:, None, :].astype(jnp.float32)                    # (4, 1, WC)

    return {"w128": w128.astype(jnp.bfloat16),
            "w256": w256.astype(jnp.bfloat16),
            "shifts": shifts}


# ---------------------------------------------------------------------------
# Fully fused residual-block kernel: one batch element per grid step.
# ---------------------------------------------------------------------------
def _residual_block_kernel(x_ref, w128_ref, w256_ref, shift_ref, o_ref,
                           xp_ref, y1p_ref, y2p_ref, *, D, H, WC):
    f32 = jnp.float32
    M = D * H
    RA = (D + 2) * H                  # rows in a D-padded per-kh slab

    def pad_h(v):                     # replicate-pad H by 1 on each side
        return jnp.concatenate([v[:, :1, :], v, v[:, H - 1:, :]], axis=1)

    def pad_d(v):                     # replicate-pad D by 1 on each side
        return jnp.concatenate([v[:1], v, v[D - 1:]], axis=0)

    def elu(y):                       # nn.ELU(alpha=1.0); exp arg clamped
        return jnp.where(y > 0, y, jnp.exp(jnp.minimum(y, 0.0)) - 1.0)

    # ---- stage A: conv1a (3x3x3) + conv2a (1x3x3), shared rep-padded x ----
    xp_ref[...] = pad_d(pad_h(x_ref[...])).astype(xp_ref.dtype)   # bf16 scratch

    acc1 = jnp.zeros((M, WC), f32)
    acc2 = jnp.zeros((M, WC), f32)
    for kh in range(3):
        # One slab copy per kh; each kd tap is a contiguous, sublane-aligned
        # row range of it (H is a multiple of 8) -> no per-tap reshape copies.
        slab = xp_ref[:, kh:kh + H, :].reshape(RA, WC)
        acc1 += jnp.dot(slab[0:M], w128_ref[kh],                    # kd = 0
                        preferred_element_type=f32)
        acc1 += jnp.dot(slab[2 * H:2 * H + M], w128_ref[3 + kh],    # kd = 2
                        preferred_element_type=f32)
        # conv1a kd=1 fused with conv2a along N (fills 256-wide MXU).
        r = jnp.dot(slab[H:H + M], w256_ref[kh], preferred_element_type=f32)
        acc1 += r[:, :WC]
        acc2 += r[:, WC:]

    # BN scale folded into the band weights; only the shift remains.
    y1a = elu(acc1 + shift_ref[0])
    y2a = elu(acc2 + shift_ref[1])
    y1p_ref[...] = pad_d(pad_h(y1a.reshape(D, H, WC))).astype(y1p_ref.dtype)
    y2p_ref[...] = pad_h(y2a.reshape(D, H, WC)).astype(y2p_ref.dtype)

    # ---- stage B: conv1b + conv2b accumulate straight into z ----
    accz = jnp.zeros((M, WC), f32)
    for kh in range(3):
        slab1 = y1p_ref[:, kh:kh + H, :].reshape(RA, WC)
        for kd in range(3):
            accz += jnp.dot(slab1[kd * H:kd * H + M],
                            w128_ref[6 + kd * 3 + kh],
                            preferred_element_type=f32)
        slab2 = y2p_ref[:, kh:kh + H, :].reshape(M, WC)
        accz += jnp.dot(slab2, w128_ref[15 + kh], preferred_element_type=f32)
    z = accz + shift_ref[2]           # shift(conv1b) + shift(conv2b)

    # fusion 1x1x1 conv (+BN shift), residual add, ELU
    yf = jnp.dot(z.astype(jnp.bfloat16), w128_ref[18],
                 preferred_element_type=f32) + shift_ref[3]
    xres = x_ref[...].reshape(M, WC)                    # residual in f32
    o_ref[...] = elu(yf + xres).astype(o_ref.dtype)


# ---------------------------------------------------------------------------
# Wrapper: one pallas_call over the batch; weights come pre-prepared.
# ---------------------------------------------------------------------------
def residual_block_forward(x, prep):
    # x: (N, D, H, W, C) channels-last
    N, D, H, W, C = x.shape
    WC = W * C
    if WC != 128:
        raise ValueError(f"kernel assumes lane-packed W*C == 128, got {WC}")
    if H % 8 != 0:
        raise ValueError(f"H must be a multiple of 8 (sublane align), got {H}")
    M = D * H
    x_pk = x.reshape(N, D, H, WC)
    w128, w256, shifts = prep["w128"], prep["w256"], prep["shifts"]

    kernel = functools.partial(_residual_block_kernel, D=D, H=H, WC=WC)

    # 25 (M,128)x(128,128)-equivalent matmuls per batch element.
    flops = 25 * 2 * N * M * WC * WC
    transcendentals = 3 * N * M * WC
    bytes_accessed = (2 * x_pk.size * x_pk.dtype.itemsize
                      + w128.size * 2 + w256.size * 2 + shifts.size * 4)

    out = pl.pallas_call(
        kernel,
        out_shape=jax.ShapeDtypeStruct((N, M, WC), x.dtype),
        grid=(N,),
        in_specs=[
            pl.BlockSpec((pl.Squeezed(), D, H, WC), lambda n: (n, 0, 0, 0)),
            pl.BlockSpec(w128.shape, lambda n: (0, 0, 0)),
            pl.BlockSpec(w256.shape, lambda n: (0, 0, 0)),
            pl.BlockSpec(shifts.shape, lambda n: (0, 0, 0)),
        ],
        out_specs=pl.BlockSpec((pl.Squeezed(), M, WC), lambda n: (n, 0, 0)),
        scratch_shapes=[
            pltpu.VMEM((D + 2, H + 2, WC), jnp.bfloat16),   # rep-padded x
            pltpu.VMEM((D + 2, H + 2, WC), jnp.bfloat16),   # rep-padded y1a
            pltpu.VMEM((D, H + 2, WC), jnp.bfloat16),       # rep-padded y2a
        ],
        compiler_params=pltpu.CompilerParams(
            dimension_semantics=("parallel",)),
        cost_estimate=pl.CostEstimate(flops=flops,
                                      transcendentals=transcendentals,
                                      bytes_accessed=bytes_accessed),
    )(x_pk, w128, w256, shifts)
    return out.reshape(N, D, H, W, C)


# ---------------------------------------------------------------------------
# Parameter construction (deterministic, synthetic)
# ---------------------------------------------------------------------------
def _fold_bn(bias, gamma, beta, mean, var, eps=1e-5):
    inv = 1.0 / jnp.sqrt(var + eps)
    scale = gamma * inv
    shift = (bias - mean) * scale + beta
    return scale, shift


def make_conv_bn_params(key, cin, cout, ksize):
    kd, kh, kw = ksize
    k0, k1, k2, k3, k4, k5 = jax.random.split(key, 6)
    fan_in = cin * kd * kh * kw
    # PyTorch Conv3d weight layout: (Cout, Cin, kD, kH, kW)
    w_pt = jax.random.normal(k0, (cout, cin, kd, kh, kw),
                             jnp.float32) / math.sqrt(fan_in)
    bias = 0.1 * jax.random.normal(k1, (cout,), jnp.float32)
    gamma = 1.0 + 0.1 * jax.random.normal(k2, (cout,), jnp.float32)
    beta = 0.1 * jax.random.normal(k3, (cout,), jnp.float32)
    mean = 0.1 * jax.random.normal(k4, (cout,), jnp.float32)
    var = 0.9 + 0.2 * jax.random.uniform(k5, (cout,), jnp.float32)
    scale, shift = _fold_bn(bias, gamma, beta, mean, var)
    w = jnp.transpose(w_pt, (2, 3, 4, 1, 0))   # -> (kD, kH, kW, Cin, Cout)
    return {"w": w, "scale": scale, "shift": shift}


# ---------------------------------------------------------------------------
# Pure-JAX reference (ground truth)
# ---------------------------------------------------------------------------
def _conv_bn_act_ref(x, w, scale, shift, *, pad, apply_act):
    pd, ph, pw = pad
    xp = jnp.pad(x, ((0, 0), (pd, pd), (ph, ph), (pw, pw), (0, 0)), mode="edge")
    y = lax.conv_general_dilated(
        xp, w, window_strides=(1, 1, 1), padding="VALID",
        dimension_numbers=("NDHWC", "DHWIO", "NDHWC"), precision=_REF_PREC)
    y = y * scale + shift
    if apply_act:
        y = jnp.where(y > 0, y, jnp.exp(jnp.minimum(y, 0.0)) - 1.0)
    return y


def residual_block_ref(x, params):
    y1 = _conv_bn_act_ref(x, **params["c1a"], pad=(1, 1, 1), apply_act=True)
    y1 = _conv_bn_act_ref(y1, **params["c1b"], pad=(1, 1, 1), apply_act=False)
    y2 = _conv_bn_act_ref(x, **params["c2a"], pad=(0, 1, 1), apply_act=True)
    y2 = _conv_bn_act_ref(y2, **params["c2b"], pad=(0, 1, 1), apply_act=False)
    z = y1 + y2
    fw = params["fus"]["w"]
    cin, cout = fw.shape[-2], fw.shape[-1]
    y = jnp.einsum("ndhwc,co->ndhwo", z, fw.reshape(cin, cout),
                   precision=_REF_PREC)
    y = y * params["fus"]["scale"] + params["fus"]["shift"]
    y = y + x
    return jnp.where(y > 0, y, jnp.exp(jnp.minimum(y, 0.0)) - 1.0)


if __name__ == "__main__":
    # batch=2, channels=8 (in==out, projection=False), D=8, H=W=16 -> W*C=128
    N, C, D, H, W = 2, 8, 8, 16, 16
    root = jax.random.PRNGKey(0)
    kx, k1, k2, k3, k4, k5 = jax.random.split(root, 6)

    x_ncdhw = jax.random.normal(kx, (N, C, D, H, W), jnp.float32)  # PyTorch layout
    x = jnp.transpose(x_ncdhw, (0, 2, 3, 4, 1))                    # -> NDHWC

    params = {
        "c1a": make_conv_bn_params(k1, C, C, (3, 3, 3)),
        "c1b": make_conv_bn_params(k2, C, C, (3, 3, 3)),
        "c2a": make_conv_bn_params(k3, C, C, (1, 3, 3)),
        "c2b": make_conv_bn_params(k4, C, C, (1, 3, 3)),
        "fus": make_conv_bn_params(k5, C, C, (1, 1, 1)),
    }

    # One-time weight preparation, hoisted out of the per-forward path.
    prep = prepare_params(params, W)
    prep = jax.tree_util.tree_map(jax.block_until_ready, prep)

    fwd = jax.jit(residual_block_forward)
    y = jax.block_until_ready(fwd(x, prep))

    y_ref = residual_block_ref(x, params)
    assert y.shape == (N, D, H, W, C)
    assert bool(jnp.all(jnp.isfinite(y)))
    # Kernel uses bf16 weights / DEFAULT MXU precision with f32 accumulation;
    # reference is full-f32 HIGHEST -> loose tolerance.
    err = float(jnp.max(jnp.abs(y - y_ref)))
    assert err < 1e-1, f"max abs err {err}"
    print("KERNEL_OK")
</pallas_src>

<mosaic_0001>
module attributes {stable_mosaic.version = 11 : i64} {
  func.func @_residual_block_kernel(%arg0: i32, %arg1: memref<1x8x16x128xf32, #tpu.memory_space<vmem>>, %arg2: memref<19x128x128xbf16, #tpu.memory_space<vmem>>, %arg3: memref<3x128x256xbf16, #tpu.memory_space<vmem>>, %arg4: memref<4x1x128xf32, #tpu.memory_space<vmem>>, %arg5: memref<1x128x128xf32, #tpu.memory_space<vmem>>, %arg6: memref<10x18x128xbf16, #tpu.memory_space<vmem>>, %arg7: memref<10x18x128xbf16, #tpu.memory_space<vmem>>, %arg8: memref<8x18x128xbf16, #tpu.memory_space<vmem>>) attributes {dimension_semantics = [#tpu.dimension_semantics<parallel>], iteration_bounds = array<i64: 2>, scalar_prefetch = 0 : i64, scratch_operands = 3 : i64, tpu.core_type = #tpu.core_type<tc>, window_params = [{transform_indices = @transform_0, window_bounds = array<i64: 1, 8, 16, 128>}, {pipeline_mode = #tpu.pipeline_mode<synchronous>, transform_indices = @transform_1, window_bounds = array<i64: 19, 128, 128>}, {pipeline_mode = #tpu.pipeline_mode<synchronous>, transform_indices = @transform_2, window_bounds = array<i64: 3, 128, 256>}, {pipeline_mode = #tpu.pipeline_mode<synchronous>, transform_indices = @transform_3, window_bounds = array<i64: 4, 1, 128>}, {transform_indices = @transform_4, window_bounds = array<i64: 1, 128, 128>}]} {
    %c0 = arith.constant 0 : index
    %c0_0 = arith.constant 0 : index
    %c0_1 = arith.constant 0 : index
    %c0_2 = arith.constant 0 : index
    %0 = vector.load %arg1[%c0, %c0_0, %c0_1, %c0_2] : memref<1x8x16x128xf32, #tpu.memory_space<vmem>>, vector<1x8x16x128xf32>
    %1 = vector.shape_cast %0 : vector<1x8x16x128xf32> to vector<8x16x128xf32>
    %2 = vector.extract_strided_slice %1 {offsets = [0, 0, 0], sizes = [8, 1, 128], strides = [1, 1, 1]} : vector<8x16x128xf32> to vector<8x1x128xf32>
    %3 = vector.extract_strided_slice %1 {offsets = [0, 15, 0], sizes = [8, 1, 128], strides = [1, 1, 1]} : vector<8x16x128xf32> to vector<8x1x128xf32>
    %4 = tpu.concatenate %2, %1, %3 in 1 : vector<8x1x128xf32>, vector<8x16x128xf32>, vector<8x1x128xf32> -> vector<8x18x128xf32>
    %5 = vector.extract_strided_slice %4 {offsets = [0, 0, 0], sizes = [1, 18, 128], strides = [1, 1, 1]} : vector<8x18x128xf32> to vector<1x18x128xf32>
    %6 = vector.extract_strided_slice %4 {offsets = [7, 0, 0], sizes = [1, 18, 128], strides = [1, 1, 1]} : vector<8x18x128xf32> to vector<1x18x128xf32>
    %7 = tpu.concatenate %5, %4, %6 in 0 : vector<1x18x128xf32>, vector<8x18x128xf32>, vector<1x18x128xf32> -> vector<10x18x128xf32>
    %8 = arith.truncf %7 : vector<10x18x128xf32> to vector<10x18x128xbf16>
    %c0_3 = arith.constant 0 : index
    %c0_4 = arith.constant 0 : index
    %c0_5 = arith.constant 0 : index
    %9 = vector.load %arg6[%c0_3, %c0_4, %c0_5] : memref<10x18x128xbf16, #tpu.memory_space<vmem>>, vector<10x18x128xbf16>
    tpu.vector_store %arg6[%c0_3, %c0_4, %c0_5], %8 {strides = array<i32>} : memref<10x18x128xbf16, #tpu.memory_space<vmem>>, vector<10x18x128xbf16>,
    %cst = arith.constant 0.000000e+00 : f32
    %10 = vector.broadcast %cst : f32 to vector<128x128xf32>
    %cst_6 = arith.constant 0.000000e+00 : f32
    %11 = vector.broadcast %cst_6 : f32 to vector<128x128xf32>
    %c0_7 = arith.constant 0 : index
    %c0_8 = arith.constant 0 : index
    %c0_9 = arith.constant 0 : index
    %12 = vector.load %arg6[%c0_7, %c0_8, %c0_9] : memref<10x18x128xbf16, #tpu.memory_space<vmem>>, vector<10x16x128xbf16>
    %13 = vector.shape_cast %12 : vector<10x16x128xbf16> to vector<160x128xbf16>
    %14 = vector.extract_strided_slice %13 {offsets = [0, 0], sizes = [128, 128], strides = [1, 1]} : vector<160x128xbf16> to vector<128x128xbf16>
    %c0_10 = arith.constant 0 : index
    %c0_11 = arith.constant 0 : index
    %c0_12 = arith.constant 0 : index
    %15 = vector.load %arg2[%c0_10, %c0_11, %c0_12] : memref<19x128x128xbf16, #tpu.memory_space<vmem>>, vector<1x128x128xbf16>
    %16 = vector.shape_cast %15 : vector<1x128x128xbf16> to vector<128x128xbf16>
    %cst_13 = arith.constant dense<0.000000e+00> : vector<128x128xf32>
    %17 = tpu.matmul %14, %16, %cst_13 {dimension_numbers = #tpu.dot_dimension_numbers<[1], [0], [0], [1], [0, 0, 1, 1], [], []>} : vector<128x128xbf16>, vector<128x128xbf16>, vector<128x128xf32> -> vector<128x128xf32>
    %18 = arith.addf %10, %17 : vector<128x128xf32>
    %19 = vector.extract_strided_slice %13 {offsets = [32, 0], sizes = [128, 128], strides = [1, 1]} : vector<160x128xbf16> to vector<128x128xbf16>
    %c3 = arith.constant 3 : index
    %c0_14 = arith.constant 0 : index
    %c0_15 = arith.constant 0 : index
    %20 = vector.load %arg2[%c3, %c0_14, %c0_15] : memref<19x128x128xbf16, #tpu.memory_space<vmem>>, vector<1x128x128xbf16>
    %21 = vector.shape_cast %20 : vector<1x128x128xbf16> to vector<128x128xbf16>
    %cst_16 = arith.constant dense<0.000000e+00> : vector<128x128xf32>
    %22 = tpu.matmul %19, %21, %cst_16 {dimension_numbers = #tpu.dot_dimension_numbers<[1], [0], [0], [1], [0, 0, 1, 1], [], []>} : vector<128x128xbf16>, vector<128x128xbf16>, vector<128x128xf32> -> vector<128x128xf32>
    %23 = arith.addf %18, %22 : vector<128x128xf32>
    %24 = vector.extract_strided_slice %13 {offsets = [16, 0], sizes = [128, 128], strides = [1, 1]} : vector<160x128xbf16> to vector<128x128xbf16>
    %c0_17 = arith.constant 0 : index
    %c0_18 = arith.constant 0 : index
    %c0_19 = arith.constant 0 : index
    %25 = vector.load %arg3[%c0_17, %c0_18, %c0_19] : memref<3x128x256xbf16, #tpu.memory_space<vmem>>, vector<1x128x256xbf16>
    %26 = vector.shape_cast %25 : vector<1x128x256xbf16> to vector<128x256xbf16>
    %cst_20 = arith.constant dense<0.000000e+00> : vector<128x256xf32>
    %27 = tpu.matmul %24, %26, %cst_20 {dimension_numbers = #tpu.dot_dimension_numbers<[1], [0], [0], [1], [0, 0, 1, 1], [], []>} : vector<128x128xbf16>, vector<128x256xbf16>, vector<128x256xf32> -> vector<128x256xf32>
    %28 = vector.extract_strided_slice %27 {offsets = [0, 0], sizes = [128, 128], strides = [1, 1]} : vector<128x256xf32> to vector<128x128xf32>
    %29 = arith.addf %23, %28 : vector<128x128xf32>
    %30 = vector.extract_strided_slice %27 {offsets = [0, 128], sizes = [128, 128], strides = [1, 1]} : vector<128x256xf32> to vector<128x128xf32>
    %31 = arith.addf %11, %30 : vector<128x128xf32>
    %c0_21 = arith.constant 0 : index
    %c1 = arith.constant 1 : index
    %c0_22 = arith.constant 0 : index
    %32 = vector.load %arg6[%c0_21, %c1, %c0_22] : memref<10x18x128xbf16, #tpu.memory_space<vmem>>, vector<10x16x128xbf16>
    %33 = vector.shape_cast %32 : vector<10x16x128xbf16> to vector<160x128xbf16>
    %34 = vector.extract_strided_slice %33 {offsets = [0, 0], sizes = [128, 128], strides = [1, 1]} : vector<160x128xbf16> to vector<128x128xbf16>
    %c1_23 = arith.constant 1 : index
    %c0_24 = arith.constant 0 : index
    %c0_25 = arith.constant 0 : index
    %35 = vector.load %arg2[%c1_23, %c0_24, %c0_25] : memref<19x128x128xbf16, #tpu.memory_space<vmem>>, vector<1x128x128xbf16>
    %36 = vector.shape_cast %35 : vector<1x128x128xbf16> to vector<128x128xbf16>
    %cst_26 = arith.constant dense<0.000000e+00> : vector<128x128xf32>
    %37 = tpu.matmul %34, %36, %cst_26 {dimension_numbers = #tpu.dot_dimension_numbers<[1], [0], [0], [1], [0, 0, 1, 1], [], []>} : vector<128x128xbf16>, vector<128x128xbf16>, vector<128x128xf32> -> vector<128x128xf32>
    %38 = arith.addf %29, %37 : vector<128x128xf32>
    %39 = vector.extract_strided_slice %33 {offsets = [32, 0], sizes = [128, 128], strides = [1, 1]} : vector<160x128xbf16> to vector<128x128xbf16>
    %c4 = arith.constant 4 : index
    %c0_27 = arith.constant 0 : index
    %c0_28 = arith.constant 0 : index
    %40 = vector.load %arg2[%c4, %c0_27, %c0_28] : memref<19x128x128xbf16, #tpu.memory_space<vmem>>, vector<1x128x128xbf16>
    %41 = vector.shape_cast %40 : vector<1x128x128xbf16> to vector<128x128xbf16>
    %cst_29 = arith.constant dense<0.000000e+00> : vector<128x128xf32>
    %42 = tpu.matmul %39, %41, %cst_29 {dimension_numbers = #tpu.dot_dimension_numbers<[1], [0], [0], [1], [0, 0, 1, 1], [], []>} : vector<128x128xbf16>, vector<128x128xbf16>, vector<128x128xf32> -> vector<128x128xf32>
    %43 = arith.addf %38, %42 : vector<128x128xf32>
    %44 = vector.extract_strided_slice %33 {offsets = [16, 0], sizes = [128, 128], strides = [1, 1]} : vector<160x128xbf16> to vector<128x128xbf16>
    %c1_30 = arith.constant 1 : index
    %c0_31 = arith.constant 0 : index
    %c0_32 = arith.constant 0 : index
    %45 = vector.load %arg3[%c1_30, %c0_31, %c0_32] : memref<3x128x256xbf16, #tpu.memory_space<vmem>>, vector<1x128x256xbf16>
    %46 = vector.shape_cast %45 : vector<1x128x256xbf16> to vector<128x256xbf16>
    %cst_33 = arith.constant dense<0.000000e+00> : vector<128x256xf32>
    %47 = tpu.matmul %44, %46, %cst_33 {dimension_numbers = #tpu.dot_dimension_numbers<[1], [0], [0], [1], [0, 0, 1, 1], [], []>} : vector<128x128xbf16>, vector<128x256xbf16>, vector<128x256xf32> -> vector<128x256xf32>
    %48 = vector.extract_strided_slice %47 {offsets = [0, 0], sizes = [128, 128], strides = [1, 1]} : vector<128x256xf32> to vector<128x128xf32>
    %49 = arith.addf %43, %48 : vector<128x128xf32>
    %50 = vector.extract_strided_slice %47 {offsets = [0, 128], sizes = [128, 128], strides = [1, 1]} : vector<128x256xf32> to vector<128x128xf32>
    %51 = arith.addf %31, %50 : vector<128x128xf32>
    %c0_34 = arith.constant 0 : index
    %c2 = arith.constant 2 : index
    %c0_35 = arith.constant 0 : index
    %52 = vector.load %arg6[%c0_34, %c2, %c0_35] : memref<10x18x128xbf16, #tpu.memory_space<vmem>>, vector<10x16x128xbf16>
    %53 = vector.shape_cast %52 : vector<10x16x128xbf16> to vector<160x128xbf16>
    %54 = vector.extract_strided_slice %53 {offsets = [0, 0], sizes = [128, 128], strides = [1, 1]} : vector<160x128xbf16> to vector<128x128xbf16>
    %c2_36 = arith.constant 2 : index
    %c0_37 = arith.constant 0 : index
    %c0_38 = arith.constant 0 : index
    %55 = vector.load %arg2[%c2_36, %c0_37, %c0_38] : memref<19x128x128xbf16, #tpu.memory_space<vmem>>, vector<1x128x128xbf16>
    %56 = vector.shape_cast %55 : vector<1x128x128xbf16> to vector<128x128xbf16>
    %cst_39 = arith.constant dense<0.000000e+00> : vector<128x128xf32>
    %57 = tpu.matmul %54, %56, %cst_39 {dimension_numbers = #tpu.dot_dimension_numbers<[1], [0], [0], [1], [0, 0, 1, 1], [], []>} : vector<128x128xbf16>, vector<128x128xbf16>, vector<128x128xf32> -> vector<128x128xf32>
    %58 = arith.addf %49, %57 : vector<128x128xf32>
    %59 = vector.extract_strided_slice %53 {offsets = [32, 0], sizes = [128, 128], strides = [1, 1]} : vector<160x128xbf16> to vector<128x128xbf16>
    %c5 = arith.constant 5 : index
    %c0_40 = arith.constant 0 : index
    %c0_41 = arith.constant 0 : index
    %60 = vector.load %arg2[%c5, %c0_40, %c0_41] : memref<19x128x128xbf16, #tpu.memory_space<vmem>>, vector<1x128x128xbf16>
    %61 = vector.shape_cast %60 : vector<1x128x128xbf16> to vector<128x128xbf16>
    %cst_42 = arith.constant dense<0.000000e+00> : vector<128x128xf32>
    %62 = tpu.matmul %59, %61, %cst_42 {dimension_numbers = #tpu.dot_dimension_numbers<[1], [0], [0], [1], [0, 0, 1, 1], [], []>} : vector<128x128xbf16>, vector<128x128xbf16>, vector<128x128xf32> -> vector<128x128xf32>
    %63 = arith.addf %58, %62 : vector<128x128xf32>
    %64 = vector.extract_strided_slice %53 {offsets = [16, 0], sizes = [128, 128], strides = [1, 1]} : vector<160x128xbf16> to vector<128x128xbf16>
    %c2_43 = arith.constant 2 : index
    %c0_44 = arith.constant 0 : index
    %c0_45 = arith.constant 0 : index
    %65 = vector.load %arg3[%c2_43, %c0_44, %c0_45] : memref<3x128x256xbf16, #tpu.memory_space<vmem>>, vector<1x128x256xbf16>
    %66 = vector.shape_cast %65 : vector<1x128x256xbf16> to vector<128x256xbf16>
    %cst_46 = arith.constant dense<0.000000e+00> : vector<128x256xf32>
    %67 = tpu.matmul %64, %66, %cst_46 {dimension_numbers = #tpu.dot_dimension_numbers<[1], [0], [0], [1], [0, 0, 1, 1], [], []>} : vector<128x128xbf16>, vector<128x256xbf16>, vector<128x256xf32> -> vector<128x256xf32>
    %68 = vector.extract_strided_slice %67 {offsets = [0, 0], sizes = [128, 128], strides = [1, 1]} : vector<128x256xf32> to vector<128x128xf32>
    %69 = arith.addf %63, %68 : vector<128x128xf32>
    %70 = vector.extract_strided_slice %67 {offsets = [0, 128], sizes = [128, 128], strides = [1, 1]} : vector<128x256xf32> to vector<128x128xf32>
    %71 = arith.addf %51, %70 : vector<128x128xf32>
    %c0_47 = arith.constant 0 : index
    %c0_48 = arith.constant 0 : index
    %c0_49 = arith.constant 0 : index
    %72 = vector.load %arg4[%c0_47, %c0_48, %c0_49] : memref<4x1x128xf32, #tpu.memory_space<vmem>>, vector<1x1x128xf32>
    %73 = vector.shape_cast %72 : vector<1x1x128xf32> to vector<1x128xf32>
    %74 = vector.broadcast %73 : vector<1x128xf32> to vector<128x128xf32>
    %75 = arith.addf %69, %74 : vector<128x128xf32>
    %cst_50 = arith.constant 0.000000e+00 : f32
    %76 = vector.broadcast %cst_50 : f32 to vector<128x128xf32>
    %77 = arith.cmpf ogt, %75, %76 : vector<128x128xf32>
    %cst_51 = arith.constant 0.000000e+00 : f32
    %78 = vector.broadcast %cst_51 : f32 to vector<128x128xf32>
    %79 = arith.minimumf %75, %78 : vector<128x128xf32>
    %80 = math.exp %79 : vector<128x128xf32>
    %cst_52 = arith.constant 1.000000e+00 : f32
    %81 = vector.broadcast %cst_52 : f32 to vector<128x128xf32>
    %82 = arith.subf %80, %81 : vector<128x128xf32>
    %83 = arith.select %77, %75, %82 : vector<128x128xi1>, vector<128x128xf32>
    %c1_53 = arith.constant 1 : index
    %c0_54 = arith.constant 0 : index
    %c0_55 = arith.constant 0 : index
    %84 = vector.load %arg4[%c1_53, %c0_54, %c0_55] : memref<4x1x128xf32, #tpu.memory_space<vmem>>, vector<1x1x128xf32>
    %85 = vector.shape_cast %84 : vector<1x1x128xf32> to vector<1x128xf32>
    %86 = vector.broadcast %85 : vector<1x128xf32> to vector<128x128xf32>
    %87 = arith.addf %71, %86 : vector<128x128xf32>
    %cst_56 = arith.constant 0.000000e+00 : f32
    %88 = vector.broadcast %cst_56 : f32 to vector<128x128xf32>
    %89 = arith.cmpf ogt, %87, %88 : vector<128x128xf32>
    %cst_57 = arith.constant 0.000000e+00 : f32
    %90 = vector.broadcast %cst_57 : f32 to vector<128x128xf32>
    %91 = arith.minimumf %87, %90 : vector<128x128xf32>
    %92 = math.exp %91 : vector<128x128xf32>
    %cst_58 = arith.constant 1.000000e+00 : f32
    %93 = vector.broadcast %cst_58 : f32 to vector<128x128xf32>
    %94 = arith.subf %92, %93 : vector<128x128xf32>
    %95 = arith.select %89, %87, %94 : vector<128x128xi1>, vector<128x128xf32>
    %96 = vector.shape_cast %83 : vector<128x128xf32> to vector<8x16x128xf32>
    %97 = vector.extract_strided_slice %96 {offsets = [0, 0, 0], sizes = [8, 1, 128], strides = [1, 1, 1]} : vector<8x16x128xf32> to vector<8x1x128xf32>
    %98 = vector.extract_strided_slice %96 {offsets = [0, 15, 0], sizes = [8, 1, 128], strides = [1, 1, 1]} : vector<8x16x128xf32> to vector<8x1x128xf32>
    %99 = tpu.concatenate %97, %96, %98 in 1 : vector<8x1x128xf32>, vector<8x16x128xf32>, vector<8x1x128xf32> -> vector<8x18x128xf32>
    %100 = vector.extract_strided_slice %99 {offsets = [0, 0, 0], sizes = [1, 18, 128], strides = [1, 1, 1]} : vector<8x18x128xf32> to vector<1x18x128xf32>
    %101 = vector.extract_strided_slice %99 {offsets = [7, 0, 0], sizes = [1, 18, 128], strides = [1, 1, 1]} : vector<8x18x128xf32> to vector<1x18x128xf32>
    %102 = tpu.concatenate %100, %99, %101 in 0 : vector<1x18x128xf32>, vector<8x18x128xf32>, vector<1x18x128xf32> -> vector<10x18x128xf32>
    %103 = arith.truncf %102 : vector<10x18x128xf32> to vector<10x18x128xbf16>
    %c0_59 = arith.constant 0 : index
    %c0_60 = arith.constant 0 : index
    %c0_61 = arith.constant 0 : index
    %104 = vector.load %arg7[%c0_59, %c0_60, %c0_61] : memref<10x18x128xbf16, #tpu.memory_space<vmem>>, vector<10x18x128xbf16>
    tpu.vector_store %arg7[%c0_59, %c0_60, %c0_61], %103 {strides = array<i32>} : memref<10x18x128xbf16, #tpu.memory_space<vmem>>, vector<10x18x128xbf16>,
    %105 = vector.shape_cast %95 : vector<128x128xf32> to vector<8x16x128xf32>
    %106 = vector.extract_strided_slice %105 {offsets = [0, 0, 0], sizes = [8, 1, 128], strides = [1, 1, 1]} : vector<8x16x128xf32> to vector<8x1x128xf32>
    %107 = vector.extract_strided_slice %105 {offsets = [0, 15, 0], sizes = [8, 1, 128], strides = [1, 1, 1]} : vector<8x16x128xf32> to vector<8x1x128xf32>
    %108 = tpu.concatenate %106, %105, %107 in 1 : vector<8x1x128xf32>, vector<8x16x128xf32>, vector<8x1x128xf32> -> vector<8x18x128xf32>
    %109 = arith.truncf %108 : vector<8x18x128xf32> to vector<8x18x128xbf16>
    %c0_62 = arith.constant 0 : index
    %c0_63 = arith.constant 0 : index
    %c0_64 = arith.constant 0 : index
    %110 = vector.load %arg8[%c0_62, %c0_63, %c0_64] : memref<8x18x128xbf16, #tpu.memory_space<vmem>>, vector<8x18x128xbf16>
    tpu.vector_store %arg8[%c0_62, %c0_63, %c0_64], %109 {strides = array<i32>} : memref<8x18x128xbf16, #tpu.memory_space<vmem>>, vector<8x18x128xbf16>,
    %cst_65 = arith.constant 0.000000e+00 : f32
    %111 = vector.broadcast %cst_65 : f32 to vector<128x128xf32>
    %c0_66 = arith.constant 0 : index
    %c0_67 = arith.constant 0 : index
    %c0_68 = arith.constant 0 : index
    %112 = vector.load %arg7[%c0_66, %c0_67, %c0_68] : memref<10x18x128xbf16, #tpu.memory_space<vmem>>, vector<10x16x128xbf16>
    %113 = vector.shape_cast %112 : vector<10x16x128xbf16> to vector<160x128xbf16>
    %114 = vector.extract_strided_slice %113 {offsets = [0, 0], sizes = [128, 128], strides = [1, 1]} : vector<160x128xbf16> to vector<128x128xbf16>
    %c6 = arith.constant 6 : index
    %c0_69 = arith.constant 0 : index
    %c0_70 = arith.constant 0 : index
    %115 = vector.load %arg2[%c6, %c0_69, %c0_70] : memref<19x128x128xbf16, #tpu.memory_space<vmem>>, vector<1x128x128xbf16>
    %116 = vector.shape_cast %115 : vector<1x128x128xbf16> to vector<128x128xbf16>
    %cst_71 = arith.constant dense<0.000000e+00> : vector<128x128xf32>
    %117 = tpu.matmul %114, %116, %cst_71 {dimension_numbers = #tpu.dot_dimension_numbers<[1], [0], [0], [1], [0, 0, 1, 1], [], []>} : vector<128x128xbf16>, vector<128x128xbf16>, vector<128x128xf32> -> vector<128x128xf32>
    %118 = arith.addf %111, %117 : vector<128x128xf32>
    %119 = vector.extract_strided_slice %113 {offsets = [16, 0], sizes = [128, 128], strides = [1, 1]} : vector<160x128xbf16> to vector<128x128xbf16>
    %c9 = arith.constant 9 : index
    %c0_72 = arith.constant 0 : index
    %c0_73 = arith.constant 0 : index
    %120 = vector.load %arg2[%c9, %c0_72, %c0_73] : memref<19x128x128xbf16, #tpu.memory_space<vmem>>, vector<1x128x128xbf16>
    %121 = vector.shape_cast %120 : vector<1x128x128xbf16> to vector<128x128xbf16>
    %cst_74 = arith.constant dense<0.000000e+00> : vector<128x128xf32>
    %122 = tpu.matmul %119, %121, %cst_74 {dimension_numbers = #tpu.dot_dimension_numbers<[1], [0], [0], [1], [0, 0, 1, 1], [], []>} : vector<128x128xbf16>, vector<128x128xbf16>, vector<128x128xf32> -> vector<128x128xf32>
    %123 = arith.addf %118, %122 : vector<128x128xf32>
    %124 = vector.extract_strided_slice %113 {offsets = [32, 0], sizes = [128, 128], strides = [1, 1]} : vector<160x128xbf16> to vector<128x128xbf16>
    %c12 = arith.constant 12 : index
    %c0_75 = arith.constant 0 : index
    %c0_76 = arith.constant 0 : index
    %125 = vector.load %arg2[%c12, %c0_75, %c0_76] : memref<19x128x128xbf16, #tpu.memory_space<vmem>>, vector<1x128x128xbf16>
    %126 = vector.shape_cast %125 : vector<1x128x128xbf16> to vector<128x128xbf16>
    %cst_77 = arith.constant dense<0.000000e+00> : vector<128x128xf32>
    %127 = tpu.matmul %124, %126, %cst_77 {dimension_numbers = #tpu.dot_dimension_numbers<[1], [0], [0], [1], [0, 0, 1, 1], [], []>} : vector<128x128xbf16>, vector<128x128xbf16>, vector<128x128xf32> -> vector<128x128xf32>
    %128 = arith.addf %123, %127 : vector<128x128xf32>
    %c0_78 = arith.constant 0 : index
    %c0_79 = arith.constant 0 : index
    %c0_80 = arith.constant 0 : index
    %129 = vector.load %arg8[%c0_78, %c0_79, %c0_80] : memref<8x18x128xbf16, #tpu.memory_space<vmem>>, vector<8x16x128xbf16>
    %130 = vector.shape_cast %129 : vector<8x16x128xbf16> to vector<128x128xbf16>
    %c15 = arith.constant 15 : index
    %c0_81 = arith.constant 0 : index
    %c0_82 = arith.constant 0 : index
    %131 = vector.load %arg2[%c15, %c0_81, %c0_82] : memref<19x128x128xbf16, #tpu.memory_space<vmem>>, vector<1x128x128xbf16>
    %132 = vector.shape_cast %131 : vector<1x128x128xbf16> to vector<128x128xbf16>
    %cst_83 = arith.constant dense<0.000000e+00> : vector<128x128xf32>
    %133 = tpu.matmul %130, %132, %cst_83 {dimension_numbers = #tpu.dot_dimension_numbers<[1], [0], [0], [1], [0, 0, 1, 1], [], []>} : vector<128x128xbf16>, vector<128x128xbf16>, vector<128x128xf32> -> vector<128x128xf32>
    %134 = arith.addf %128, %133 : vector<128x128xf32>
    %c0_84 = arith.constant 0 : index
    %c1_85 = arith.constant 1 : index
    %c0_86 = arith.constant 0 : index
    %135 = vector.load %arg7[%c0_84, %c1_85, %c0_86] : memref<10x18x128xbf16, #tpu.memory_space<vmem>>, vector<10x16x128xbf16>
    %136 = vector.shape_cast %135 : vector<10x16x128xbf16> to vector<160x128xbf16>
    %137 = vector.extract_strided_slice %136 {offsets = [0, 0], sizes = [128, 128], strides = [1, 1]} : vector<160x128xbf16> to vector<128x128xbf16>
    %c7 = arith.constant 7 : index
    %c0_87 = arith.constant 0 : index
    %c0_88 = arith.constant 0 : index
    %138 = vector.load %arg2[%c7, %c0_87, %c0_88] : memref<19x128x128xbf16, #tpu.memory_space<vmem>>, vector<1x128x128xbf16>
    %139 = vector.shape_cast %138 : vector<1x128x128xbf16> to vector<128x128xbf16>
    %cst_89 = arith.constant dense<0.000000e+00> : vector<128x128xf32>
    %140 = tpu.matmul %137, %139, %cst_89 {dimension_numbers = #tpu.dot_dimension_numbers<[1], [0], [0], [1], [0, 0, 1, 1], [], []>} : vector<128x128xbf16>, vector<128x128xbf16>, vector<128x128xf32> -> vector<128x128xf32>
    %141 = arith.addf %134, %140 : vector<128x128xf32>
    %142 = vector.extract_strided_slice %136 {offsets = [16, 0], sizes = [128, 128], strides = [1, 1]} : vector<160x128xbf16> to vector<128x128xbf16>
    %c10 = arith.constant 10 : index
    %c0_90 = arith.constant 0 : index
    %c0_91 = arith.constant 0 : index
    %143 = vector.load %arg2[%c10, %c0_90, %c0_91] : memref<19x128x128xbf16, #tpu.memory_space<vmem>>, vector<1x128x128xbf16>
    %144 = vector.shape_cast %143 : vector<1x128x128xbf16> to vector<128x128xbf16>
    %cst_92 = arith.constant dense<0.000000e+00> : vector<128x128xf32>
    %145 = tpu.matmul %142, %144, %cst_92 {dimension_numbers = #tpu.dot_dimension_numbers<[1], [0], [0], [1], [0, 0, 1, 1], [], []>} : vector<128x128xbf16>, vector<128x128xbf16>, vector<128x128xf32> -> vector<128x128xf32>
    %146 = arith.addf %141, %145 : vector<128x128xf32>
    %147 = vector.extract_strided_slice %136 {offsets = [32, 0], sizes = [128, 128], strides = [1, 1]} : vector<160x128xbf16> to vector<128x128xbf16>
    %c13 = arith.constant 13 : index
    %c0_93 = arith.constant 0 : index
    %c0_94 = arith.constant 0 : index
    %148 = vector.load %arg2[%c13, %c0_93, %c0_94] : memref<19x128x128xbf16, #tpu.memory_space<vmem>>, vector<1x128x128xbf16>
    %149 = vector.shape_cast %148 : vector<1x128x128xbf16> to vector<128x128xbf16>
    %cst_95 = arith.constant dense<0.000000e+00> : vector<128x128xf32>
    %150 = tpu.matmul %147, %149, %cst_95 {dimension_numbers = #tpu.dot_dimension_numbers<[1], [0], [0], [1], [0, 0, 1, 1], [], []>} : vector<128x128xbf16>, vector<128x128xbf16>, vector<128x128xf32> -> vector<128x128xf32>
    %151 = arith.addf %146, %150 : vector<128x128xf32>
    %c0_96 = arith.constant 0 : index
    %c1_97 = arith.constant 1 : index
    %c0_98 = arith.constant 0 : index
    %152 = vector.load %arg8[%c0_96, %c1_97, %c0_98] : memref<8x18x128xbf16, #tpu.memory_space<vmem>>, vector<8x16x128xbf16>
    %153 = vector.shape_cast %152 : vector<8x16x128xbf16> to vector<128x128xbf16>
    %c16 = arith.constant 16 : index
    %c0_99 = arith.constant 0 : index
    %c0_100 = arith.constant 0 : index
    %154 = vector.load %arg2[%c16, %c0_99, %c0_100] : memref<19x128x128xbf16, #tpu.memory_space<vmem>>, vector<1x128x128xbf16>
    %155 = vector.shape_cast %154 : vector<1x128x128xbf16> to vector<128x128xbf16>
    %cst_101 = arith.constant dense<0.000000e+00> : vector<128x128xf32>
    %156 = tpu.matmul %153, %155, %cst_101 {dimension_numbers = #tpu.dot_dimension_numbers<[1], [0], [0], [1], [0, 0, 1, 1], [], []>} : vector<128x128xbf16>, vector<128x128xbf16>, vector<128x128xf32> -> vector<128x128xf32>
    %157 = arith.addf %151, %156 : vector<128x128xf32>
    %c0_102 = arith.constant 0 : index
    %c2_103 = arith.constant 2 : index
    %c0_104 = arith.constant 0 : index
    %158 = vector.load %arg7[%c0_102, %c2_103, %c0_104] : memref<10x18x128xbf16, #tpu.memory_space<vmem>>, vector<10x16x128xbf16>
    %159 = vector.shape_cast %158 : vector<10x16x128xbf16> to vector<160x128xbf16>
    %160 = vector.extract_strided_slice %159 {offsets = [0, 0], sizes = [128, 128], strides = [1, 1]} : vector<160x128xbf16> to vector<128x128xbf16>
    %c8 = arith.constant 8 : index
    %c0_105 = arith.constant 0 : index
    %c0_106 = arith.constant 0 : index
    %161 = vector.load %arg2[%c8, %c0_105, %c0_106] : memref<19x128x128xbf16, #tpu.memory_space<vmem>>, vector<1x128x128xbf16>
    %162 = vector.shape_cast %161 : vector<1x128x128xbf16> to vector<128x128xbf16>
    %cst_107 = arith.constant dense<0.000000e+00> : vector<128x128xf32>
    %163 = tpu.matmul %160, %162, %cst_107 {dimension_numbers = #tpu.dot_dimension_numbers<[1], [0], [0], [1], [0, 0, 1, 1], [], []>} : vector<128x128xbf16>, vector<128x128xbf16>, vector<128x128xf32> -> vector<128x128xf32>
    %164 = arith.addf %157, %163 : vector<128x128xf32>
    %165 = vector.extract_strided_slice %159 {offsets = [16, 0], sizes = [128, 128], strides = [1, 1]} : vector<160x128xbf16> to vector<128x128xbf16>
    %c11 = arith.constant 11 : index
    %c0_108 = arith.constant 0 : index
    %c0_109 = arith.constant 0 : index
    %166 = vector.load %arg2[%c11, %c0_108, %c0_109] : memref<19x128x128xbf16, #tpu.memory_space<vmem>>, vector<1x128x128xbf16>
    %167 = vector.shape_cast %166 : vector<1x128x128xbf16> to vector<128x128xbf16>
    %cst_110 = arith.constant dense<0.000000e+00> : vector<128x128xf32>
    %168 = tpu.matmul %165, %167, %cst_110 {dimension_numbers = #tpu.dot_dimension_numbers<[1], [0], [0], [1], [0, 0, 1, 1], [], []>} : vector<128x128xbf16>, vector<128x128xbf16>, vector<128x128xf32> -> vector<128x128xf32>
    %169 = arith.addf %164, %168 : vector<128x128xf32>
    %170 = vector.extract_strided_slice %159 {offsets = [32, 0], sizes = [128, 128], strides = [1, 1]} : vector<160x128xbf16> to vector<128x128xbf16>
    %c14 = arith.constant 14 : index
    %c0_111 = arith.constant 0 : index
    %c0_112 = arith.constant 0 : index
    %171 = vector.load %arg2[%c14, %c0_111, %c0_112] : memref<19x128x128xbf16, #tpu.memory_space<vmem>>, vector<1x128x128xbf16>
    %172 = vector.shape_cast %171 : vector<1x128x128xbf16> to vector<128x128xbf16>
    %cst_113 = arith.constant dense<0.000000e+00> : vector<128x128xf32>
    %173 = tpu.matmul %170, %172, %cst_113 {dimension_numbers = #tpu.dot_dimension_numbers<[1], [0], [0], [1], [0, 0, 1, 1], [], []>} : vector<128x128xbf16>, vector<128x128xbf16>, vector<128x128xf32> -> vector<128x128xf32>
    %174 = arith.addf %169, %173 : vector<128x128xf32>
    %c0_114 = arith.constant 0 : index
    %c2_115 = arith.constant 2 : index
    %c0_116 = arith.constant 0 : index
    %175 = vector.load %arg8[%c0_114, %c2_115, %c0_116] : memref<8x18x128xbf16, #tpu.memory_space<vmem>>, vector<8x16x128xbf16>
    %176 = vector.shape_cast %175 : vector<8x16x128xbf16> to vector<128x128xbf16>
    %c17 = arith.constant 17 : index
    %c0_117 = arith.constant 0 : index
    %c0_118 = arith.constant 0 : index
    %177 = vector.load %arg2[%c17, %c0_117, %c0_118] : memref<19x128x128xbf16, #tpu.memory_space<vmem>>, vector<1x128x128xbf16>
    %178 = vector.shape_cast %177 : vector<1x128x128xbf16> to vector<128x128xbf16>
    %cst_119 = arith.constant dense<0.000000e+00> : vector<128x128xf32>
    %179 = tpu.matmul %176, %178, %cst_119 {dimension_numbers = #tpu.dot_dimension_numbers<[1], [0], [0], [1], [0, 0, 1, 1], [], []>} : vector<128x128xbf16>, vector<128x128xbf16>, vector<128x128xf32> -> vector<128x128xf32>
    %180 = arith.addf %174, %179 : vector<128x128xf32>
    %c2_120 = arith.constant 2 : index
    %c0_121 = arith.constant 0 : index
    %c0_122 = arith.constant 0 : index
    %181 = vector.load %arg4[%c2_120, %c0_121, %c0_122] : memref<4x1x128xf32, #tpu.memory_space<vmem>>, vector<1x1x128xf32>
    %182 = vector.shape_cast %181 : vector<1x1x128xf32> to vector<1x128xf32>
    %183 = vector.broadcast %182 : vector<1x128xf32> to vector<128x128xf32>
    %184 = arith.addf %180, %183 : vector<128x128xf32>
    %185 = arith.truncf %184 : vector<128x128xf32> to vector<128x128xbf16>
    %c18 = arith.constant 18 : index
    %c0_123 = arith.constant 0 : index
    %c0_124 = arith.constant 0 : index
    %186 = vector.load %arg2[%c18, %c0_123, %c0_124] : memref<19x128x128xbf16, #tpu.memory_space<vmem>>, vector<1x128x128xbf16>
    %187 = vector.shape_cast %186 : vector<1x128x128xbf16> to vector<128x128xbf16>
    %cst_125 = arith.constant dense<0.000000e+00> : vector<128x128xf32>
    %188 = tpu.matmul %185, %187, %cst_125 {dimension_numbers = #tpu.dot_dimension_numbers<[1], [0], [0], [1], [0, 0, 1, 1], [], []>} : vector<128x128xbf16>, vector<128x128xbf16>, vector<128x128xf32> -> vector<128x128xf32>
    %c3_126 = arith.constant 3 : index
    %c0_127 = arith.constant 0 : index
    %c0_128 = arith.constant 0 : index
    %189 = vector.load %arg4[%c3_126, %c0_127, %c0_128] : memref<4x1x128xf32, #tpu.memory_space<vmem>>, vector<1x1x128xf32>
    %190 = vector.shape_cast %189 : vector<1x1x128xf32> to vector<1x128xf32>
    %191 = vector.broadcast %190 : vector<1x128xf32> to vector<128x128xf32>
    %192 = arith.addf %188, %191 : vector<128x128xf32>
    %c0_129 = arith.constant 0 : index
    %c0_130 = arith.constant 0 : index
    %c0_131 = arith.constant 0 : index
    %c0_132 = arith.constant 0 : index
    %193 = vector.load %arg1[%c0_129, %c0_130, %c0_131, %c0_132] : memref<1x8x16x128xf32, #tpu.memory_space<vmem>>, vector<1x8x16x128xf32>
    %194 = vector.shape_cast %193 : vector<1x8x16x128xf32> to vector<8x16x128xf32>
    %195 = vector.shape_cast %194 : vector<8x16x128xf32> to vector<128x128xf32>
    %196 = arith.addf %192, %195 : vector<128x128xf32>
    %cst_133 = arith.constant 0.000000e+00 : f32
    %197 = vector.broadcast %cst_133 : f32 to vector<128x128xf32>
    %198 = arith.cmpf ogt, %196, %197 : vector<128x128xf32>
    %cst_134 = arith.constant 0.000000e+00 : f32
    %199 = vector.broadcast %cst_134 : f32 to vector<128x128xf32>
    %200 = arith.minimumf %196, %199 : vector<128x128xf32>
    %201 = math.exp %200 : vector<128x128xf32>
    %cst_135 = arith.constant 1.000000e+00 : f32
    %202 = vector.broadcast %cst_135 : f32 to vector<128x128xf32>
    %203 = arith.subf %201, %202 : vector<128x128xf32>
    %204 = arith.select %198, %196, %203 : vector<128x128xi1>, vector<128x128xf32>
    %c0_136 = arith.constant 0 : index
    %c0_137 = arith.constant 0 : index
    %c0_138 = arith.constant 0 : index
    %205 = vector.load %arg5[%c0_136, %c0_137, %c0_138] : memref<1x128x128xf32, #tpu.memory_space<vmem>>, vector<1x128x128xf32>
    %206 = vector.shape_cast %205 : vector<1x128x128xf32> to vector<128x128xf32>
    %207 = vector.shape_cast %204 : vector<128x128xf32> to vector<1x128x128xf32>
    tpu.vector_store %arg5[%c0_136, %c0_137, %c0_138], %207 {strides = array<i32>} : memref<1x128x128xf32, #tpu.memory_space<vmem>>, vector<1x128x128xf32>,
    return
  }
  func.func @transform_0(%arg0: i32) -> (i32, i32, i32, i32) {
    %c0_i32 = arith.constant 0 : i32
    %c0_i32_0 = arith.constant 0 : i32
    %c0_i32_1 = arith.constant 0 : i32
    %c0_i32_2 = arith.constant 0 : i32
    return %arg0, %c0_i32, %c0_i32_0, %c0_i32_1 : i32, i32, i32, i32
  }
  func.func @transform_1(%arg0: i32) -> (i32, i32, i32) {
    %c0_i32 = arith.constant 0 : i32
    %c0_i32_0 = arith.constant 0 : i32
    %c0_i32_1 = arith.constant 0 : i32
    %c0_i32_2 = arith.constant 0 : i32
    return %c0_i32, %c0_i32_0, %c0_i32_1 : i32, i32, i32
  }
  func.func @transform_2(%arg0: i32) -> (i32, i32, i32) {
    %c0_i32 = arith.constant 0 : i32
    %c0_i32_0 = arith.constant 0 : i32
    %c0_i32_1 = arith.constant 0 : i32
    %c0_i32_2 = arith.constant 0 : i32
    return %c0_i32, %c0_i32_0, %c0_i32_1 : i32, i32, i32
  }
  func.func @transform_3(%arg0: i32) -> (i32, i32, i32) {
    %c0_i32 = arith.constant 0 : i32
    %c0_i32_0 = arith.constant 0 : i32
    %c0_i32_1 = arith.constant 0 : i32
    %c0_i32_2 = arith.constant 0 : i32
    return %c0_i32, %c0_i32_0, %c0_i32_1 : i32, i32, i32
  }
  func.func @transform_4(%arg0: i32) -> (i32, i32, i32) {
    %c0_i32 = arith.constant 0 : i32
    %c0_i32_0 = arith.constant 0 : i32
    %c0_i32_1 = arith.constant 0 : i32
    return %arg0, %c0_i32, %c0_i32_0 : i32, i32, i32
  }
}

</mosaic_0001>

<bundles_post_ra>
// kernel: residual_block_forward.1
= control target key start
LH: loop header
LB: loop body
LE: loop exit
PB: predicated region body
PF: predicated region fallthrough
CT: control target
= control target key end

     0   :  { %s9170_s15 = smov 0   ;;  %s12044_s0 = inlined_call_operand.vmem [shape: f32[2,8,16,128], index: 0, kind: input, shape index: {}]   ;;  %s12045_s1 = inlined_call_operand.vmem [shape: bf16[19,128,128], index: 1, kind: input, shape index: {}]   ;;  %s12046_s2 = inlined_call_operand.vmem [shape: bf16[3,128,256], index: 2, kind: input, shape index: {}]   ;;  %s12047_s3 = inlined_call_operand.vmem [shape: f32[4,1,128], index: 3, kind: input, shape index: {}]   ;;  %s12048_s4 = inlined_call_operand.vmem [shape: f32[2,128,128], index: 4, kind: output, shape index: {}]  }
   0x1 LB: > { %s6922_s16 = sadd.s32 4294967295, %s9142_s15   ;;  %p6926_p0 = scmp.ge.s32.totalorder %s9142_s15, 1  ;;  %s9142_s15 = sphi %s9170_s15, %s14_s15  }
   0x2   : > { %p162_p1 = scmp.lt.s32.totalorder %s9142_s15, 3 }
   0x4   : > { %p163_p2 = pnand %p6926_p0, %p162_p1 }
   0x6   : > { %166 = sbr.rel (%p163_p2) target bundleno = 1148 (0x47c), region = 36 }
   0xb   : > { %v8784_v0 = vld [vmem:[%s12045_s1 + $0xf8] sm:$0xff]   ;;  %v8786_v2 = vld [vmem:[%s12045_s1 + $0xf0] sm:$0xff]   ;;  %p188_p3 = scmp.lt.s32.totalorder %s6922_s16, 1  ;;  %v8788_v4 = vld [vmem:[%s12045_s1 + $0xe8] sm:$0xff]   ;;  %vm231_vm0 = vcmask 1040384   ;;  %vm2041_vm4 = vcmask 1042432  }
   0xc   : > { %v8785_v1 = vld [vmem:[%s12045_s1 + $0x38] sm:$0xff]   ;;  %8151 = vmatprep.subr.bf16.mxu0 %v8784_v0  ;;  %v8787_v3 = vld [vmem:[%s12045_s1 + $0x30] sm:$0xff]   ;;  %v8789_v5 = vld [vmem:[%s12045_s1 + $0x28] sm:$0xff]   ;;  %vm1120_vm1 = vsmask.f32 3328  ;;  %vm2042_vm5 = vcmask 1046532  }
   0xd   : > { %8183 = vmatprep.subr.bf16.mxu1 %v8785_v1  ;;  %8152 = vmatpush3.bf16.msra.mxu0 %v8784_v0  ;;  %s12190_s16 = smov (!%p188_p3, %s6922_s16), 1  ;;  %v8790_v6 = vld [vmem:[%s12045_s1 + $0xe0] sm:$0xff]   ;;  %v8792_v8 = vld [vmem:[%s12045_s1 + $0xd8] sm:$0xff]   ;;  %v8794_v10 = vld [vmem:[%s12045_s1 + $0xd0] sm:$0xff]   ;;  %vm1121_vm2 = vsmask.f32 7440 }
   0xe   : > { %8184 = vmatpush3.bf16.msra.mxu1 %v8785_v1  ;;  %8153 = vmatprep.subr.bf16.mxu0 %v8786_v2  ;;  %v8791_v7 = vld [vmem:[%s12045_s1 + $0x20] sm:$0xff]   ;;  %s7692_s7 = sshll.u32 %s12190_s16, 7  ;;  %v8793_v9 = vld [vmem:[%s12045_s1 + $0x18] sm:$0xff]   ;;  %v8795_v11 = vld [vmem:[%s12045_s1 + $0x10] sm:$0xff]  }
   0xf   : > { %8185 = vmatprep.subr.bf16.mxu1 %v8787_v3  ;;  %s9216_s14 = scalar_lea.vmem %s12044_s0, %s7692_s7  ;;  %v8796_v25 = vld [vmem:[%s12045_s1 + $0xc8] sm:$0xff]   ;;  %v8798_v39 = vld [vmem:[%s12045_s1 + $0xc0] sm:$0xff]   ;;  %v8806_v63 = vld [vmem:[%s12046_s2 + $0x74] ss:$8 sps:$4 sm:$0xff]   ;;  %s11967_s12 = scalar_lea.vmem %s12048_s4, %s7692_s7 }
  0x10   : > { %v201_v12 = vld [vmem:[%s9216_s14 + $0x10] sm:$0xff]  ;;  %v202_v13 = vld [vmem:[%s9216_s14 + $0x18] sm:$0xff]  ;;  %v199_v14 = vld [vmem:[%s9216_s14] sm:$0xff] }
  0x11   : > { %8154 = vmatpush3.bf16.msra.mxu0 %v8786_v2  ;;  %v235_v15 = vrot.slane %v201_v12, 7  ;;  %v236_v16 = vrot.slane %v202_v13, 7  ;;  %v281_v17 = vrot.slane %v202_v13, 6  ;;  %v200_v18 = vld [vmem:[%s9216_s14 + $0x8] sm:$0xff]  ;;  %v232_v19 = vrot.slane %v199_v14, 7  ;;  %v203_v20 = vld [vmem:[%s9216_s14 + $0x20] sm:$0xff]  ;;  %vm9382_vm3 = vmor %vm1120_vm1, %vm1121_vm2 }
  0x12   : > { %8186 = vmatpush3.bf16.msra.mxu1 %v8787_v3  ;;  %8155 = vmatprep.subr.bf16.mxu0 %v8788_v4  ;;  %v233_v21 = vrot.slane %v200_v18, 7  ;;  %v280_v22 = vrot.slane %v200_v18, 6  ;;  %v204_v23 = vld [vmem:[%s9216_s14 + $0x28] sm:$0xff]  ;;  %v238_v24 = vrot.slane %v203_v20, 7  ;;  %v205_v46 = vld [vmem:[%s9216_s14 + $0x30] sm:$0xff]  ;;  %v206_v47 = vld [vmem:[%s9216_s14 + $0x38] sm:$0xff] }
  0x13   : > { %8187 = vmatprep.subr.bf16.mxu1 %v8789_v5  ;;  %v237_v26 = vsel %vm231_vm0, %v235_v15, %v236_v16  ;;  %v297_v27 = vsel %vm231_vm0, %v201_v12, %v235_v15  ;;  %v296_v28 = vsel %vm231_vm0, %v199_v14, %v232_v19  ;;  %v239_v29 = vrot.slane %v204_v23, 7  ;;  %v8797_v34 = vld [vmem:[%s12045_s1 + $0x8] sm:$0xff]   ;;  %v207_v48 = vld [vmem:[%s9216_s14 + $0x40] sm:$0xff]  ;;  %v8811_v15 = vld [vmem:[%s12045_s1 + $0x70] sm:$0xff]  }
  0x14   : > { %v7774_v30 = vpack.c.bf16 %v237_v26, %v297_v27  ;;  %v234_v31 = vsel %vm231_vm0, %v232_v19, %v233_v21  ;;  %v304_v32 = vsel %vm231_vm0, %v233_v21, %v280_v22  ;;  %v282_v33 = vrot.slane %v204_v23, 6  ;;  %v208_v53 = vld [vmem:[%s9216_s14 + $0x48] sm:$0xff]  ;;  %v8799_v55 = vld [vmem:[%s12045_s1] sm:$0xff]   ;;  %v8816_v23 = vld [vmem:[%s12046_s2 + $0x54] ss:$8 sps:$4 sm:$0xff]  }
  0x15   : > { %8156 = vmatpush3.bf16.msra.mxu0 %v8788_v4  ;;  %v7694_v35 = vpack.c.bf16 %v296_v28, %v296_v28  ;;  %v7695_v36 = vpack.c.bf16 %v234_v31, %v234_v31  ;;  %v7696_v37 = vpack.c.bf16 %v304_v32, %v304_v32  ;;  %v7769_v38 = vpack.c.bf16 %v234_v31, %v296_v28  ;;  %v8807_v4 = vld [vmem:[%s12045_s1 + $0x78] sm:$0xff]   ;;  %v8808_v14 = vld [vmem:[%s12046_s2 + $0x60] ss:$8 sps:$4 sm:$0xff]   ;;  %vm9529_vm6 = vmor %vm2041_vm4, %vm2042_vm5 }
  0x16   : > { %8188 = vmatpush3.bf16.msra.mxu1 %v8789_v5  ;;  %8157 = vmatprep.subr.bf16.mxu0 %v8790_v6  ;;  %7836 = vst [vmem:[#allocation2 + $0x18] sm:$0xff] %v7774_v30   ;;  %v240_v40 = vsel %vm231_vm0, %v238_v24, %v239_v29  ;;  %v298_v41 = vsel %vm231_vm0, %v203_v20, %v238_v24  ;;  %v241_v50 = vrot.slane %v205_v46, 7  ;;  %v242_v51 = vrot.slane %v206_v47, 7  ;;  %v211_v21 = vld [vmem:[%s9216_s14 + $0x60] sm:$0xff]  ;;  %v212_v22 = vld [vmem:[%s9216_s14 + $0x68] sm:$0xff] }
  0x17   : > { %8189 = vmatprep.subr.bf16.mxu1 %v8791_v7  ;;  %v305_v42 = vsel %vm231_vm0, %v236_v16, %v281_v17  ;;  %v306_v43 = vsel %vm231_vm0, %v239_v29, %v282_v33  ;;  %7770 = vst [vmem:[#allocation2] sm:$0xff] %v7769_v38   ;;  %419 = vst [vmem:[#allocation2 + $0xc] sm:$0xf] %v7694_v35  ;;  %v7700_v44 = vpack.c.bf16 %v298_v41, %v298_v41  ;;  %v209_v16 = vld [vmem:[%s9216_s14 + $0x50] sm:$0xff]  ;;  %v210_v17 = vld [vmem:[%s9216_s14 + $0x58] sm:$0xff] }
  0x18   : > { %420 = vst [vmem:[#allocation2 + $0x10] sm:$0xf] %v7695_v36  ;;  %421 = vst [vmem:[#allocation2 + $0x14] sm:$0x1] %v7696_v37  ;;  %v7701_v45 = vpack.c.bf16 %v240_v40, %v240_v40  ;;  %v7699_v49 = vpack.c.bf16 %v305_v42, %v305_v42  ;;  %v283_v52 = vrot.slane %v206_v47, 6  ;;  %v244_v54 = vrot.slane %v207_v48, 7 }
  0x19   : > { %8158 = vmatpush3.bf16.msra.mxu0 %v8790_v6  ;;  %418 = vst [vmem:[#allocation2 + $0x8] sm:$0x1] %v7696_v37  ;;  %425 = vst [vmem:[#allocation2 + $0x24] sm:$0xf] %v7700_v44  ;;  %v245_v56 = vrot.slane %v208_v53, 7  ;;  %v284_v57 = vrot.slane %v208_v53, 6  ;;  %v7702_v58 = vpack.c.bf16 %v306_v43, %v306_v43  ;;  %v243_v59 = vsel %vm231_vm0, %v241_v50, %v242_v51 }
  0x1a   : > { %8190 = vmatpush3.bf16.msra.mxu1 %v8791_v7  ;;  %8159 = vmatprep.subr.bf16.mxu0 %v8792_v8  ;;  %426 = vst [vmem:[#allocation2 + $0x28] sm:$0xf] %v7701_v45  ;;  %424 = vst [vmem:[#allocation2 + $0x20] sm:$0x1] %v7699_v49  ;;  %v299_v60 = vsel %vm231_vm0, %v205_v46, %v241_v50  ;;  %v300_v61 = vsel %vm231_vm0, %v207_v48, %v244_v54  ;;  %v247_v18 = vrot.slane %v209_v16, 7  ;;  %v8817_v31 = vld [vmem:[%s12045_s1 + $0x68] sm:$0xff]  }
  0x1b   : > { %8191 = vmatprep.subr.bf16.mxu1 %v8793_v9  ;;  %v307_v62 = vsel %vm231_vm0, %v242_v51, %v283_v52  ;;  %v7779_v0 = vpack.c.bf16 %v243_v59, %v299_v60  ;;  %v246_v1 = vsel %vm231_vm0, %v244_v54, %v245_v56  ;;  %v7706_v2 = vpack.c.bf16 %v300_v61, %v300_v61  ;;  %v8814_v40 = vld [vmem:[%s12046_s2 + $0x50] ss:$8 sps:$4 sm:$0xff]   ;;  %v8820_v42 = vld [vmem:[%s12046_s2 + $0x44] ss:$8 sps:$4 sm:$0xff]   ;;  %v8818_v47 = vld [vmem:[%s12046_s2 + $0x40] ss:$8 sps:$4 sm:$0xff]  }
  0x1c   : > { %427 = vst [vmem:[#allocation2 + $0x2c] sm:$0x1] %v7702_v58  ;;  %v7705_v3 = vpack.c.bf16 %v307_v62, %v307_v62  ;;  %v7707_v5 = vpack.c.bf16 %v246_v1, %v246_v1  ;;  %v308_v6 = vsel %vm231_vm0, %v245_v56, %v284_v57  ;;  %v248_v19 = vrot.slane %v210_v17, 7  ;;  %v8821_v43 = vld [vmem:[%s12045_s1 + $0x60] sm:$0xff]   ;;  %v213_v44 = vld [vmem:[%s9216_s14 + $0x70] sm:$0xff]  ;;  %v214_v45 = vld [vmem:[%s9216_s14 + $0x78] sm:$0xff] }
  0x1d   : > { %8160 = vmatpush3.bf16.msra.mxu0 %v8792_v8  ;;  %v9267_v7 = vld [vmem:[#allocation2 + $0x18] sm:$0xff]   ;;  %7837 = vst [vmem:[#allocation2 + $0x30] sm:$0xff] %v7779_v0   ;;  %431 = vst [vmem:[#allocation2 + $0x3c] sm:$0xf] %v7706_v2  ;;  %v285_v20 = vrot.slane %v210_v17, 6  ;;  %v250_v24 = vrot.slane %v211_v21, 7  ;;  %v301_v29 = vsel %vm231_vm0, %v209_v16, %v247_v18 }
  0x1e   : > { %8192 = vmatpush3.bf16.msra.mxu1 %v8793_v9  ;;  %8161 = vmatprep.subr.bf16.mxu0 %v8794_v10  ;;  %v8804_v8 = vld [vmem:[%s12046_s2 + $0x70] ss:$8 sps:$4 sm:$0xff]   ;;  %430 = vst [vmem:[#allocation2 + $0x38] sm:$0x1] %v7705_v3  ;;  %v7708_v9 = vpack.c.bf16 %v308_v6, %v308_v6  ;;  %432 = vst [vmem:[#allocation2 + $0x40] sm:$0xf] %v7707_v5  ;;  %v249_v28 = vsel %vm231_vm0, %v247_v18, %v248_v19 }
  0x1f   : > { %8193 = vmatprep.subr.bf16.mxu1 %v8795_v11  ;;  %8167 = vmatprep.mubr.bf16.mxu0 %v9267_v7  ;;  %v9276_v12 = vld [vmem:[#allocation2 + $0xc] sm:$0xff]   ;;  %v286_v26 = vrot.slane %v212_v22, 6  ;;  %v309_v30 = vsel %vm231_vm0, %v248_v19, %v285_v20  ;;  %v7784_v32 = vpack.c.bf16 %v249_v28, %v301_v29  ;;  %v253_v46 = vrot.slane %v213_v44, 7  ;;  %v8826_v50 = vld [vmem:[%s12046_s2 + $0x34] ss:$8 sps:$4 sm:$0xff]  }
  0x20   : > { %433 = vst [vmem:[#allocation2 + $0x44] sm:$0x1] %v7708_v9  ;;  %v7711_v38 = vpack.c.bf16 %v309_v30, %v309_v30  ;;  %v254_v48 = vrot.slane %v214_v45, 7  ;;  %v287_v49 = vrot.slane %v214_v45, 6  ;;  %v8824_v52 = vld [vmem:[%s12046_s2 + $0x30] ss:$8 sps:$4 sm:$0xff]  }
  0x21   : > { %8162 = vmatpush3.bf16.msra.mxu0 %v8794_v10  ;;  %v8801_v10 = vld [vmem:[#allocation2] sm:$0xff]   ;;  %7838 = vst [vmem:[#allocation2 + $0x48] sm:$0xff] %v7784_v32   ;;  %v303_v51 = vsel %vm231_vm0, %v213_v44, %v253_v46  ;;  %v8827_v53 = vld [vmem:[%s12045_s1 + $0x58] sm:$0xff]   ;;  %v8831_v0 = vld [vmem:[%s12045_s1 + $0x50] sm:$0xff]   ;;  %v12059_v28 = vmov 0 }
  0x22   : > { %8194 = vmatpush3.bf16.msra.mxu1 %v8795_v11  ;;  %8163 = vmatprep.subr.bf16.mxu0 %v8796_v25  ;;  %v8810_v11 = vld [vmem:[%s12046_s2 + $0x64] ss:$8 sps:$4 sm:$0xff]   ;;  %436 = vst [vmem:[#allocation2 + $0x50] sm:$0x1] %v7711_v38  ;;  %v255_v54 = vsel %vm231_vm0, %v253_v46, %v254_v48  ;;  %v311_v56 = vsel %vm231_vm0, %v254_v48, %v287_v49  ;;  %v1090_v1 = vld [vmem:[#allocation2] sm:$0xf] }
  0x23   : > { %8195 = vmatprep.subr.bf16.mxu1 %v8797_v34  ;;  %8199 = vmatprep.mubr.bf16.mxu1 %v8801_v10  ;;  %v9278_v13 = vld [vmem:[#allocation2 + $0x24] sm:$0xff]   ;;  %v7789_v58 = vpack.c.bf16 %v255_v54, %v303_v51  ;;  %v7716_v59 = vpack.c.bf16 %v255_v54, %v255_v54  ;;  %v7717_v60 = vpack.c.bf16 %v311_v56, %v311_v56  ;;  %v8836_v3 = vld [vmem:[%s12046_s2 + $0x14] ss:$8 sps:$4 sm:$0xff]   ;;  %v1124_v5 = vshrl.u32 %v1090_v1, 16  ;;  %v9407_v54 = vld [vmem:[#allocation2 + $0x20] sm:$0x1] }
  0x24   : > { %v9295_v27 = vld [vmem:[#allocation2 + $0x30] sm:$0xff]   ;;  %v8830_v62 = vld [vmem:[%s12046_s2 + $0x24] ss:$8 sps:$4 sm:$0xff]   ;;  %v1127_v6 = vshll.u32 %v1090_v1, 16  ;;  %v12060_v28 = vsel %vm9382_vm3, 4294967295, %v12059_v28  ;;  %v1191_v1 = vshll.u32 %v9407_v54, 16 }
  0x25   : > { %8164 = vmatpush3.bf16.msra.mxu0 %v8796_v25  ;;  %v251_v25 = vrot.slane %v212_v22, 7  ;;  %v9307_v35 = vld [vmem:[#allocation2 + $0x3c] sm:$0xff]   ;;  %7839 = vst [vmem:[#allocation2 + $0x60] sm:$0xff] %v7789_v58   ;;  %444 = vst [vmem:[#allocation2 + $0x70] sm:$0xf] %v7716_v59  ;;  %v8837_v10 = vld [vmem:[%s12045_s1 + $0x48] sm:$0xff]  }
  0x26   : > { %8196 = vmatpush3.bf16.msra.mxu1 %v8797_v34  ;;  %8165 = vmatprep.subr.bf16.mxu0 %v8798_v39  ;;  %v302_v34 = vsel %vm231_vm0, %v211_v21, %v250_v24  ;;  %442 = vst [vmem:[#allocation2 + $0x68] sm:$0x1] %v7717_v60  ;;  %445 = vst [vmem:[#allocation2 + $0x74] sm:$0x1] %v7717_v60  ;;  %v9353_v2 = vld [vmem:[#allocation2 + $0x4] sm:$0xf] }
  0x27   : > { %8197 = vmatprep.subr.bf16.mxu1 %v8799_v55  ;;  %v252_v33 = vsel %vm231_vm0, %v250_v24, %v251_v25  ;;  %v7712_v36 = vpack.c.bf16 %v302_v34, %v302_v34  ;;  %v1137_v9 = vshrl.u32 %v9353_v2, 16  ;;  %v1126_v16 = vrot.slane %v1124_v5, 4  ;;  %v9370_v20 = vld [vmem:[#allocation2 + $0x14] sm:$0x1]  ;;  %v8834_v21 = vld [vmem:[%s12046_s2 + $0x10] ss:$8 sps:$4 sm:$0xff]  }
  0x28   : > { %v7713_v37 = vpack.c.bf16 %v252_v33, %v252_v33  ;;  %v9339_v57 = vld [vmem:[#allocation2 + $0x48] sm:$0xff]   ;;  %v1129_v17 = vrot.slane %v1127_v6, 5  ;;  %12061 = vst [vmem:[#allocation5_spill] sm:$0xff] %v12060_v28  ;;  %v1167_v32 = vshll.u32 %v9370_v20, 16  ;;  %v8845_v48 = vld [vmem:[%s12046_s2 + $0xf4] ss:$8 sps:$4 sm:$0xff]  }
  0x29   : > { %8166 = vmatpush3.bf16.msra.mxu0 %v8798_v39  ;;  %v310_v39 = vsel %vm231_vm0, %v251_v25, %v286_v26  ;;  %437 = vst [vmem:[#allocation2 + $0x54] sm:$0xf] %v7712_v36  ;;  %v1139_v19 = vrot.slane %v1137_v9, 4  ;;  %v8840_v26 = vld [vmem:[%s12046_s2 + $0x4] ss:$8 sps:$4 sm:$0xff]   ;;  %v9144_v59 = vmov 0  }
  0x2a   : > { %8198 = vmatpush3.bf16.msra.mxu1 %v8799_v55  ;;  %945 = vmatprep.subr.bf16.mxu0 %v8806_v63  ;;  %v7714_v41 = vpack.c.bf16 %v310_v39, %v310_v39  ;;  %438 = vst [vmem:[#allocation2 + $0x58] sm:$0xf] %v7713_v37  ;;  %v7715_v55 = vpack.c.bf16 %v303_v51, %v303_v51  ;;  %v8828_v63 = vld [vmem:[%s12046_s2 + $0x20] ss:$8 sps:$4 sm:$0xff]   ;;  %v1096_v51 = vld [vmem:[#allocation2 + $0x18] sm:$0xf] }
  0x2b   : > { %8215 = vmatprep.subr.bf16.mxu1 %v8807_v4  ;;  %v1130_v29 = vor.u32 %v1129_v17, %v1126_v16  ;;  %v1175_v56 = vshll.u32 %v1096_v51, 16  ;;  %v1193_v16 = vrot.slane %v1191_v1, 5  ;;  %v9425_v17 = vld [vmem:[#allocation2 + $0x2c] sm:$0x1]  ;;  %v9462_v1 = vld [vmem:[#allocation2 + $0x44] sm:$0x1] }
  0x2c   : > { %8168 = vmatmul.mubr.bf16.vlgmr.msra.gmra.mxu0 %v9278_v13  ;;  %439 = vst [vmem:[#allocation2 + $0x5c] sm:$0x1] %v7714_v41  ;;  %443 = vst [vmem:[#allocation2 + $0x6c] sm:$0xf] %v7715_v55  ;;  %v9388_v33 = vld [vmem:[#allocation2 + $0x60] sm:$0xff]   ;;  %v1172_v55 = vshrl.u32 %v1096_v51, 16 }
  0x2d   : > { %8200 = vmatmul.mubr.bf16.vlgmr.msra.gmra.mxu1 %v9276_v12  ;;  %946 = vmatpush1.bf16.msra.mxu0 %v8804_v8  ;;  %v1133_v8 = vshll.u32 %v9353_v2, 16  ;;  %v1131_v37 = vrot.slane %v1130_v29, 4  ;;  %v8841_v41 = vld [vmem:[%s12045_s1 + $0x40] sm:$0xff]  }
  0x2e   : > { %8216 = vmatpush3.bf16.msra.mxu1 %v8807_v4  ;;  %947 = vmatprep.subr.bf16.mxu0 %v8810_v11  ;;  %v9359_v4 = vld [vmem:[#allocation2 + $0x8] sm:$0x1]  ;;  %v1174_v6 = vrot.slane %v1172_v55, 4 }
  0x2f   : > { %8217 = vmatprep.subr.bf16.mxu1 %v8811_v15  ;;  %8203 = vmatprep.mubr.bf16.mxu1 %v9267_v7  ;;  %v1143_v11 = vshll.u32 %v9359_v4, 16  ;;  %v1135_v18 = vrot.slane %v1133_v8, 5  ;;  %v1177_v8 = vrot.slane %v1175_v56, 5 }
  0x30   : > { %8171 = vmatprep.mubr.bf16.mxu0 %v9295_v27 }
  0x31   : > { %948 = vmatpush1.bf16.msra.mxu0 %v8808_v14  ;;  %v9341_v61 = vld [vmem:[#allocation2 + $0x54] sm:$0xff]   ;;  %v1093_v14 = vld [vmem:[#allocation2 + $0xc] sm:$0xf]  ;;  %v1145_v22 = vrot.slane %v1143_v11, 5  ;;  %v1140_v30 = vor.u32 %v1139_v19, %v1135_v18  ;;  %v1136_v44 = vsel %vm9382_vm3, %v1131_v37, %v1135_v18 }
  0x32   : > { %8218 = vmatpush3.bf16.msra.mxu1 %v8811_v15  ;;  %949 = vmatprep.subr.bf16.mxu0 %v8816_v23  ;;  %v9368_v15 = vld [vmem:[#allocation2 + $0x10] sm:$0xf]  ;;  %v1148_v23 = vshrl.u32 %v1093_v14, 16  ;;  %v1151_v24 = vshll.u32 %v1093_v14, 16  ;;  %v8850_v37 = vld [vmem:[%s12046_s2 + $0xe4] ss:$8 sps:$4 sm:$0xff]  }
  0x33   : > { %8219 = vmatprep.subr.bf16.mxu1 %v8817_v31  ;;  %v1157_v25 = vshll.u32 %v9368_v15, 16  ;;  %v8833_v36 = vld [vmem:[#allocation2 + $0x6c] sm:$0xff]   ;;  %v1141_v38 = vrot.slane %v1140_v30, 4  ;;  %v1215_v30 = vshll.u32 %v9425_v17, 16 }
  0x34   : > { %8172 = vmatmul.mubr.bf16.gmra.mxu0 %v9307_v35  ;;  %v1150_v34 = vrot.slane %v1148_v23, 4  ;;  %v1153_v39 = vrot.slane %v1151_v24, 5  ;;  %v8846_v24 = vld [vmem:[%s12045_s1 + $0x130] sm:$0xff]  }
  0x35   : > { %8204 = vmatmul.mubr.bf16.gmra.mxu1 %v9278_v13  ;;  %950 = vmatpush1.bf16.msra.mxu0 %v8814_v40  ;;  %v8838_v40 = vld [vmem:[%s12046_s2] ss:$8 sps:$4 sm:$0xff]   ;;  %v1146_v45 = vsel %vm9382_vm3, %v1141_v38, %v1145_v22 }
  0x36   : > { %8220 = vmatpush3.bf16.msra.mxu1 %v8817_v31  ;;  %951 = vmatprep.subr.bf16.mxu0 %v8820_v42  ;;  %v1161_v31 = vshrl.u32 %v9368_v15, 16  ;;  %v1159_v42 = vrot.slane %v1157_v25, 5  ;;  %v1154_v46 = vor.u32 %v1153_v39, %v1150_v34  ;;  %v7029_v49 = vcombine.low %v1136_v44, %v1146_v45  ;;  %v9449_v44 = vld [vmem:[#allocation2 + $0x34] sm:$0xf] }
  0x37   : > { %8221 = vmatprep.subr.bf16.mxu1 %v8821_v43  ;;  %8207 = vmatprep.mubr.bf16.mxu1 %v9295_v27  ;;  %v1229_v55 = vshll.u32 %v9449_v44, 16  ;;  %v1233_v56 = vshrl.u32 %v9449_v44, 16 }
  0x38   : > { %8175 = vmatprep.mubr.bf16.mxu0 %v9339_v57 }
  0x39   : > { %952 = vmatpush1.bf16.msra.mxu0 %v8818_v47  ;;  %v1169_v47 = vrot.slane %v1167_v32, 5 }
  0x3a   : > { %8222 = vmatpush3.bf16.msra.mxu1 %v8821_v43  ;;  %953 = vmatprep.subr.bf16.mxu0 %v8826_v50  ;;  %v1163_v43 = vrot.slane %v1161_v31, 4  ;;  %v8848_v31 = vld [vmem:[%s12046_s2 + $0xe0] ss:$8 sps:$4 sm:$0xff]  }
  0x3b   : > { %8223 = vmatprep.subr.bf16.mxu1 %v8827_v53 }
  0x3c   : > { %8176 = vmatmul.mubr.bf16.gmra.mxu0 %v9341_v61  ;;  %v1164_v50 = vor.u32 %v1163_v43, %v1159_v42  ;;  %v1102_v43 = vld [vmem:[#allocation2 + $0x30] sm:$0xf] }
  0x3d   : > { %8208 = vmatmul.mubr.bf16.gmra.mxu1 %v9307_v35  ;;  %954 = vmatpush1.bf16.msra.mxu0 %v8824_v52  ;;  %v9405_v52 = vld [vmem:[#allocation2 + $0x1c] sm:$0xf] }
  0x3e   : > { %8224 = vmatpush3.bf16.msra.mxu1 %v8827_v53  ;;  %955 = vmatprep.subr.bf16.mxu0 %v8830_v62  ;;  %v1155_v53 = vrot.slane %v1154_v46, 4  ;;  %v1181_v58 = vshll.u32 %v9405_v52, 16  ;;  %v1165_v60 = vrot.slane %v1164_v50, 4  ;;  %v8842_v62 = vld [vmem:[%s12045_s1 + $0x138] sm:$0xff]  }
  0x3f   : > { %8225 = vmatprep.subr.bf16.mxu1 %v8831_v0  ;;  %8211 = vmatprep.mubr.bf16.mxu1 %v9339_v57  ;;  %v1105_v50 = vld [vmem:[#allocation2 + $0x3c] sm:$0xf] }
  0x40   : > { %8179 = vmatprep.mubr.bf16.mxu0 %v9388_v33  ;;  %v1160_v5 = vsel %vm9382_vm3, %v1155_v53, %v1159_v42  ;;  %v1183_v9 = vrot.slane %v1181_v58, 5  ;;  %v1170_v11 = vsel %vm9382_vm3, %v1165_v60, %v1169_v47  ;;  %v9453_v47 = vld [vmem:[#allocation2 + $0x38] sm:$0x1]  ;;  %v9459_v58 = vld [vmem:[#allocation2 + $0x40] sm:$0xf] }
  0x41   : > { %956 = vmatpush1.bf16.msra.mxu0 %v8828_v63  ;;  %v8843_v63 = vld [vmem:[%s12046_s2 + $0xf0] ss:$8 sps:$4 sm:$0xff]   ;;  %v9427_v19 = vcombine.low %v1160_v5, %v1170_v11  ;;  %v8851_v5 = vld [vmem:[%s12045_s1 + $0x120] sm:$0xff]  }
  0x42   : > { %8226 = vmatpush3.bf16.msra.mxu1 %v8831_v0  ;;  %957 = vmatprep.subr.bf16.mxu0 %v8836_v3  ;;  %v1185_v0 = vshrl.u32 %v9405_v52, 16  ;;  %v1099_v3 = vld [vmem:[#allocation2 + $0x24] sm:$0xf] }
  0x43   : > { %8227 = vmatprep.subr.bf16.mxu1 %v8837_v10  ;;  %v1196_v18 = vshrl.u32 %v1099_v3, 16  ;;  %v1199_v22 = vshll.u32 %v1099_v3, 16 }
  0x44   : > { %8180 = vmatmul.mubr.bf16.gmra.mxu0 %v8833_v36  ;;  %v1187_v14 = vrot.slane %v1185_v0, 4  ;;  %v1239_v0 = vshll.u32 %v9453_v47, 16 }
  0x45   : > { %8212 = vmatmul.mubr.bf16.gmra.mxu1 %v9341_v61  ;;  %958 = vmatpush1.bf16.msra.mxu0 %v8834_v21  ;;  %v1178_v21 = vor.u32 %v1177_v8, %v1174_v6  ;;  %v1201_v34 = vrot.slane %v1199_v22, 5  ;;  %v1231_v6 = vrot.slane %v1229_v55, 5  ;;  %v1235_v8 = vrot.slane %v1233_v56, 4 }
  0x46   : > { %8228 = vmatpush3.bf16.msra.mxu1 %v8837_v10  ;;  %959 = vmatprep.subr.bf16.mxu0 %v8840_v26  ;;  %v9421_v10 = vld [vmem:[#allocation2 + $0x28] sm:$0xf]  ;;  %v1188_v25 = vor.u32 %v1187_v14, %v1183_v9  ;;  %v1198_v26 = vrot.slane %v1196_v18, 4  ;;  %v1247_v18 = vshll.u32 %v1105_v50, 16 }
  0x47   : > { %8229 = vmatprep.subr.bf16.mxu1 %v8841_v41  ;;  %977 = vmatprep.mubr.bf16.mxu0 %v9144_v59  ;;  %v1205_v23 = vshll.u32 %v9421_v10, 16  ;;  %v1209_v29 = vshrl.u32 %v9421_v10, 16  ;;  %v1179_v32 = vrot.slane %v1178_v21, 4  ;;  %v8853_v21 = vld [vmem:[%s12046_s2 + $0xd0] ss:$8 sps:$4 sm:$0xff]  }
  0x48   : > { %8231 = vmatprep.mubr.bf16.mxu1 %v7029_v49  ;;  %v1189_v38 = vrot.slane %v1188_v25, 4  ;;  %v1202_v42 = vor.u32 %v1201_v34, %v1198_v26  ;;  %v1223_v49 = vshll.u32 %v1102_v43, 16  ;;  %v1253_v25 = vshll.u32 %v9459_v58, 16  ;;  %v8855_v26 = vld [vmem:[%s12046_s2 + $0xd4] ss:$8 sps:$4 sm:$0xff]  }
  0x49   : > { %960 = vmatpush1.bf16.msra.mxu0 %v8838_v40  ;;  %v1207_v36 = vrot.slane %v1205_v23, 5  ;;  %v1211_v39 = vrot.slane %v1209_v29, 4  ;;  %v1217_v40 = vrot.slane %v1215_v30, 5  ;;  %v1236_v23 = vor.u32 %v1235_v8, %v1231_v6 }
  0x4a   : > { %8230 = vmatpush3.bf16.msra.mxu1 %v8841_v41  ;;  %1856 = vmatprep.subr.bf16.mxu0 %v8845_v48  ;;  %v8847_v41 = vld [vmem:[%s12045_s1 + $0x128] sm:$0xff]   ;;  %v1194_v45 = vsel %vm9382_vm3, %v1189_v38, %v1193_v16  ;;  %v1220_v48 = vshrl.u32 %v1102_v43, 16  ;;  %v1203_v53 = vrot.slane %v1202_v42, 4  ;;  %v1241_v16 = vrot.slane %v1239_v0, 5  ;;  %v9490_v42 = vld [vmem:[#allocation2 + $0x50] sm:$0x1] }
  0x4b   : > { %8247 = vmatprep.subr.bf16.mxu1 %v8842_v62  ;;  %v1212_v46 = vor.u32 %v1211_v39, %v1207_v36  ;;  %v1249_v30 = vrot.slane %v1247_v18, 5  ;;  %v1255_v34 = vrot.slane %v1253_v25, 5 }
  0x4c   : > { %978 = vmatmul.mubr.bf16.vlgmr.msra.gmra.mxu0 %v9276_v12  ;;  %v1184_v12 = vsel %vm9382_vm3, %v1179_v32, %v1183_v9  ;;  %v1208_v3 = vsel %vm9382_vm3, %v1203_v53, %v1207_v36  ;;  %v1244_v9 = vshrl.u32 %v1105_v50, 16  ;;  %v1237_v32 = vrot.slane %v1236_v23, 4  ;;  %v1108_v36 = vld [vmem:[#allocation2 + $0x48] sm:$0xf] }
  0x4d   : > { %8232 = vmatmul.mubr.bf16.vlgmr.msra.gmra.mxu1 %v9427_v19  ;;  %1857 = vmatpush1.bf16.msra.mxu0 %v8843_v63  ;;  %v9455_v51 = vcombine.low %v1184_v12, %v1194_v45  ;;  %v1213_v60 = vrot.slane %v1212_v46, 4  ;;  %v1225_v63 = vrot.slane %v1223_v49, 5  ;;  %v8852_v45 = vld [vmem:[%s12045_s1 + $0x118] sm:$0xff]   ;;  %v1268_v46 = vshrl.u32 %v1108_v36, 16  ;;  %v1111_v49 = vld [vmem:[#allocation2 + $0x54] sm:$0xf] }
  0x4e   : > { %8248 = vmatpush3.bf16.msra.mxu1 %v8842_v62  ;;  %987 = vmatprep.mubr.bf16.mxu0 %v9144_v59  ;;  %v1222_v62 = vrot.slane %v1220_v48, 4  ;;  %v1242_v43 = vsel %vm9382_vm3, %v1237_v32, %v1241_v16  ;;  %v1271_v48 = vshll.u32 %v1108_v36, 16  ;;  %v1292_v16 = vshrl.u32 %v1111_v49, 16 }
  0x4f   : > { %8249 = vmatprep.subr.bf16.mxu1 %v8846_v24  ;;  %1858 = vmatprep.subr.bf16.mxu0 %v8850_v37  ;;  %v1218_v11 = vsel %vm9382_vm3, %v1213_v60, %v1217_v40  ;;  %v9486_v37 = vld [vmem:[#allocation2 + $0x4c] sm:$0xf]  ;;  %v9501_v60 = vld [vmem:[#allocation2 + $0x58] sm:$0xf]  ;;  %v1295_v23 = vshll.u32 %v1111_v49, 16 }
  0x50   : > { %8235 = vmatprep.mubr.bf16.mxu1 %v9455_v51  ;;  %v1226_v14 = vor.u32 %v1225_v63, %v1222_v62  ;;  %v9476_v22 = vcombine.low %v1208_v3, %v1218_v11  ;;  %v1281_v56 = vshrl.u32 %v9486_v37, 16  ;;  %v1270_v62 = vrot.slane %v1268_v46, 4  ;;  %v8856_v11 = vld [vmem:[%s12045_s1 + $0x110] sm:$0xff]   ;;  %v8857_v49 = vld [vmem:[%s12045_s1 + $0x108] sm:$0xff]  }
  0x51   : > { %1859 = vmatpush1.bf16.msra.mxu0 %v8848_v31  ;;  %v1257_v31 = vshrl.u32 %v9459_v58, 16  ;;  %v1273_v63 = vrot.slane %v1271_v48, 5  ;;  %v1287_v3 = vshll.u32 %v9490_v42, 16  ;;  %v1297_v32 = vrot.slane %v1295_v23, 5 }
  0x52   : > { %8250 = vmatpush3.bf16.msra.mxu1 %v8846_v24  ;;  %v1246_v24 = vrot.slane %v1244_v9, 4  ;;  %v1227_v29 = vrot.slane %v1226_v14, 4  ;;  %1860 = vmatprep.subr.bf16.mxu0 %v8855_v26  ;;  %v1283_v14 = vrot.slane %v1281_v56, 4  ;;  %v8862_v56 = vld [vmem:[%s12046_s2 + $0xb0] ss:$8 sps:$4 sm:$0xff]  }
  0x53   : > { %8251 = vmatprep.subr.bf16.mxu1 %v8847_v41  ;;  %v1259_v40 = vrot.slane %v1257_v31, 4  ;;  %v1274_v18 = vor.u32 %v1273_v63, %v1270_v62  ;;  %v2046_v62 = vrot.slane %v9353_v2, 5 }
  0x54   : > { %988 = vmatmul.mubr.bf16.gmra.mxu0 %v9267_v7  ;;  %v1263_v7 = vshll.u32 %v9462_v1, 16  ;;  %v1232_v38 = vsel %vm9382_vm3, %v1227_v29, %v1231_v6  ;;  %v1250_v39 = vor.u32 %v1249_v30, %v1246_v24  ;;  %v9504_v6 = vld [vmem:[#allocation2 + $0x5c] sm:$0x1]  ;;  %v8858_v24 = vld [vmem:[%s12046_s2 + $0xc0] ss:$8 sps:$4 sm:$0xff]   ;;  %v1294_v29 = vrot.slane %v1292_v16, 4 }
  0x55   : > { %997 = vmatprep.mubr.bf16.mxu0 %v9144_v59  ;;  %8236 = vmatmul.mubr.bf16.gmra.mxu1 %v9476_v22  ;;  %v9498_v50 = vcombine.low %v1232_v38, %v1242_v43  ;;  %v1260_v55 = vor.u32 %v1259_v40, %v1255_v34  ;;  %v1305_v30 = vshrl.u32 %v9501_v60, 16  ;;  %v12062_v40 = vmov 0 }
  0x56   : > { %8252 = vmatpush3.bf16.msra.mxu1 %v8847_v41  ;;  %v1265_v12 = vrot.slane %v1263_v7, 5  ;;  %1861 = vmatpush1.bf16.msra.mxu0 %v8853_v21  ;;  %v1277_v41 = vshll.u32 %v9486_v37, 16  ;;  %v1251_v53 = vrot.slane %v1250_v39, 4  ;;  %v1289_v21 = vrot.slane %v1287_v3, 5  ;;  %v8869_v3 = vld [vmem:[%s12046_s2 + $0xa4] ss:$8 sps:$4 sm:$0xff]  }
  0x57   : > { %8253 = vmatprep.subr.bf16.mxu1 %v8851_v5  ;;  %8239 = vmatprep.mubr.bf16.mxu1 %v9498_v50  ;;  %v1261_v9 = vrot.slane %v1260_v55, 4  ;;  %v1275_v7 = vrot.slane %v1274_v18, 4  ;;  %v1307_v38 = vrot.slane %v1305_v30, 4  ;;  %v1311_v39 = vshll.u32 %v9504_v6, 16  ;;  %v9592_v30 = vld [vmem:[#allocation2 + $0x68] sm:$0x1] }
  0x58   : > { %v1279_v0 = vrot.slane %v1277_v41, 5  ;;  %v1256_v8 = vsel %vm9382_vm3, %v1251_v53, %v1255_v34  ;;  %v12063_v40 = vsel %vm9529_vm6, 4294967295, %v12062_v40  ;;  %v1298_v43 = vor.u32 %v1297_v32, %v1294_v29  ;;  %v9590_v29 = vld [vmem:[#allocation2 + $0x64] sm:$0xf] }
  0x59   : > { %v1266_v25 = vsel %vm9382_vm3, %v1261_v9, %v1265_v12  ;;  %12064 = vst [vmem:[#allocation6_spill] sm:$0xff] %v12063_v40  ;;  %v1313_v41 = vrot.slane %v1311_v39, 5  ;;  %v2053_v16 = vrot.slane %v9368_v15, 5  ;;  %v1325_v32 = vshll.u32 %v9590_v29, 16 }
  0x5a   : > { %8254 = vmatpush3.bf16.msra.mxu1 %v8851_v5  ;;  %v1301_v5 = vshll.u32 %v9501_v60, 16  ;;  %v1284_v26 = vor.u32 %v1283_v14, %v1279_v0  ;;  %v9524_v31 = vcombine.low %v1256_v8, %v1266_v25  ;;  %v1280_v12 = vsel %vm9382_vm3, %v1275_v7, %v1279_v0  ;;  %v8861_v0 = vld [vmem:[%s12045_s1 + $0x100] sm:$0xff]  }
  0x5b   : > { %8255 = vmatprep.subr.bf16.mxu1 %v8852_v45  ;;  %v1299_v55 = vrot.slane %v1298_v43, 4  ;;  %v2049_v14 = vrot.slane %v9359_v4, 5  ;;  %v2055_v4 = vrot.slane %v2053_v16, 4  ;;  %v1114_v25 = vld [vmem:[#allocation2 + $0x60] sm:$0xf]  ;;  %v9600_v43 = vrot.slane %v1325_v32, 5 }
  0x5c   : > { %998 = vmatmul.mubr.bf16.gmra.mxu0 %v9278_v13  ;;  %v8860_v13 = vld [vmem:[%s12046_s2 + $0xc4] ss:$8 sps:$4 sm:$0xff]   ;;  %v1303_v34 = vrot.slane %v1301_v5, 5  ;;  %v1285_v36 = vrot.slane %v1284_v26, 4  ;;  %v8865_v5 = vld [vmem:[%s12045_s1 + $0xb8] sm:$0xff]   ;;  %v2056_v26 = vrot.slane %v9370_v20, 5 }
  0x5d   : > { %1007 = vmatprep.mubr.bf16.mxu0 %v9144_v59  ;;  %1862 = vmatprep.subr.bf16.mxu0 %v8860_v13  ;;  %v1316_v13 = vshrl.u32 %v1114_v25, 16  ;;  %v1319_v7 = vshll.u32 %v1114_v25, 16 }
  0x5e   : > { %8256 = vmatpush3.bf16.msra.mxu1 %v8852_v45  ;;  %v8864_v45 = vld [vmem:[%s12046_s2 + $0xb4] ss:$8 sps:$4 sm:$0xff]   ;;  %v1290_v46 = vsel %vm9382_vm3, %v1285_v36, %v1289_v21  ;;  %v1308_v48 = vor.u32 %v1307_v38, %v1303_v34  ;;  %1863 = vmatpush1.bf16.msra.mxu0 %v8858_v24  ;;  %v1304_v8 = vsel %vm9382_vm3, %v1299_v55, %v1303_v34  ;;  %v8872_v24 = vld [vmem:[%s12046_s2 + $0x90] ss:$8 sps:$4 sm:$0xff]   ;;  %v1329_v34 = vshrl.u32 %v9590_v29, 16 }
  0x5f   : > { %8240 = vmatmul.mubr.bf16.gmra.mxu1 %v9524_v31  ;;  %8257 = vmatprep.subr.bf16.mxu1 %v8856_v11  ;;  %v9544_v53 = vcombine.low %v1280_v12, %v1290_v46  ;;  %v8874_v21 = vld [vmem:[%s12046_s2 + $0x94] ss:$8 sps:$4 sm:$0xff]   ;;  %v1335_v36 = vshll.u32 %v9592_v30, 16  ;;  %v1117_v38 = vld [vmem:[#allocation2 + $0x6c] sm:$0xf]  ;;  %v2057_v39 = vsel %vm9529_vm6, %v2055_v4, %v2056_v26  ;;  %v1318_v20 = vrot.slane %v1316_v13, 4 }
  0x60   : > { %1864 = vmatprep.subr.bf16.mxu0 %v8864_v45  ;;  %v1309_v63 = vrot.slane %v1308_v48, 4  ;;  %v1321_v12 = vrot.slane %v1319_v7, 5  ;;  %v1331_v45 = vrot.slane %v1329_v34, 4  ;;  %v9602_v46 = vld [vmem:[#allocation2 + $0x70] sm:$0xf]  ;;  %v1340_v48 = vshrl.u32 %v1117_v38, 16 }
  0x61   : > { %8243 = vmatprep.mubr.bf16.mxu1 %v9544_v53  ;;  %v9610_v55 = vld [vmem:[#allocation2 + $0x74] sm:$0x1]  ;;  %v2002_v4 = vld [vmem:[#allocation2 + $0xc] sm:$0xe] }
  0x62   : > { %8258 = vmatpush3.bf16.msra.mxu1 %v8856_v11  ;;  %v1314_v9 = vsel %vm9382_vm3, %v1309_v63, %v1313_v41  ;;  %v2048_v11 = vrot.slane %v2046_v62, 4  ;;  %1865 = vmatpush1.bf16.msra.mxu0 %v8862_v56  ;;  %v8866_v41 = vld [vmem:[%s12045_s1 + $0xb0] sm:$0xff]   ;;  %v1322_v56 = vor.u32 %v1321_v12, %v1318_v20  ;;  %v8879_v63 = vld [vmem:[%s12046_s2 + $0x84] ss:$8 sps:$4 sm:$0xff]   ;;  %v7104_v26 = vrot.slane %v2002_v4, 9 }
  0x63   : > { %8259 = vmatprep.subr.bf16.mxu1 %v8857_v49  ;;  %v9567_v18 = vcombine.low %v1304_v8, %v1314_v9  ;;  %1866 = vmatprep.subr.bf16.mxu0 %v8869_v3  ;;  %v1343_v3 = vshll.u32 %v1117_v38, 16  ;;  %v1349_v8 = vshll.u32 %v9602_v46, 16  ;;  %v1353_v9 = vshrl.u32 %v9602_v46, 16  ;;  %v8885_v20 = vld [vmem:[%s12046_s2 + $0x174] ss:$8 sps:$4 sm:$0xff]  }
  0x64   : > { %1008 = vmatmul.mubr.bf16.gmra.mxu0 %v9295_v27  ;;  %v8867_v27 = vld [vmem:[%s12046_s2 + $0xa0] ss:$8 sps:$4 sm:$0xff]   ;;  %v9577_v23 = vsel %vm9529_vm6, %v2048_v11, %v2049_v14  ;;  %v9625_v14 = vrot.slane %v1340_v48, 4  ;;  %v2054_v38 = vsel %vm9529_vm6, %v7104_v26, %v2053_v16  ;;  %v2003_v12 = vld [vmem:[#allocation2 + $0x18] sm:$0xe]  ;;  %v2063_v48 = vrot.slane %v9407_v54, 5 }
  0x65   : > { %1017 = vmatprep.mubr.bf16.mxu0 %v9144_v59  ;;  %v8870_v11 = vld [vmem:[%s12045_s1 + $0xa8] sm:$0xff]   ;;  %v1345_v7 = vrot.slane %v1343_v3, 5  ;;  %v9629_v32 = vrot.slane %v1349_v8, 5  ;;  %v1355_v34 = vrot.slane %v1353_v9, 4  ;;  %v9654_v15 = vcombine.low %v2054_v38, %v2057_v39  ;;  %v2005_v8 = vld [vmem:[#allocation2 + $0x30] sm:$0xe] }
  0x66   : > { %8260 = vmatpush3.bf16.msra.mxu1 %v8857_v49  ;;  %1867 = vmatpush1.bf16.msra.mxu0 %v8867_v27  ;;  %v9608_v49 = vrot.slane %v1335_v36, 5  ;;  %v1359_v27 = vshll.u32 %v9610_v55, 16  ;;  %v7105_v16 = vrot.slane %v2003_v12, 9  ;;  %v8875_v9 = vld [vmem:[%s12045_s1 + $0x98] sm:$0xff]   ;;  %v2084_v26 = vrot.slane %v9462_v1, 5 }
  0x67   : > { %8244 = vmatmul.mubr.bf16.gmra.mxu1 %v9567_v18  ;;  %8261 = vmatprep.subr.bf16.mxu1 %v8861_v0  ;;  %v1356_v39 = vor.u32 %v1355_v34, %v9629_v32 }
  0x68   : > { %8263 = vmatprep.mubr.bf16.mxu1 %v9455_v51  ;;  %1868 = vmatprep.subr.bf16.mxu0 %v8874_v21  ;;  %v2001_v21 = vld [vmem:[#allocation2] sm:$0xe] }
  0x69   : > { %v7103_v25 = vrot.slane %v2001_v21, 9  ;;  %v2006_v21 = vld [vmem:[#allocation2 + $0x3c] sm:$0xe]  ;;  %v1357_v38 = vrot.slane %v1356_v39, 4 }
  0x6a   : > { %8262 = vmatpush3.bf16.msra.mxu1 %v8861_v0  ;;  %1869 = vmatpush1.bf16.msra.mxu0 %v8872_v24  ;;  %v1332_v0 = vor.u32 %v1331_v45, %v9600_v43  ;;  %v1323_v24 = vrot.slane %v1322_v56, 4  ;;  %v2004_v45 = vld [vmem:[#allocation2 + $0x24] sm:$0xe] }
  0x6b   : > { %8279 = vmatprep.subr.bf16.mxu1 %v8865_v5  ;;  %1870 = vmatprep.subr.bf16.mxu0 %v8879_v63  ;;  %v9639_v36 = vsel %vm9529_vm6, %v7103_v25, %v2046_v62  ;;  %v2060_v62 = vrot.slane %v9405_v52, 5  ;;  %v2070_v63 = vrot.slane %v9425_v17, 5  ;;  %v2081_v25 = vrot.slane %v9459_v58, 5 }
  0x6c   : > { %1018 = vmatmul.mubr.bf16.gmra.mxu0 %v9307_v35  ;;  %v8877_v35 = vld [vmem:[%s12046_s2 + $0x80] ss:$8 sps:$4 sm:$0xff]   ;;  %v1333_v13 = vrot.slane %v1332_v0, 4  ;;  %v7129_v2 = vcombine.low %v9639_v36, %v9577_v23  ;;  %v1328_v52 = vsel %vm9382_vm3, %v1323_v24, %v9600_v43  ;;  %v1346_v0 = vor.u32 %v1345_v7, %v9625_v14  ;;  %v8886_v36 = vld [vmem:[%s12045_s1 + $0x170] sm:$0xff]  }
  0x6d   : > { %1027 = vmatprep.mubr.bf16.mxu0 %v9144_v59  ;;  %v2062_v56 = vrot.slane %v2060_v62, 4  ;;  %v2061_v3 = vsel %vm9529_vm6, %v7105_v16, %v2060_v62  ;;  %v7107_v14 = vrot.slane %v2005_v8, 9  ;;  %v7108_v24 = vrot.slane %v2006_v21, 9  ;;  %v2008_v62 = vld [vmem:[#allocation2 + $0x54] sm:$0xe] }
  0x6e   : > { %1871 = vmatpush1.bf16.msra.mxu0 %v8877_v35  ;;  %v2067_v35 = vrot.slane %v9421_v10, 5  ;;  %v1338_v54 = vsel %vm9382_vm3, %v1333_v13, %v9608_v49  ;;  %v2077_v49 = vrot.slane %v9453_v47, 5  ;;  %v1347_v47 = vrot.slane %v1346_v0, 4  ;;  %v2009_v8 = vld [vmem:[#allocation2 + $0x60] sm:$0xe] }
  0x6f   : > { %8264 = vmatmul.mubr.bf16.vlgmr.msra.gmra.mxu1 %v9476_v22  ;;  %2607 = vmatprep.subr.bf16.mxu0 %v8885_v20  ;;  %v2064_v10 = vsel %vm9529_vm6, %v2062_v56, %v2063_v48  ;;  %v9687_v13 = vcombine.low %v1328_v52, %v1338_v54  ;;  %v2082_v58 = vsel %vm9529_vm6, %v7108_v24, %v2081_v25  ;;  %v2083_v20 = vrot.slane %v2081_v25, 4  ;;  %v8880_v52 = vld [vmem:[%s12045_s1 + $0x88] sm:$0xff]   ;;  %v8881_v54 = vld [vmem:[%s12045_s1 + $0x80] sm:$0xff]  }
  0x70   : > { %8280 = vmatpush3.bf16.msra.mxu1 %v8865_v5  ;;  %8267 = vmatprep.mubr.bf16.mxu1 %v9498_v50  ;;  %v8871_v5 = vld [vmem:[%s12045_s1 + $0xa0] sm:$0xff]   ;;  %v2069_v43 = vrot.slane %v2067_v35, 4  ;;  %v7110_v48 = vrot.slane %v2008_v62, 9  ;;  %v2098_v56 = vrot.slane %v9504_v6, 5 }
  0x71   : > { %8281 = vmatprep.subr.bf16.mxu1 %v8866_v41  ;;  %v8890_v21 = vld [vmem:[%s12046_s2 + $0x164] ss:$8 sps:$4 sm:$0xff]  }
  0x72   : > { %v2071_v4 = vsel %vm9529_vm6, %v2069_v43, %v2070_v63 }
  0x74   : > { %1028 = vmatmul.mubr.bf16.gmra.mxu0 %v9339_v57  ;;  %8282 = vmatpush3.bf16.msra.mxu1 %v8866_v41  ;;  %v9649_v57 = vrot.slane %v1359_v27, 5  ;;  %v7106_v41 = vrot.slane %v2004_v45, 9  ;;  %v2074_v27 = vrot.slane %v9449_v44, 5  ;;  %v2095_v45 = vrot.slane %v9501_v60, 5 }
  0x75   : > { %1037 = vmatprep.mubr.bf16.mxu0 %v9144_v59  ;;  %8283 = vmatprep.subr.bf16.mxu1 %v8870_v11  ;;  %v2102_v60 = vrot.slane %v9590_v29, 5  ;;  %v2109_v29 = vrot.slane %v9602_v46, 5  ;;  %v8883_v46 = vld [vmem:[%s12046_s2 + $0x170] ss:$8 sps:$4 sm:$0xff]  }
  0x76   : > { %v2068_v17 = vsel %vm9529_vm6, %v7106_v41, %v2067_v35  ;;  %v2075_v44 = vsel %vm9529_vm6, %v7107_v14, %v2074_v27  ;;  %v2076_v34 = vrot.slane %v2074_v27, 4  ;;  %v1352_v41 = vsel %vm9382_vm3, %v1347_v47, %v9629_v32  ;;  %v8882_v14 = vld [vmem:[%s12045_s1 + $0x178] sm:$0xff]   ;;  %v8900_v47 = vld [vmem:[%s12046_s2 + $0x144] ss:$8 sps:$4 sm:$0xff]  }
  0x77   : > { %8268 = vmatmul.mubr.bf16.gmra.mxu1 %v9524_v31  ;;  %v9689_v7 = vcombine.low %v2068_v17, %v2071_v4  ;;  %v1362_v35 = vsel %vm9382_vm3, %v1357_v38, %v9649_v57  ;;  %v2097_v63 = vrot.slane %v2095_v45, 4  ;;  %v2096_v6 = vsel %vm9529_vm6, %v7110_v48, %v2095_v45  ;;  %v8891_v38 = vld [vmem:[%s12045_s1 + $0x160] sm:$0xff]   ;;  %v8896_v45 = vld [vmem:[%s12045_s1 + $0x150] sm:$0xff]  }
  0x78   : > { %8284 = vmatpush3.bf16.msra.mxu1 %v8870_v11  ;;  %8271 = vmatprep.mubr.bf16.mxu1 %v9544_v53  ;;  %v9678_v11 = vcombine.low %v2061_v3, %v2064_v10  ;;  %v2078_v1 = vsel %vm9529_vm6, %v2076_v34, %v2077_v49  ;;  %v2104_v39 = vrot.slane %v2102_v60, 4  ;;  %v2105_v32 = vrot.slane %v9592_v30, 5  ;;  %v8893_v34 = vld [vmem:[%s12046_s2 + $0x150] ss:$8 sps:$4 sm:$0xff]   ;;  %v8905_v48 = vld [vmem:[%s12046_s2 + $0x120] ss:$8 sps:$4 sm:$0xff]  }
  0x79   : > { %8285 = vmatprep.subr.bf16.mxu1 %v8871_v5  ;;  %v9701_v12 = vcombine.low %v2075_v44, %v2078_v1  ;;  %v2099_v0 = vsel %vm9529_vm6, %v2097_v63, %v2098_v56  ;;  %v7062_v57 = vcombine.low %v1352_v41, %v1362_v35  ;;  %v2088_v10 = vrot.slane %v9486_v37, 5  ;;  %v8895_v44 = vld [vmem:[%s12046_s2 + $0x154] ss:$8 sps:$4 sm:$0xff]   ;;  %v8907_v1 = vld [vmem:[%s12046_s2 + $0x124] ss:$8 sps:$4 sm:$0xff]  }
  0x7a   : > { %v9727_v3 = vcombine.low %v2096_v6, %v2099_v0  ;;  %v2106_v17 = vsel %vm9529_vm6, %v2104_v39, %v2105_v32  ;;  %v2112_v30 = vrot.slane %v9610_v55, 5  ;;  %v2111_v43 = vrot.slane %v2109_v29, 4  ;;  %v8910_v41 = vld [vmem:[%s12046_s2 + $0x114] ss:$8 sps:$4 sm:$0xff]   ;;  %v8908_v35 = vld [vmem:[%s12046_s2 + $0x110] ss:$8 sps:$4 sm:$0xff]  }
  0x7b   : > { %v2091_v37 = vrot.slane %v9490_v42, 5  ;;  %v7111_v27 = vrot.slane %v2009_v8, 9  ;;  %v2090_v24 = vrot.slane %v2088_v10, 4  ;;  %v8913_v63 = vld [vmem:[%s12046_s2 + $0x104] ss:$8 sps:$4 sm:$0xff]  }
  0x7c   : > { %1038 = vmatmul.mubr.bf16.gmra.mxu0 %v9341_v61  ;;  %8286 = vmatpush3.bf16.msra.mxu1 %v8871_v5  ;;  %v8876_v61 = vld [vmem:[%s12045_s1 + $0x90] sm:$0xff]   ;;  %v2085_v5 = vsel %vm9529_vm6, %v2083_v20, %v2084_v26  ;;  %v9747_v55 = vsel %vm9529_vm6, %v2111_v43, %v2112_v30 }
  0x7d   : > { %1047 = vmatprep.mubr.bf16.mxu0 %v9144_v59  ;;  %8287 = vmatprep.subr.bf16.mxu1 %v8875_v9  ;;  %v9707_v16 = vcombine.low %v2082_v58, %v2085_v5  ;;  %v2103_v42 = vsel %vm9529_vm6, %v7111_v27, %v2102_v60  ;;  %v8898_v58 = vld [vmem:[%s12046_s2 + $0x140] ss:$8 sps:$4 sm:$0xff]   ;;  %v8904_v20 = vld [vmem:[%s12046_s2 + $0x134] ss:$8 sps:$4 sm:$0xff]   ;;  %v2092_v62 = vsel %vm9529_vm6, %v2090_v24, %v2091_v37 }
  0x7e   : > { %v9761_v26 = vcombine.low %v2103_v42, %v2106_v17  ;;  %v8901_v60 = vld [vmem:[%s12045_s1 + $0x140] sm:$0xff]  }
  0x7f   : > { %8272 = vmatmul.mubr.bf16.gmra.mxu1 %v9567_v18 }
  0x80   : > { %8288 = vmatpush3.bf16.msra.mxu1 %v8875_v9  ;;  %8275 = vmatprep.mubr.bf16.mxu1 %v9687_v13  ;;  %v2010_v9 = vld [vmem:[#allocation2 + $0x6c] sm:$0xe] }
  0x81   : > { %8289 = vmatprep.subr.bf16.mxu1 %v8876_v61  ;;  %v7112_v49 = vrot.slane %v2010_v9, 9 }
  0x83   : > { %v9759_v25 = vsel %vm9529_vm6, %v7112_v49, %v2109_v29 }
  0x84   : > { %1048 = vmatmul.mubr.bf16.gmra.mxu0 %v9388_v33  ;;  %8290 = vmatpush3.bf16.msra.mxu1 %v8876_v61  ;;  %v2007_v33 = vld [vmem:[#allocation2 + $0x48] sm:$0xe]  ;;  %v7162_v23 = vcombine.low %v9759_v25, %v9747_v55  ;;  %v8902_v61 = vld [vmem:[%s12046_s2 + $0x130] ss:$8 sps:$4 sm:$0xff]  }
  0x85   : > { %1888 = vmatprep.mubr.bf16.mxu0 %v9144_v59  ;;  %8291 = vmatprep.subr.bf16.mxu1 %v8880_v52  ;;  %v7109_v4 = vrot.slane %v2007_v33, 9 }
  0x87   : > { %8276 = vmatmul.mubr.bf16.gmra.mxu1 %v7062_v57  ;;  %v2089_v5 = vsel %vm9529_vm6, %v7109_v4, %v2088_v10 }
  0x88   : > { %8292 = vmatpush3.bf16.msra.mxu1 %v8880_v52  ;;  %8295 = vmatprep.mubr.bf16.mxu1 %v7129_v2  ;;  %v8888_v2 = vld [vmem:[%s12046_s2 + $0x160] ss:$8 sps:$4 sm:$0xff]   ;;  %v9821_v56 = vcombine.low %v2089_v5, %v2092_v62 }
  0x89   : > { %8293 = vmatprep.subr.bf16.mxu1 %v8881_v54  ;;  %v8911_v52 = vld [vmem:[%s12046_s2 + $0x100] ss:$8 sps:$4 sm:$0xff]  }
  0x8c   : > { %1889 = vmatmul.mubr.bf16.vlgmr.msra.gmra.mxu0 %v9427_v19  ;;  %8294 = vmatpush3.bf16.msra.mxu1 %v8881_v54  ;;  %v8887_v19 = vld [vmem:[%s12045_s1 + $0x168] sm:$0xff]  }
  0x8d   : > { %2608 = vmatpush1.bf16.msra.mxu0 %v8883_v46  ;;  %8311 = vmatprep.subr.bf16.mxu1 %v8882_v14 }
  0x8e   : > { %1898 = vmatprep.mubr.bf16.mxu0 %v9144_v59  ;;  %2609 = vmatprep.subr.bf16.mxu0 %v8890_v21 }
  0x8f   : > { %8296 = vmatmul.mubr.bf16.vlgmr.msra.gmra.mxu1 %v9654_v15 }
  0x90   : > { %8312 = vmatpush3.bf16.msra.mxu1 %v8882_v14  ;;  %8299 = vmatprep.mubr.bf16.mxu1 %v9678_v11 }
  0x91   : > { %8313 = vmatprep.subr.bf16.mxu1 %v8886_v36  ;;  %2610 = vmatpush1.bf16.msra.mxu0 %v8888_v2 }
  0x92   : > { %2611 = vmatprep.subr.bf16.mxu0 %v8895_v44 }
  0x94   : > { %1899 = vmatmul.mubr.bf16.gmra.mxu0 %v9455_v51  ;;  %8314 = vmatpush3.bf16.msra.mxu1 %v8886_v36  ;;  %v8892_v51 = vld [vmem:[%s12045_s1 + $0x158] sm:$0xff]  }
  0x95   : > { %1908 = vmatprep.mubr.bf16.mxu0 %v9144_v59  ;;  %8315 = vmatprep.subr.bf16.mxu1 %v8887_v19 }
  0x96   : > { %2612 = vmatpush1.bf16.msra.mxu0 %v8893_v34 }
  0x97   : > { %2613 = vmatprep.subr.bf16.mxu0 %v8900_v47  ;;  %8300 = vmatmul.mubr.bf16.gmra.mxu1 %v9689_v7 }
  0x98   : > { %8316 = vmatpush3.bf16.msra.mxu1 %v8887_v19  ;;  %8303 = vmatprep.mubr.bf16.mxu1 %v9701_v12 }
  0x99   : > { %8317 = vmatprep.subr.bf16.mxu1 %v8891_v38 }
  0x9a   : > { %2614 = vmatpush1.bf16.msra.mxu0 %v8898_v58 }
  0x9b   : > { %2615 = vmatprep.subr.bf16.mxu0 %v8904_v20 }
  0x9c   : > { %1909 = vmatmul.mubr.bf16.gmra.mxu0 %v9476_v22  ;;  %8318 = vmatpush3.bf16.msra.mxu1 %v8891_v38  ;;  %v8897_v22 = vld [vmem:[%s12045_s1 + $0x148] sm:$0xff]  }
  0x9d   : > { %1918 = vmatprep.mubr.bf16.mxu0 %v9144_v59  ;;  %8319 = vmatprep.subr.bf16.mxu1 %v8892_v51 }
  0x9e   : > { %2616 = vmatpush1.bf16.msra.mxu0 %v8902_v61 }
  0x9f   : > { %2617 = vmatprep.subr.bf16.mxu0 %v8907_v1  ;;  %8304 = vmatmul.mubr.bf16.gmra.mxu1 %v9707_v16 }
  0xa0   : > { %8320 = vmatpush3.bf16.msra.mxu1 %v8892_v51  ;;  %8307 = vmatprep.mubr.bf16.mxu1 %v9821_v56 }
  0xa1   : > { %8321 = vmatprep.subr.bf16.mxu1 %v8896_v45 }
  0xa2   : > { %2618 = vmatpush1.bf16.msra.mxu0 %v8905_v48 }
  0xa3   : > { %2619 = vmatprep.subr.bf16.mxu0 %v8910_v41 }
  0xa4   : > { %1919 = vmatmul.mubr.bf16.gmra.mxu0 %v9498_v50  ;;  %8322 = vmatpush3.bf16.msra.mxu1 %v8896_v45 }
  0xa5   : > { %1928 = vmatprep.mubr.bf16.mxu0 %v9144_v59  ;;  %8323 = vmatprep.subr.bf16.mxu1 %v8897_v22 }
  0xa6   : > { %2620 = vmatpush1.bf16.msra.mxu0 %v8908_v35 }
  0xa7   : > { %2621 = vmatprep.subr.bf16.mxu0 %v8913_v63  ;;  %8308 = vmatmul.mubr.bf16.gmra.mxu1 %v9727_v3 }
  0xa8   : > { %8324 = vmatpush3.bf16.msra.mxu1 %v8897_v22  ;;  %8327 = vmatprep.mubr.bf16.mxu1 %v9678_v11 }
  0xa9   : > { %8325 = vmatprep.subr.bf16.mxu1 %v8901_v60 }
  0xaa   : > { %2622 = vmatpush1.bf16.msra.mxu0 %v8911_v52 }
  0xac   : > { %1929 = vmatmul.mubr.bf16.gmra.mxu0 %v9524_v31  ;;  %8326 = vmatpush3.bf16.msra.mxu1 %v8901_v60 }
  0xad   : > { %1938 = vmatprep.mubr.bf16.mxu0 %v9144_v59 }
  0xaf   : > { %8328 = vmatmul.mubr.bf16.vlgmr.msra.gmra.mxu1 %v9689_v7 }
  0xb0   : > { %8331 = vmatprep.mubr.bf16.mxu1 %v9701_v12 }
  0xb4   : > { %1939 = vmatmul.mubr.bf16.gmra.mxu0 %v9544_v53 }
  0xb5   : > { %1948 = vmatprep.mubr.bf16.mxu0 %v9144_v59 }
  0xb7   : > { %8332 = vmatmul.mubr.bf16.gmra.mxu1 %v9707_v16 }
  0xb8   : > { %8335 = vmatprep.mubr.bf16.mxu1 %v9821_v56 }
  0xbc   : > { %1949 = vmatmul.mubr.bf16.gmra.mxu0 %v9567_v18 }
  0xbd   : > { %1958 = vmatprep.mubr.bf16.mxu0 %v9144_v59 }
  0xbf   : > { %8336 = vmatmul.mubr.bf16.gmra.mxu1 %v9727_v3 }
  0xc0   : > { %8339 = vmatprep.mubr.bf16.mxu1 %v9761_v26 }
  0xc4   : > { %1959 = vmatmul.mubr.bf16.gmra.mxu0 %v9687_v13 }
  0xc5   : > { %2639 = vmatprep.mubr.bf16.mxu0 %v9144_v59 }
  0xc7   : > { %8340 = vmatmul.mubr.bf16.gmra.mxu1 %v7162_v23 }
  0xcc   : > { %2640 = vmatmul.mubr.bf16.vlgmr.msra.gmra.mxu0 %v9654_v15 }
  0xcd   : > { %2649 = vmatprep.mubr.bf16.mxu0 %v9144_v59 }
  0xd4   : > { %2650 = vmatmul.mubr.bf16.gmra.mxu0 %v9678_v11 }
  0xd5   : > { %2659 = vmatprep.mubr.bf16.mxu0 %v9144_v59 }
  0xdc   : > { %2660 = vmatmul.mubr.bf16.gmra.mxu0 %v9689_v7 }
  0xdd   : > { %2669 = vmatprep.mubr.bf16.mxu0 %v9144_v59 }
  0xe4   : > { %2670 = vmatmul.mubr.bf16.gmra.mxu0 %v9701_v12 }
  0xe5   : > { %2679 = vmatprep.mubr.bf16.mxu0 %v9144_v59 }
  0xec   : > { %v8169_v50 = vpop.f32.mrf.mxu0  ;;  %2680 = vmatmul.mubr.bf16.gmra.mxu0 %v9707_v16 }
  0xed   : > { %v8201_v31 = vpop.f32.mrf.mxu1  ;;  %2689 = vmatprep.mubr.bf16.mxu0 %v9144_v59 }
  0xee   : > { %v795_v53 = vadd.f32 %v8201_v31, %v8169_v50  ;;  %v629_v18 = vpop.f32.mrf.mxu0 }
  0xef   : > { %v786_v15 = vpop.f32.mrf.mxu1 }
  0xf0   : > { %v787_v11 = vadd.f32 %v786_v15, %v629_v18  ;;  %v8170_v13 = vpop.f32.mrf.mxu0 }
  0xf1   : > { %v8202_v6 = vpop.f32.mrf.mxu1 }
  0xf2   : > { %v798_v0 = vadd.f32 %v8202_v6, %v8170_v13  ;;  %v9874_v7 = vpop.f32.mrf.mxu0 }
  0xf3   : > { %v9876_v39 = vpop.f32.mrf.mxu1 }
  0xf4   : > { %v8173_v12 = vpop.f32.mrf.mxu0  ;;  %2690 = vmatmul.mubr.bf16.gmra.mxu0 %v9821_v56 }
  0xf5   : > { %v8205_v32 = vpop.f32.mrf.mxu1  ;;  %2699 = vmatprep.mubr.bf16.mxu0 %v9144_v59 }
  0xf6   : > { %v9880_v16 = vadd.f32 %v8205_v32, %v8173_v12  ;;  %v645_v57 = vpop.f32.mrf.mxu0 }
  0xf7   : > { %v802_v29 = vpop.f32.mrf.mxu1 }
  0xf8   : > { %v803_v54 = vadd.f32 %v802_v29, %v645_v57  ;;  %v8174_v10 = vpop.f32.mrf.mxu0 }
  0xf9   : > { %v8206_v17 = vpop.f32.mrf.mxu1 }
  0xfa   : > { %v9882_v30 = vadd.f32 %v8206_v17, %v8174_v10  ;;  %v9884_v33 = vpop.f32.mrf.mxu0 }
  0xfb   : > { %v9886_v43 = vpop.f32.mrf.mxu1 }
  0xfc   : > { %v8177_v46 = vpop.f32.mrf.mxu0  ;;  %2700 = vmatmul.mubr.bf16.gmra.mxu0 %v9727_v3 }
  0xfd   : > { %v8209_v8 = vpop.f32.mrf.mxu1  ;;  %2709 = vmatprep.mubr.bf16.mxu0 %v9144_v59 }
  0xfe   : > { %v9890_v9 = vadd.f32 %v8209_v8, %v8177_v46  ;;  %v661_v14 = vpop.f32.mrf.mxu0 }
  0xff   : > { %v818_v37 = vpop.f32.mrf.mxu1 }
 0x100   : > { %v9892_v27 = vadd.f32 %v818_v37, %v661_v14  ;;  %v8178_v49 = vpop.f32.mrf.mxu0 }
 0x101   : > { %v8210_v55 = vpop.f32.mrf.mxu1 }
 0x102   : > { %v9894_v21 = vadd.f32 %v8210_v55, %v8178_v49  ;;  %v9896_v4 = vpop.f32.mrf.mxu0 }
 0x103   : > { %v9898_v24 = vpop.f32.mrf.mxu1 }
 0x104   : > { %v8181_v42 = vpop.f32.mrf.mxu0  ;;  %2710 = vmatmul.mubr.bf16.gmra.mxu0 %v9761_v26 }
 0x105   : > { %v8213_v3 = vpop.f32.mrf.mxu1 }
 0x106   : > { %v9901_v25 = vadd.f32 %v8213_v3, %v8181_v42  ;;  %v677_v59 = vpop.f32.mrf.mxu0 }
 0x107   : > { %v834_v23 = vpop.f32.mrf.mxu1 }
 0x108   : > { %v9903_v36 = vadd.f32 %v834_v23, %v677_v59  ;;  %v8182_v2 = vpop.f32.mrf.mxu0  ;;  %v8915_v23 = vld [vmem:[%s12045_s1 + $0x270] sm:$0xff]  }
 0x109   : > { %v8214_v44 = vpop.f32.mrf.mxu1 }
 0x10a   : > { %v9905_v19 = vadd.f32 %v8214_v44, %v8182_v2  ;;  %v9907_v34 = vpop.f32.mrf.mxu0 }
 0x10b   : > { %v9909_v47 = vpop.f32.mrf.mxu1 }
 0x10c   : > { %v979_v38 = vpop.f32.mrf.mxu0 }
 0x10d   : > { %v1058_v58 = vadd.f32 %v979_v38, %v787_v11  ;;  %v8233_v20 = vpop.f32.mrf.mxu1 }
 0x10e   : > { %v9911_v51 = vpop.f32.mrf.mxu0 }
 0x10f   : > { %v1494_v26 = vpop.f32.mrf.mxu1 }
 0x110   : > { %v9913_v61 = vadd.f32 %v1494_v26, %v1058_v58  ;;  %v9915_v1 = vpop.f32.mrf.mxu0 }
 0x111   : > { %v8234_v5 = vpop.f32.mrf.mxu1 }
 0x112   : > { %v9917_v62 = vpop.f32.mrf.mxu0 }
 0x113   : > { %v9919_v45 = vpop.f32.mrf.mxu1 }
 0x114   : > { %v989_v48 = vpop.f32.mrf.mxu0 }
 0x115   : > { %v1060_v56 = vadd.f32 %v989_v48, %v795_v53  ;;  %v8237_v41 = vpop.f32.mrf.mxu1 }
 0x116   : > { %v9921_v22 = vpop.f32.mrf.mxu0 }
 0x117   : > { %12065 = vst [vmem:[#allocation7_spill] sm:$0xff] %v9921_v22  ;;  %v1559_v35 = vadd.f32 %v8233_v20, %v1060_v56  ;;  %v1510_v63 = vpop.f32.mrf.mxu1 }
 0x118   : > { %v993_v60 = vpop.f32.mrf.mxu0 }
 0x119   : > { %v1061_v52 = vadd.f32 %v993_v60, %v798_v0  ;;  %v8238_v50 = vpop.f32.mrf.mxu1  ;;  %v8914_v0 = vld [vmem:[%s12045_s1 + $0x278] sm:$0xff]  }
 0x11a   : > { %v9923_v31 = vpop.f32.mrf.mxu0  ;;  %8343 = vmatprep.subr.bf16.mxu1 %v8914_v0  ;;  %v8917_v60 = vld [vmem:[%s12045_s1 + $0x338] sm:$0xff]  }
 0x11b   : > { %12066 = vst [vmem:[#allocation8_spill] sm:$0xff] %v9923_v31  ;;  %v1560_v18 = vadd.f32 %v8234_v5, %v1061_v52  ;;  %v9925_v15 = vpop.f32.mrf.mxu1  ;;  %8344 = vmatpush3.bf16.msra.mxu1 %v8914_v0  ;;  %8407 = vmatprep.subr.bf16.mxu0 %v8917_v60 }
 0x11c   : > { %v999_v11 = vpop.f32.mrf.mxu0  ;;  %8345 = vmatprep.subr.bf16.mxu1 %v8915_v23  ;;  %8408 = vmatpush3.bf16.msra.mxu0 %v8917_v60 }
 0x11d   : > { %v1062_v13 = vadd.f32 %v999_v11, %v803_v54 }
 0x11e   : > { %v9927_v6 = vpop.f32.mrf.mxu0 }
 0x11f   : > { %v1561_v12 = vadd.f32 %v1510_v63, %v1062_v13  ;;  %v8241_v32 = vpop.f32.mrf.mxu1  ;;  %8346 = vmatpush3.bf16.msra.mxu1 %v8915_v23 }
 0x120   : > { %v9929_v53 = vpop.f32.mrf.mxu0 }
 0x121   : > { %v1526_v57 = vpop.f32.mrf.mxu1 }
 0x122   : > { %v9931_v29 = vpop.f32.mrf.mxu0 }
 0x123   : > { %12067 = vst [vmem:[#allocation9_spill] sm:$0xff] %v9931_v29  ;;  %v8242_v10 = vpop.f32.mrf.mxu1 }
 0x124   : > { %v1009_v17 = vpop.f32.mrf.mxu0 }
 0x125   : > { %v1064_v46 = vadd.f32 %v1009_v17, %v9880_v16  ;;  %v9937_v54 = vpop.f32.mrf.mxu1 }
 0x126   : > { %v9939_v8 = vpop.f32.mrf.mxu0 }
 0x127   : > { %v1563_v14 = vadd.f32 %v8237_v41, %v1064_v46  ;;  %v9941_v37 = vpop.f32.mrf.mxu1 }
 0x128   : > { %v1013_v49 = vpop.f32.mrf.mxu0 }
 0x129   : > { %v1065_v55 = vadd.f32 %v1013_v49, %v9882_v30  ;;  %v1542_v42 = vpop.f32.mrf.mxu1 }
 0x12a   : > { %v9944_v3 = vpop.f32.mrf.mxu0 }
 0x12b   : > { %12068 = vst [vmem:[#allocation10_spill] sm:$0xff] %v9944_v3  ;;  %v1564_v59 = vadd.f32 %v8238_v50, %v1065_v55  ;;  %v9949_v16 = vpop.f32.mrf.mxu1 }
 0x12c   : > { %v1019_v2 = vpop.f32.mrf.mxu0 }
 0x12d   : > { %v1066_v44 = vadd.f32 %v1019_v2, %v9892_v27  ;;  %v9952_v38 = vpop.f32.mrf.mxu1  ;;  %v8916_v27 = vld [vmem:[%s12045_s1 + $0x268] sm:$0xff]  }
 0x12e   : > { %v9954_v58 = vpop.f32.mrf.mxu0  ;;  %8347 = vmatprep.subr.bf16.mxu1 %v8916_v27 }
 0x12f   : > { %v1565_v30 = vadd.f32 %v1526_v57, %v1066_v44  ;;  %v8265_v20 = vpop.f32.mrf.mxu1  ;;  %8348 = vmatpush3.bf16.msra.mxu1 %v8916_v27  ;;  %v8919_v44 = vld [vmem:[%s12045_s1 + $0x330] sm:$0xff]   ;;  %v8920_v27 = vld [vmem:[%s12045_s1 + $0x258] sm:$0xff]  }
 0x130   : > { %v9956_v26 = vpop.f32.mrf.mxu0  ;;  %v9958_v5 = vadd.f32 %v8265_v20, %v1559_v35  ;;  %8409 = vmatprep.subr.bf16.mxu0 %v8919_v44 }
 0x131   : > { %v9960_v48 = vpop.f32.mrf.mxu1  ;;  %8410 = vmatpush3.bf16.msra.mxu0 %v8919_v44 }
 0x132   : > { %v9962_v56 = vpop.f32.mrf.mxu0 }
 0x133   : > { %12069 = vst [vmem:[#allocation11_spill] sm:$0xff] %v9962_v56  ;;  %v8266_v41 = vpop.f32.mrf.mxu1 }
 0x134   : > { %v1029_v63 = vpop.f32.mrf.mxu0  ;;  %v9970_v52 = vadd.f32 %v8266_v41, %v1560_v18 }
 0x135   : > { %v1068_v50 = vadd.f32 %v1029_v63, %v9890_v9  ;;  %v9973_v35 = vpop.f32.mrf.mxu1 }
 0x136   : > { %v9975_v11 = vpop.f32.mrf.mxu0 }
 0x137   : > { %v1567_v13 = vadd.f32 %v8241_v32, %v1068_v50  ;;  %v8269_v57 = vpop.f32.mrf.mxu1  ;;  %v8918_v32 = vld [vmem:[%s12045_s1 + $0x260] sm:$0xff]  }
 0x138   : > { %v1033_v0 = vpop.f32.mrf.mxu0  ;;  %v9977_v17 = vadd.f32 %v8269_v57, %v1563_v14  ;;  %8349 = vmatprep.subr.bf16.mxu1 %v8918_v32 }
 0x139   : > { %v1069_v46 = vadd.f32 %v1033_v0, %v9894_v21  ;;  %v1696_v49 = vpop.f32.mrf.mxu1  ;;  %8350 = vmatpush3.bf16.msra.mxu1 %v8918_v32 }
 0x13a   : > { %v9980_v18 = vpop.f32.mrf.mxu0  ;;  %v9982_v55 = vadd.f32 %v1696_v49, %v1561_v12  ;;  %8351 = vmatprep.subr.bf16.mxu1 %v8920_v27 }
 0x13b   : > { %12070 = vst [vmem:[#allocation12_spill] sm:$0xff] %v9980_v18  ;;  %v1568_v9 = vadd.f32 %v8242_v10, %v1069_v46  ;;  %v8270_v23 = vpop.f32.mrf.mxu1  ;;  %v8922_v46 = vld [vmem:[%s12045_s1 + $0x250] sm:$0xff]  }
 0x13c   : > { %v1039_v2 = vpop.f32.mrf.mxu0  ;;  %v9990_v14 = vadd.f32 %v8270_v23, %v1564_v59 }
 0x13d   : > { %v1070_v21 = vadd.f32 %v1039_v2, %v9903_v36  ;;  %v9993_v20 = vpop.f32.mrf.mxu1  ;;  %v8921_v36 = vld [vmem:[%s12045_s1 + $0x328] sm:$0xff]   ;;  %8352 = vmatpush3.bf16.msra.mxu1 %v8920_v27 }
 0x13e   : > { %v9995_v41 = vpop.f32.mrf.mxu0  ;;  %8411 = vmatprep.subr.bf16.mxu0 %v8921_v36  ;;  %8353 = vmatprep.subr.bf16.mxu1 %v8922_v46 }
 0x13f   : > { %v1569_v12 = vadd.f32 %v1542_v42, %v1070_v21  ;;  %v8273_v10 = vpop.f32.mrf.mxu1  ;;  %8412 = vmatpush3.bf16.msra.mxu0 %v8921_v36 }
 0x140   : > { %v9997_v63 = vpop.f32.mrf.mxu0  ;;  %v10005_v59 = vadd.f32 %v8273_v10, %v1567_v13  ;;  %v8923_v13 = vld [vmem:[%s12045_s1 + $0x320] sm:$0xff]   ;;  %v8924_v10 = vld [vmem:[%s12045_s1 + $0x248] sm:$0xff]  }
 0x141   : > { %v1712_v60 = vpop.f32.mrf.mxu1  ;;  %8413 = vmatprep.subr.bf16.mxu0 %v8923_v13  ;;  %8354 = vmatpush3.bf16.msra.mxu1 %v8922_v46 }
 0x142   : > { %v10007_v50 = vpop.f32.mrf.mxu0  ;;  %v10009_v42 = vadd.f32 %v1712_v60, %v1565_v30  ;;  %8355 = vmatprep.subr.bf16.mxu1 %v8924_v10 }
 0x143   : > { %12071 = vst [vmem:[#allocation13_spill] sm:$0xff] %v10007_v50  ;;  %v8274_v57 = vpop.f32.mrf.mxu1  ;;  %8414 = vmatpush3.bf16.msra.mxu0 %v8923_v13  ;;  %v8927_v13 = vld [vmem:[%s12045_s1 + $0x240] sm:$0xff]  }
 0x144   : > { %v1049_v0 = vpop.f32.mrf.mxu0  ;;  %v10017_v49 = vadd.f32 %v8274_v57, %v1568_v9 }
 0x145   : > { %v1072_v23 = vadd.f32 %v1049_v0, %v9901_v25  ;;  %v10020_v2 = vpop.f32.mrf.mxu1  ;;  %v8926_v25 = vld [vmem:[%s12045_s1 + $0x318] sm:$0xff]   ;;  %8356 = vmatpush3.bf16.msra.mxu1 %v8924_v10 }
 0x146   : > { %v10022_v30 = vpop.f32.mrf.mxu0  ;;  %8415 = vmatprep.subr.bf16.mxu0 %v8926_v25  ;;  %8357 = vmatprep.subr.bf16.mxu1 %v8927_v13 }
 0x147   : > { %v1571_v32 = vadd.f32 %v9941_v37, %v1072_v23  ;;  %v8277_v44 = vpop.f32.mrf.mxu1  ;;  %8416 = vmatpush3.bf16.msra.mxu0 %v8926_v25 }
 0x148   : > { %v1053_v21 = vpop.f32.mrf.mxu0 }
 0x149   : > { %v10031_v9 = vadd.f32 %v8277_v44, %v1571_v32  ;;  %v1073_v27 = vadd.f32 %v1053_v21, %v9905_v19  ;;  %v1728_v36 = vpop.f32.mrf.mxu1  ;;  %v8928_v19 = vld [vmem:[%s12045_s1 + $0x310] sm:$0xff]   ;;  %8358 = vmatpush3.bf16.msra.mxu1 %v8927_v13 }
 0x14a   : > { %v10034_v60 = vpop.f32.mrf.mxu0  ;;  %v10036_v37 = vadd.f32 %v1728_v36, %v1569_v12  ;;  %8417 = vmatprep.subr.bf16.mxu0 %v8928_v19 }
 0x14b   : > { %12072 = vst [vmem:[#allocation14_spill] sm:$0xff] %v10034_v60  ;;  %v1572_v57 = vadd.f32 %v9949_v16, %v1073_v27  ;;  %v8278_v0 = vpop.f32.mrf.mxu1  ;;  %8418 = vmatpush3.bf16.msra.mxu0 %v8928_v19 }
 0x14c   : > { %v10039_v46 = vpop.f32.mrf.mxu0 }
 0x14d   : > { %v10047_v23 = vadd.f32 %v8278_v0, %v1572_v57  ;;  %v10049_v32 = vpop.f32.mrf.mxu1 }
 0x14e   : > { %v1892_v12 = vpop.f32.mrf.mxu0 }
 0x14f   : > { %v10052_v16 = vadd.f32 %v1892_v12, %v9911_v51  ;;  %v10054_v44 = vpop.f32.mrf.mxu1  ;;  %v8930_v51 = vld [vmem:[%s12045_s1 + $0x308] sm:$0xff]  }
 0x150   : > { %12073 = vst [vmem:[#allocation15_spill] sm:$0xff] %v10054_v44  ;;  %v10056_v21 = vpop.f32.mrf.mxu0  ;;  %8419 = vmatprep.subr.bf16.mxu0 %v8930_v51 }
 0x151   : > { %v10058_v10 = vpop.f32.mrf.mxu1  ;;  %8420 = vmatpush3.bf16.msra.mxu0 %v8930_v51  ;;  %v8931_v51 = vld [vmem:[%s12045_s1 + $0x300] sm:$0xff]  }
 0x152   : > { %v10060_v25 = vpop.f32.mrf.mxu0  ;;  %8421 = vmatprep.subr.bf16.mxu0 %v8931_v51 }
 0x153   : > { %v10062_v27 = vpop.f32.mrf.mxu1 }
 0x154   : > { %12074 = vst [vmem:[#allocation16_spill] sm:$0xff] %v10062_v27  ;;  %v10064_v36 = vpop.f32.mrf.mxu0 }
 0x155   : > { %v10066_v57 = vpop.f32.mrf.mxu1  ;;  %8422 = vmatpush3.bf16.msra.mxu0 %v8931_v51 }
 0x156   : > { %v10068_v0 = vpop.f32.mrf.mxu0 }
 0x157   : > { %12075 = vst [vmem:[#allocation17_spill] sm:$0xff] %v10068_v0  ;;  %v8301_v13 = vpop.f32.mrf.mxu1 }
 0x158   : > { %v10073_v19 = vpop.f32.mrf.mxu0 }
 0x159   : > { %v10075_v12 = vpop.f32.mrf.mxu1 }
 0x15a   : > { %12076 = vst [vmem:[#allocation18_spill] sm:$0xff] %v10075_v12  ;;  %v10077_v40 = vpop.f32.mrf.mxu0 }
 0x15b   : > { %12077 = vst [vmem:[#allocation19_spill] sm:$0xff] %v10077_v40  ;;  %v10079_v28 = vpop.f32.mrf.mxu1 }
 0x15c   : > { %12078 = vst [vmem:[#allocation20_spill] sm:$0xff] %v10079_v28  ;;  %v10081_v60 = vpop.f32.mrf.mxu0 }
 0x15d   : > { %v10083_v50 = vpop.f32.mrf.mxu1 }
 0x15e   : > { %12079 = vst [vmem:[#allocation21_spill] sm:$0xff] %v10083_v50  ;;  %v1912_v18 = vpop.f32.mrf.mxu0 }
 0x15f   : > { %v10086_v56 = vadd.f32 %v1912_v18, %v9927_v6  ;;  %v8305_v3 = vpop.f32.mrf.mxu1  ;;  %v822_v18 = vadd.f32 %v9898_v24, %v9896_v4 }
 0x160   : > { %v10088_v29 = vpop.f32.mrf.mxu0 }
 0x161   : > { %12080 = vst [vmem:[#allocation22_spill] sm:$0xff] %v10086_v56  ;;  %12081 = vst [vmem:[#allocation23_spill] sm:$0xff] %v10088_v29  ;;  %v2277_v12 = vpop.f32.mrf.mxu1 }
 0x162   : > { %v10093_v31 = vpop.f32.mrf.mxu0 }
 0x163   : > { %12082 = vst [vmem:[#allocation24_spill] sm:$0xff] %v10093_v31  ;;  %v8306_v28 = vpop.f32.mrf.mxu1  ;;  %v1067_v31 = vadd.f32 %v9956_v26, %v822_v18 }
 0x164   : > { %v1920_v40 = vpop.f32.mrf.mxu0 }
 0x165   : > { %v1975_v50 = vadd.f32 %v1920_v40, %v9977_v17  ;;  %v10096_v27 = vpop.f32.mrf.mxu1  ;;  %v1566_v17 = vadd.f32 %v9937_v54, %v1067_v31  ;;  %v10129_v54 = vld [vmem:[%s12045_s1 + $0x1b8] sm:$0xff]  }
 0x166   : > { %12083 = vst [vmem:[#allocation25_spill] sm:$0xff] %v10096_v27  ;;  %v1922_v6 = vpop.f32.mrf.mxu0  ;;  %8375 = vmatprep.subr.bf16.mxu1 %v10129_v54 }
 0x167   : > { %v10101_v56 = vadd.f32 %v1922_v6, %v9939_v8  ;;  %v10103_v29 = vadd.f32 %v8301_v13, %v1975_v50  ;;  %v8309_v22 = vpop.f32.mrf.mxu1  ;;  %v1752_v8 = vadd.f32 %v10020_v2, %v1566_v17  ;;  %v838_v2 = vadd.f32 %v9909_v47, %v9907_v34 }
 0x168   : > { %v1924_v0 = vpop.f32.mrf.mxu0 }
 0x169   : > { %12084 = vst [vmem:[#allocation26_spill] sm:$0xff] %v10101_v56  ;;  %v10107_v51 = vadd.f32 %v1924_v0, %v9990_v14  ;;  %v2293_v27 = vpop.f32.mrf.mxu1  ;;  %v1071_v17 = vadd.f32 %v9997_v63, %v838_v2 }
 0x16a   : > { %v10109_v44 = vpop.f32.mrf.mxu0 }
 0x16b   : > { %v8310_v6 = vpop.f32.mrf.mxu1  ;;  %v1570_v47 = vadd.f32 %v9952_v38, %v1071_v17 }
 0x16c   : > { %v1930_v40 = vpop.f32.mrf.mxu0 }
 0x16d   : > { %v1977_v4 = vadd.f32 %v1930_v40, %v10009_v42  ;;  %v10123_v56 = vpop.f32.mrf.mxu1  ;;  %v10134_v42 = vld [vmem:[%s12045_s1 + $0x1f8] sm:$0xff]   ;;  %v1756_v63 = vadd.f32 %v10049_v32, %v1570_v47 }
 0x16e   : > { %v1932_v24 = vpop.f32.mrf.mxu0  ;;  %8471 = vmatprep.subr.bf16.mxu0 %v10134_v42 }
 0x16f   : > { %v10115_v50 = vadd.f32 %v1932_v24, %v9954_v58  ;;  %v10117_v13 = vadd.f32 %v2277_v12, %v1977_v4  ;;  %v10146_v4 = vpop.f32.mrf.mxu1 }
 0x170   : > { %v1934_v26 = vpop.f32.mrf.mxu0 }
 0x171   : > { %v10119_v14 = vadd.f32 %v1934_v26, %v1752_v8 }
 0x172   : > { %v10121_v0 = vpop.f32.mrf.mxu0 }
 0x174   : > { %v1940_v18 = vpop.f32.mrf.mxu0 }
 0x175   : > { %v1979_v31 = vadd.f32 %v1940_v18, %v10005_v59 }
 0x176   : > { %v1942_v58 = vpop.f32.mrf.mxu0 }
 0x177   : > { %v10139_v12 = vadd.f32 %v1942_v58, %v9975_v11  ;;  %v10141_v40 = vadd.f32 %v8305_v3, %v1979_v31  ;;  %v2431_v3 = vpop.f32.mrf.mxu1  ;;  %v790_v31 = vadd.f32 %v9876_v39, %v9874_v7 }
 0x178   : > { %v1944_v59 = vpop.f32.mrf.mxu0 }
 0x179   : > { %v1980_v24 = vadd.f32 %v1944_v59, %v10017_v49  ;;  %v10164_v59 = vpop.f32.mrf.mxu1 }
 0x17a   : > { %v10149_v8 = vpop.f32.mrf.mxu0 }
 0x17b   : > { %v10151_v26 = vadd.f32 %v8306_v28, %v1980_v24  ;;  %v1059_v28 = vadd.f32 %v9915_v1, %v790_v31  ;;  %v2434_v32 = vpop.f32.mrf.mxu1 }
 0x17c   : > { %v1950_v34 = vpop.f32.mrf.mxu0 }
 0x17d   : > { %v1981_v11 = vadd.f32 %v1950_v34, %v10036_v37  ;;  %v1743_v37 = vadd.f32 %v9960_v48, %v9913_v61  ;;  %v1558_v39 = vadd.f32 %v9919_v45, %v1059_v28  ;;  %v10183_v48 = vpop.f32.mrf.mxu1 }
 0x17e   : > { %v1952_v18 = vpop.f32.mrf.mxu0 }
 0x17f   : > { %v10159_v58 = vadd.f32 %v1952_v18, %v9995_v41  ;;  %v10161_v49 = vadd.f32 %v2293_v27, %v1981_v11  ;;  %v1969_v41 = vadd.f32 %v10039_v46, %v1743_v37  ;;  %v1744_v1 = vadd.f32 %v9973_v35, %v1558_v39 }
 0x180   : > { %v1954_v2 = vpop.f32.mrf.mxu0  ;;  %v1972_v37 = vadd.f32 %v10073_v19, %v9970_v52 }
 0x181   : > { %v10166_v38 = vadd.f32 %v1954_v2, %v1756_v63  ;;  %v2308_v18 = vadd.f32 %v10058_v10, %v1969_v41  ;;  %v1970_v61 = vadd.f32 %v10056_v21, %v1744_v1  ;;  %v10196_v10 = vld [vmem:[%s12047_s3] ss:$0 sm:$0xff]  ;;  %v2447_v63 = vpop.f32.mrf.mxu1 }
 0x182   : > { %v10168_v17 = vpop.f32.mrf.mxu0 }
 0x183   : > { %v2494_v35 = vadd.f32 %v2431_v3, %v2308_v18  ;;  %v2309_v21 = vadd.f32 %v10066_v57, %v1970_v61  ;;  %v12087_v18 = vld [vmem:[#allocation17_spill] sm:$0xff] }
 0x184   : > { %v1960_v7 = vpop.f32.mrf.mxu0 }
 0x185   : > { %v1983_v27 = vadd.f32 %v1960_v7, %v10031_v9  ;;  %v806_v9 = vadd.f32 %v9886_v43, %v9884_v33  ;;  %v1971_v33 = vadd.f32 %v10064_v36, %v9958_v5  ;;  %v8334_v7 = vpop.f32.mrf.mxu1 }
 0x186   : > { %v1962_v24 = vpop.f32.mrf.mxu0 }
 0x187   : > { %v10176_v34 = vadd.f32 %v8309_v22, %v1983_v27  ;;  %v10179_v47 = vadd.f32 %v1962_v24, %v10022_v30  ;;  %v1063_v30 = vadd.f32 %v9929_v53, %v806_v9  ;;  %v2495_v53 = vadd.f32 %v2434_v32, %v2309_v21  ;;  %v12090_v21 = vld [vmem:[#allocation8_spill] sm:$0xff] }
 0x188   : > { %v1964_v11 = vpop.f32.mrf.mxu0  ;;  %v1986_v32 = vadd.f32 %v10060_v25, %v9917_v62 }
 0x189   : > { %v1984_v45 = vadd.f32 %v1964_v11, %v10047_v23  ;;  %v1562_v28 = vadd.f32 %v9925_v15, %v1063_v30  ;;  %v12085_v15 = vld [vmem:[#allocation15_spill] sm:$0xff] }
 0x18a   : > { %v10188_v46 = vpop.f32.mrf.mxu0  ;;  %v2310_v27 = vadd.f32 %v12085_v15, %v1971_v33  ;;  %v12086_v11 = vld [vmem:[#allocation7_spill] sm:$0xff]  ;;  %v12095_v15 = vld [vmem:[#allocation24_spill] sm:$0xff] }
 0x18b   : > { %v10190_v22 = vadd.f32 %v8310_v6, %v1984_v45  ;;  %v10204_v6 = vld [vmem:[%s12047_s3 + $0x1] ss:$0 sm:$0xff]  ;;  %v1748_v41 = vadd.f32 %v9993_v20, %v1562_v28  ;;  %v1987_v61 = vadd.f32 %v12087_v18, %v12086_v11 }
 0x18c   : > { %v2641_v31 = vpop.f32.mrf.mxu0  ;;  %v12088_v45 = vld [vmem:[#allocation23_spill] sm:$0xff]  ;;  %v2496_v9 = vadd.f32 %v10146_v4, %v2310_v27 }
 0x18d   : > { %v2720_v23 = vadd.f32 %v2641_v31, %v2494_v35  ;;  %v1974_v20 = vadd.f32 %v12088_v45, %v1748_v41  ;;  %v12089_v35 = vld [vmem:[#allocation16_spill] sm:$0xff]  ;;  %v12097_v45 = vld [vmem:[#allocation25_spill] sm:$0xff] }
 0x18e   : > { %v2643_v43 = vpop.f32.mrf.mxu0 }
 0x18f   : > { %v10207_v3 = vadd.f32 %v10196_v10, %v2720_v23  ;;  %v2736_v2 = vadd.f32 %v2643_v43, %v10052_v16  ;;  %v1973_v16 = vadd.f32 %v10081_v60, %v9982_v55  ;;  %v2311_v55 = vadd.f32 %v12089_v35, %v1972_v37  ;;  %v2450_v60 = vpop.f32.mrf.mxu1  ;;  %v12091_v23 = vld [vmem:[#allocation19_spill] sm:$0xff]  ;;  %v12092_v43 = vld [vmem:[#allocation18_spill] sm:$0xff] }
 0x190   : > { %v2645_v57 = vpop.f32.mrf.mxu0  ;;  %v1988_v33 = vadd.f32 %v12091_v23, %v12090_v21 }
 0x191   : > { %v2791_v5 = vmin.f32 %v10207_v3, 0.0  ;;  %v10215_v36 = vadd.f32 %v10204_v6, %v2736_v2  ;;  %v2721_v39 = vadd.f32 %v2645_v57, %v2495_v53  ;;  %v2312_v53 = vadd.f32 %v12092_v43, %v1973_v16  ;;  %v8337_v18 = vpop.f32.mrf.mxu1 }
 0x192   : > { %v2647_v24 = vpop.f32.mrf.mxu0  ;;  %v2497_v4 = vadd.f32 %v10164_v59, %v2311_v55  ;;  %vm2775_vm7 = vcmp.gt.f32.partialorder %v10207_v3, 0.0 }
 0x193   : > { %v2807_v1 = vmul.f32 1.442695, %v2791_v5  ;;  %v2911_v52 = vmin.f32 %v10215_v36, 0.0  ;;  %v10225_v19 = vadd.f32 %v10196_v10, %v2721_v39  ;;  %v2737_v62 = vadd.f32 %v2647_v24, %v1986_v32  ;;  %v12093_v39 = vld [vmem:[#allocation21_spill] sm:$0xff] }
 0x194   : > { %v2651_v25 = vpop.f32.mrf.mxu0  ;;  %v2313_v41 = vadd.f32 %v12093_v39, %v1974_v20  ;;  %v12094_v32 = vld [vmem:[#allocation9_spill] sm:$0xff]  ;;  %v10256_v20 = vadd.f32 %v12097_v45, %v10119_v14  ;;  %v2500_v14 = vadd.f32 %v10183_v48, %v10103_v29  ;;  %v2498_v43 = vadd.f32 %v2447_v63, %v2312_v53 }
 0x195   : > { %9036 = vpow2.f32 %v2807_v1  ;;  %v2927_v30 = vmul.f32 1.442695, %v2911_v52  ;;  %v2792_v31 = vmin.f32 %v10225_v19, 0.0  ;;  %v10237_v2 = vadd.f32 %v10204_v6, %v2737_v62  ;;  %v12096_v52 = vld [vmem:[#allocation10_spill] sm:$0xff] }
 0x196   : > { %v2722_v28 = vadd.f32 %v2651_v25, %v2496_v9  ;;  %v2653_v57 = vpop.f32.mrf.mxu0  ;;  %v1990_v27 = vadd.f32 %v12095_v15, %v12094_v32  ;;  %v10249_v11 = vadd.f32 %v10109_v44, %v12096_v52  ;;  %v12098_v9 = vld [vmem:[#allocation20_spill] sm:$0xff]  ;;  %v10282_v63 = vadd.f32 %v8337_v18, %v10141_v40  ;;  %v12102_v52 = vld [vmem:[#allocation13_spill] sm:$0xff] }
 0x197   : > { %9038 = vpow2.f32 %v2927_v30  ;;  %v2809_v5 = vmul.f32 1.442695, %v2792_v31  ;;  %v2738_v37 = vadd.f32 %v2653_v57, %v1987_v61  ;;  %v2912_v24 = vmin.f32 %v10237_v2, 0.0  ;;  %v12099_v30 = vld [vmem:[#allocation11_spill] sm:$0xff]  ;;  %v12100_v57 = vld [vmem:[#allocation12_spill] sm:$0xff] }
 0x198   : > { %v10245_v1 = vadd.f32 %v10196_v10, %v2722_v28  ;;  %v2655_v16 = vpop.f32.mrf.mxu0  ;;  %v2315_v62 = vadd.f32 %v12098_v9, %v10107_v51  ;;  %v10263_v44 = vadd.f32 %v10121_v0, %v12099_v30  ;;  %v10298_v40 = vadd.f32 %v10168_v17, %v12102_v52 }
 0x199   : > { %9040 = vpow2.f32 %v2809_v5  ;;  %v10252_v59 = vadd.f32 %v10204_v6, %v2738_v37  ;;  %v2723_v61 = vadd.f32 %v2655_v16, %v2497_v4  ;;  %v2929_v25 = vmul.f32 1.442695, %v2912_v24  ;;  %v2463_v5 = vpop.f32.mrf.mxu1 }
 0x19a   : > { %v2793_v35 = vmin.f32 %v10245_v1, 0.0  ;;  %v2657_v55 = vpop.f32.mrf.mxu0  ;;  %v10273_v4 = vadd.f32 %v10149_v8, %v12100_v57  ;;  %v10279_v32 = vadd.f32 %v8334_v7, %v2315_v62  ;;  %v10286_v15 = vadd.f32 %v2463_v5, %v10117_v13 }
 0x19b   : > { %v2913_v31 = vmin.f32 %v10252_v59, 0.0  ;;  %v10267_v21 = vadd.f32 %v10196_v10, %v2723_v61  ;;  %v2739_v23 = vadd.f32 %v2657_v55, %v1988_v33  ;;  %9042 = vpow2.f32 %v2929_v25 }
 0x19c   : > { %v2811_v51 = vmul.f32 1.442695, %v2793_v35  ;;  %v2661_v28 = vpop.f32.mrf.mxu0  ;;  %v2499_v33 = vadd.f32 %v2450_v60, %v2313_v41  ;;  %v10290_v24 = vadd.f32 %v10123_v56, %v10166_v38  ;;  %v12101_v60 = vld [vmem:[#allocation22_spill] sm:$0xff]  ;;  %vm2895_vm8 = vcmp.gt.f32.partialorder %v10215_v36, 0.0 }
 0x19d   : > { %v2931_v0 = vmul.f32 1.442695, %v2913_v31  ;;  %v2794_v37 = vmin.f32 %v10267_v21, 0.0  ;;  %v10277_v39 = vadd.f32 %v10204_v6, %v2739_v23  ;;  %v2724_v29 = vadd.f32 %v2661_v28, %v2498_v43 }
 0x19e   : > { %9044 = vpow2.f32 %v2811_v51  ;;  %v2663_v48 = vpop.f32.mrf.mxu0  ;;  %vm2776_vm9 = vcmp.gt.f32.partialorder %v10225_v19, 0.0  ;;  %vm2896_vm10 = vcmp.gt.f32.partialorder %v10237_v2, 0.0  ;;  %vm2777_vm11 = vcmp.gt.f32.partialorder %v10245_v1, 0.0 }
 0x19f   : > { %9046 = vpow2.f32 %v2931_v0  ;;  %v2813_v53 = vmul.f32 1.442695, %v2794_v37  ;;  %v2914_v8 = vmin.f32 %v10277_v39, 0.0  ;;  %v10293_v7 = vadd.f32 %v10196_v10, %v2724_v29 }
 0x1a0   : > { %v2740_v41 = vadd.f32 %v2663_v48, %v12101_v60  ;;  %v2665_v16 = vpop.f32.mrf.mxu0  ;;  %vm2897_vm12 = vcmp.gt.f32.partialorder %v10252_v59, 0.0  ;;  %vm2778_vm13 = vcmp.gt.f32.partialorder %v10267_v21, 0.0  ;;  %vm2898_vm14 = vcmp.gt.f32.partialorder %v10277_v39, 0.0 }
 0x1a1   : > { %9048 = vpow2.f32 %v2813_v53  ;;  %v2933_v18 = vmul.f32 1.442695, %v2914_v8  ;;  %v2725_v61 = vadd.f32 %v2665_v16, %v2499_v33  ;;  %v2795_v56 = vmin.f32 %v10293_v7, 0.0 }
 0x1a2   : > { %v9037_v45 = vpop.eup %9036  ;;  %v10304_v13 = vadd.f32 %v10204_v6, %v2740_v41  ;;  %v2667_v38 = vpop.f32.mrf.mxu0  ;;  %vm2779_vm15 = vcmp.gt.f32.partialorder %v10293_v7, 0.0 }
 0x1a3   : > { %v7204_v9 = vadd.f32 -1.0, %v9037_v45  ;;  %9050 = vpow2.f32 %v2933_v18  ;;  %v10307_v62 = vadd.f32 %v10196_v10, %v2725_v61  ;;  %v2741_v17 = vadd.f32 %v2667_v38, %v1990_v27 }
 0x1a4   : > { %v9039_v25 = vpop.eup %9038  ;;  %v2815_v35 = vmul.f32 1.442695, %v2795_v56  ;;  %v2915_v55 = vmin.f32 %v10304_v13, 0.0  ;;  %v2671_v30 = vpop.f32.mrf.mxu0  ;;  %vm2899_vm1 = vcmp.gt.f32.partialorder %v10304_v13, 0.0 }
 0x1a5   : > { %v2855_v31 = vsel %vm2775_vm7, %v10207_v3, %v7204_v9  ;;  %v7222_v23 = vadd.f32 -1.0, %v9039_v25  ;;  %v2796_v43 = vmin.f32 %v10307_v62, 0.0  ;;  %v10316_v57 = vadd.f32 %v10204_v6, %v2741_v17 }
 0x1a6   : > { %v9041_v51 = vpop.eup %9040  ;;  %v3007_v28 = vrot.slane %v2855_v31, 7  ;;  %9052 = vpow2.f32 %v2815_v35  ;;  %v2935_v27 = vmul.f32 1.442695, %v2915_v55  ;;  %v2673_v5 = vpop.f32.mrf.mxu0  ;;  %v2726_v3 = vadd.f32 %v2671_v30, %v2500_v14 }
 0x1a7   : > { %v2975_v0 = vsel %vm2895_vm8, %v10215_v36, %v7222_v23  ;;  %v7205_v37 = vadd.f32 -1.0, %v9041_v51  ;;  %v2817_v33 = vmul.f32 1.442695, %v2796_v43  ;;  %v2916_v16 = vmin.f32 %v10316_v57, 0.0 }
 0x1a8   : > { %v3071_v29 = vsel %vm231_vm0, %v2855_v31, %v3007_v28  ;;  %v3237_v48 = vrot.slane %v2975_v0, 7  ;;  %9054 = vpow2.f32 %v2935_v27  ;;  %v2675_v53 = vpop.f32.mrf.mxu0  ;;  %v9043_v8 = vpop.eup %9042  ;;  %v10333_v38 = vadd.f32 %v10196_v10, %v2726_v3 }
 0x1a9   : > { %v7718_v60 = vpack.c.bf16 %v3071_v29, %v3071_v29  ;;  %v2856_v41 = vsel %vm2776_vm9, %v10225_v19, %v7205_v37  ;;  %9056 = vpow2.f32 %v2817_v33  ;;  %v7223_v18 = vadd.f32 -1.0, %v9043_v8  ;;  %v12103_v19 = vld [vmem:[#allocation26_spill] sm:$0xff]  ;;  %v10348_v3 = vpop.f32.mrf.mxu1 }
 0x1aa   : > { %v3008_v36 = vrot.slane %v2856_v41, 7  ;;  %v3055_v52 = vrot.slane %v2856_v41, 6  ;;  %v10328_v14 = vpop.f32.mrf.mxu0  ;;  %v3301_v45 = vsel %vm231_vm0, %v2975_v0, %v3237_v48  ;;  %v2937_v56 = vmul.f32 1.442695, %v2916_v16 }
 0x1ab   : > { %v9045_v61 = vpop.eup %9044  ;;  %3194 = vst [vmem:[#allocation3 + $0xc] sm:$0xf] %v7718_v60  ;;  %v2742_v9 = vadd.f32 %v2673_v5, %v12103_v19  ;;  %v2976_v55 = vsel %vm2896_vm10, %v10237_v2, %v7223_v18  ;;  %vm2780_vm2 = vcmp.gt.f32.partialorder %v10307_v62, 0.0  ;;  %vm2900_vm4 = vcmp.gt.f32.partialorder %v10316_v57, 0.0 }
 0x1ac   : > { %v9047_v17 = vpop.eup %9046  ;;  %v3009_v25 = vsel %vm231_vm0, %v3007_v28, %v3008_v36  ;;  %v3079_v35 = vsel %vm231_vm0, %v3008_v36, %v3055_v52  ;;  %v7206_v30 = vadd.f32 -1.0, %v9045_v61  ;;  %v10341_v31 = vpop.f32.mrf.mxu0  ;;  %v3238_v27 = vrot.slane %v2976_v55, 7 }
 0x1ad   : > { %v7719_v23 = vpack.c.bf16 %v3009_v25, %v3009_v25  ;;  %v7720_v43 = vpack.c.bf16 %v3079_v35, %v3079_v35  ;;  %v7794_v51 = vpack.c.bf16 %v3009_v25, %v3071_v29  ;;  %v3285_v37 = vrot.slane %v2976_v55, 6  ;;  %v2466_v25 = vpop.f32.mrf.mxu1 }
 0x1ae   : > { %v9049_v0 = vpop.eup %9048  ;;  %v2857_v5 = vsel %vm2777_vm11, %v10245_v1, %v7206_v30  ;;  %v7224_v28 = vadd.f32 -1.0, %v9047_v17  ;;  %9058 = vpow2.f32 %v2937_v56  ;;  %v10346_v33 = vpop.f32.mrf.mxu0  ;;  %v3239_v2 = vsel %vm231_vm0, %v3237_v48, %v3238_v27 }
 0x1af   : > { %7795 = vst [vmem:[#allocation3] sm:$0xff] %v7794_v51   ;;  %3193 = vst [vmem:[#allocation3 + $0x8] sm:$0x1] %v7720_v43  ;;  %v3010_v29 = vrot.slane %v2857_v5, 7  ;;  %v7207_v8 = vadd.f32 -1.0, %v9049_v0  ;;  %v2727_v1 = vadd.f32 %v2675_v53, %v10279_v32  ;;  %v3309_v41 = vsel %vm231_vm0, %v3238_v27, %v3285_v37 }
 0x1b0   : > { %3195 = vst [vmem:[#allocation3 + $0x10] sm:$0xf] %v7719_v23  ;;  %3196 = vst [vmem:[#allocation3 + $0x14] sm:$0x1] %v7720_v43  ;;  %v9051_v60 = vpop.eup %9050  ;;  %v7819_v16 = vpack.c.bf16 %v3239_v2, %v3301_v45  ;;  %v2977_v36 = vsel %vm2897_vm12, %v10252_v59, %v7224_v28  ;;  %v2797_v52 = vmin.f32 %v10333_v38, 0.0  ;;  %v10359_v18 = vpop.f32.mrf.mxu0  ;;  %v7744_v48 = vpack.c.bf16 %v3309_v41, %v3309_v41 }
 0x1b1   : > { %v3240_v61 = vrot.slane %v2977_v36, 7  ;;  %v2858_v56 = vsel %vm2778_vm13, %v10267_v21, %v7207_v8  ;;  %v7225_v45 = vadd.f32 -1.0, %v9051_v60  ;;  %v3072_v35 = vsel %vm231_vm0, %v2857_v5, %v3010_v29 }
 0x1b2   : > { %7820 = vst [vmem:[#allocation4] sm:$0xff] %v7819_v16   ;;  %v3011_v32 = vrot.slane %v2858_v56, 7  ;;  %v3056_v53 = vrot.slane %v2858_v56, 6  ;;  %v2819_v19 = vmul.f32 1.442695, %v2797_v52  ;;  %v10365_v17 = vpop.f32.mrf.mxu0  ;;  %v10370_v30 = vadd.f32 %v10204_v6, %v2742_v9  ;;  %v10384_v16 = vpop.f32.mrf.mxu1 }
 0x1b3   : > { %v9053_v59 = vpop.eup %9052  ;;  %3423 = vst [vmem:[#allocation4 + $0x8] sm:$0x1] %v7744_v48  ;;  %v3302_v55 = vsel %vm231_vm0, %v2977_v36, %v3240_v61  ;;  %v10373_v21 = vadd.f32 %v10196_v10, %v2727_v1  ;;  %v2978_v27 = vsel %vm2898_vm14, %v10277_v39, %v7225_v45  ;;  %vm2781_vm5 = vcmp.gt.f32.partialorder %v10333_v38, 0.0 }
 0x1b4   : > { %v7745_v23 = vpack.c.bf16 %v3302_v55, %v3302_v55  ;;  %v3012_v43 = vsel %vm231_vm0, %v3010_v29, %v3011_v32  ;;  %v3080_v51 = vsel %vm231_vm0, %v3011_v32, %v3056_v53  ;;  %v10380_v0 = vpop.f32.mrf.mxu0  ;;  %v3241_v2 = vrot.slane %v2978_v27, 7 }
 0x1b5   : > { %v9055_v37 = vpop.eup %9054  ;;  %v7723_v5 = vpack.c.bf16 %v3080_v51, %v3080_v51  ;;  %v7799_v28 = vpack.c.bf16 %v3012_v43, %v3072_v35  ;;  %v3286_v9 = vrot.slane %v2978_v27, 6  ;;  %v7208_v1 = vadd.f32 -1.0, %v9053_v59 }
 0x1b6   : > { %v9057_v8 = vpop.eup %9056  ;;  %3424 = vst [vmem:[#allocation4 + $0xc] sm:$0xf] %v7745_v23  ;;  %v7226_v60 = vadd.f32 -1.0, %v9055_v37  ;;  %9060 = vpow2.f32 %v2819_v19  ;;  %v2743_v29 = vadd.f32 %v10328_v14, %v10249_v11  ;;  %v3242_v39 = vsel %vm231_vm0, %v3240_v61, %v3241_v2  ;;  %v10395_v14 = vpop.f32.mrf.mxu0 }
 0x1b7   : > { %v8925_v41 = vld [vmem:[#allocation3 + $0xc] sm:$0xff]   ;;  %7840 = vst [vmem:[#allocation3 + $0x18] sm:$0xff] %v7799_v28   ;;  %3199 = vst [vmem:[#allocation3 + $0x20] sm:$0x1] %v7723_v5  ;;  %v3310_v36 = vsel %vm231_vm0, %v3241_v2, %v3286_v9  ;;  %v7209_v52 = vadd.f32 -1.0, %v9057_v8  ;;  %v2917_v48 = vmin.f32 %v10370_v30, 0.0  ;;  %v7746_v56 = vpack.c.bf16 %v3242_v39, %v3242_v39 }
 0x1b8   : > { %v7747_v32 = vpack.c.bf16 %v3310_v36, %v3310_v36  ;;  %v2859_v53 = vsel %vm2779_vm15, %v10293_v7, %v7208_v1  ;;  %v2979_v11 = vsel %vm2899_vm1, %v10304_v13, %v7226_v60  ;;  %8359 = vmatprep.mubr.bf16.mxu1 %v8925_v41  ;;  %v2503_v35 = vadd.f32 %v2466_v25, %v10256_v20  ;;  %v2479_v13 = vpop.f32.mrf.mxu1  ;;  %v2695_v5 = vpop.f32.mrf.mxu0  ;;  %v8937_v1 = vld [vmem:[%s12045_s1 + $0x1b0] sm:$0xff]  }
 0x1b9   : > { %v3013_v45 = vrot.slane %v2859_v53, 7  ;;  %v3243_v61 = vrot.slane %v2979_v11, 7  ;;  %v2860_v19 = vsel %vm2780_vm2, %v10307_v62, %v7209_v52  ;;  %v2939_v59 = vmul.f32 1.442695, %v2917_v48  ;;  %3425 = vst [vmem:[#allocation4 + $0x10] sm:$0xf] %v7746_v56 }
 0x1ba   : > { %3426 = vst [vmem:[#allocation4 + $0x14] sm:$0x1] %v7747_v32  ;;  %v3014_v55 = vrot.slane %v2860_v19, 7  ;;  %v3057_v7 = vrot.slane %v2860_v19, 6  ;;  %v2798_v23 = vmin.f32 %v10373_v21, 0.0  ;;  %v10405_v27 = vadd.f32 %v10204_v6, %v2743_v29  ;;  %v8342_v52 = vpop.f32.mrf.mxu1 }
 0x1bb   : > { %v9059_v43 = vpop.eup %9058  ;;  %v3073_v51 = vsel %vm231_vm0, %v2859_v53, %v3013_v45  ;;  %9062 = vpow2.f32 %v2939_v59  ;;  %v3303_v28 = vsel %vm231_vm0, %v2979_v11, %v3243_v61  ;;  %v2728_v41 = vadd.f32 %v10341_v31, %v10286_v15 }
 0x1bc   : > { %v7724_v62 = vpack.c.bf16 %v3073_v51, %v3073_v51  ;;  %v3015_v37 = vsel %vm231_vm0, %v3013_v45, %v3014_v55  ;;  %v3081_v20 = vsel %vm231_vm0, %v3014_v55, %v3057_v7  ;;  %v7227_v25 = vadd.f32 -1.0, %v9059_v43 }
 0x1bd   : > { %v7725_v2 = vpack.c.bf16 %v3015_v37, %v3015_v37  ;;  %v7726_v9 = vpack.c.bf16 %v3081_v20, %v3081_v20  ;;  %v2821_v8 = vmul.f32 1.442695, %v2798_v23  ;;  %v2918_v29 = vmin.f32 %v10405_v27, 0.0 }
 0x1be   : > { %3200 = vst [vmem:[#allocation3 + $0x24] sm:$0xf] %v7724_v62  ;;  %v2980_v60 = vsel %vm2900_vm4, %v10316_v57, %v7227_v25  ;;  %v2744_v39 = vadd.f32 %v10346_v33, %v10115_v50  ;;  %v8929_v36 = vld [vmem:[#allocation3 + $0x18] sm:$0xff]   ;;  %v2729_v32 = vadd.f32 %v10359_v18, %v2503_v35  ;;  %v10421_v57 = vadd.f32 %v10196_v10, %v2728_v41  ;;  %v10428_v50 = vpop.f32.mrf.mxu0  ;;  %v8941_v41 = vld [vmem:[%s12045_s1 + $0x1e8] sm:$0xff]  }
 0x1bf   : > { %3201 = vst [vmem:[#allocation3 + $0x28] sm:$0xf] %v7725_v2  ;;  %3202 = vst [vmem:[#allocation3 + $0x2c] sm:$0x1] %v7726_v9  ;;  %v3244_v48 = vrot.slane %v2980_v60, 7  ;;  %v3287_v56 = vrot.slane %v2980_v60, 6  ;;  %9064 = vpow2.f32 %v2821_v8  ;;  %v2745_v15 = vadd.f32 %v10365_v17, %v10263_v44  ;;  %8360 = vmatmul.mubr.bf16.vlgmr.msra.gmra.mxu1 %v8929_v36  ;;  %8423 = vmatprep.mubr.bf16.mxu0 %v8929_v36 }
 0x1c0   : > { %v2941_v53 = vmul.f32 1.442695, %v2918_v29  ;;  %v10424_v11 = vadd.f32 %v10204_v6, %v2744_v39  ;;  %v10433_v18 = vadd.f32 %v10196_v10, %v2729_v32  ;;  %v2730_v45 = vadd.f32 %v10380_v0, %v10282_v63  ;;  %8376 = vmatpush3.bf16.msra.mxu1 %v10129_v54  ;;  %v2482_v0 = vpop.f32.mrf.mxu1 }
 0x1c1   : > { %v3245_v31 = vsel %vm231_vm0, %v3243_v61, %v3244_v48  ;;  %v3311_v33 = vsel %vm231_vm0, %v3244_v48, %v3287_v56  ;;  %v2505_v19 = vadd.f32 %v10348_v3, %v10151_v26  ;;  %8377 = vmatprep.subr.bf16.mxu1 %v8937_v1  ;;  %v8940_v61 = vld [vmem:[%s12045_s1 + $0x1a8] sm:$0xff]   ;;  %v10445_v35 = vadd.f32 %v10384_v16, %v10176_v34  ;;  %v2701_v16 = vpop.f32.mrf.mxu0 }
 0x1c2   : > { %v7750_v44 = vpack.c.bf16 %v3311_v33, %v3311_v33  ;;  %v7824_v17 = vpack.c.bf16 %v3245_v31, %v3303_v28  ;;  %9066 = vpow2.f32 %v2941_v53  ;;  %v2506_v63 = vadd.f32 %v2479_v13, %v10161_v49 }
 0x1c3   : > { %v9061_v59 = vpop.eup %9060  ;;  %v2799_v54 = vmin.f32 %v10421_v57, 0.0  ;;  %v2919_v26 = vmin.f32 %v10424_v11, 0.0  ;;  %v10451_v3 = vadd.f32 %v8342_v52, %v10190_v22  ;;  %v2800_v55 = vmin.f32 %v10433_v18, 0.0  ;;  %v2703_v9 = vpop.f32.mrf.mxu0 }
 0x1c4   : > { %7844 = vst [vmem:[#allocation4 + $0x18] sm:$0xff] %v7824_v17   ;;  %3429 = vst [vmem:[#allocation4 + $0x20] sm:$0x1] %v7750_v44  ;;  %v10455_v7 = vadd.f32 %v10204_v6, %v2745_v15  ;;  %v10458_v34 = vadd.f32 %v10196_v10, %v2730_v45  ;;  %v2746_v43 = vadd.f32 %v10395_v14, %v10139_v12  ;;  %8378 = vmatpush3.bf16.msra.mxu1 %v8937_v1  ;;  %v8938_v12 = vld [vmem:[%s12045_s1 + $0x1f0] sm:$0xff]  }
 0x1c5   : > { %v2823_v49 = vmul.f32 1.442695, %v2799_v54  ;;  %v2943_v23 = vmul.f32 1.442695, %v2919_v26  ;;  %v2731_v13 = vadd.f32 %v2695_v5, %v2505_v19  ;;  %v2507_v22 = vadd.f32 %v2482_v0, %v10290_v24  ;;  %8379 = vmatprep.subr.bf16.mxu1 %v8940_v61  ;;  %v8942_v24 = vld [vmem:[%s12045_s1 + $0x1a0] sm:$0xff]   ;;  %v2705_v53 = vpop.f32.mrf.mxu0 }
 0x1c6   : > { %v7210_v51 = vadd.f32 -1.0, %v9061_v59  ;;  %v2825_v62 = vmul.f32 1.442695, %v2800_v55  ;;  %v2920_v37 = vmin.f32 %v10455_v7, 0.0  ;;  %vm2901_vm7 = vcmp.gt.f32.partialorder %v10370_v30, 0.0  ;;  %v10467_v25 = vld [vmem:[#allocation3 + $0x24] sm:$0xff]  }
 0x1c7   : > { %9068 = vpow2.f32 %v2823_v49  ;;  %v2801_v20 = vmin.f32 %v10458_v34, 0.0  ;;  %v10476_v28 = vadd.f32 %v10204_v6, %v2746_v43  ;;  %v10479_v2 = vadd.f32 %v10196_v10, %v2731_v13  ;;  %8363 = vmatprep.mubr.bf16.mxu1 %v10467_v25  ;;  %8424 = vmatmul.mubr.bf16.vlgmr.msra.gmra.mxu0 %v10467_v25  ;;  %v8943_v59 = vld [vmem:[%s12045_s1 + $0x1e0] sm:$0xff]  }
 0x1c8   : > { %v9063_v14 = vpop.eup %9062  ;;  %9070 = vpow2.f32 %v2943_v23  ;;  %v2945_v5 = vmul.f32 1.442695, %v2920_v37  ;;  %vm2782_vm8 = vcmp.gt.f32.partialorder %v10373_v21, 0.0  ;;  %v2861_v60 = vsel %vm2781_vm5, %v10333_v38, %v7210_v51  ;;  %8472 = vmatpush3.bf16.msra.mxu0 %v10134_v42  ;;  %8380 = vmatpush3.bf16.msra.mxu1 %v8940_v61  ;;  %v8945_v42 = vld [vmem:[%s12045_s1 + $0x198] sm:$0xff]   ;;  %v2707_v51 = vpop.f32.mrf.mxu0 }
 0x1c9   : > { %v7228_v8 = vadd.f32 -1.0, %v9063_v14  ;;  %9072 = vpow2.f32 %v2825_v62  ;;  %v2827_v1 = vmul.f32 1.442695, %v2801_v20  ;;  %vm2902_vm9 = vcmp.gt.f32.partialorder %v10405_v27, 0.0  ;;  %8473 = vmatprep.subr.bf16.mxu0 %v8938_v12  ;;  %8381 = vmatprep.subr.bf16.mxu1 %v8942_v24 }
 0x1ca   : > { %9074 = vpow2.f32 %v2945_v5  ;;  %v2921_v29 = vmin.f32 %v10476_v28, 0.0  ;;  %v2802_v38 = vmin.f32 %v10479_v2, 0.0  ;;  %v2747_v36 = vadd.f32 %v10428_v50, %v10273_v4 }
 0x1cb   : > { %v10496_v39 = vsel %vm2901_vm7, %v10370_v30, %v7228_v8  ;;  %9076 = vpow2.f32 %v2827_v1  ;;  %v2732_v32 = vadd.f32 %v2701_v16, %v2506_v63  ;;  %v2748_v30 = vadd.f32 %v2703_v9, %v10159_v58  ;;  %v8947_v63 = vld [vmem:[%s12045_s1 + $0x190] sm:$0xff]  }
 0x1cc   : > { %v9065_v52 = vpop.eup %9064  ;;  %v3246_v48 = vrot.slane %v10496_v39, 7  ;;  %v2947_v56 = vmul.f32 1.442695, %v2921_v29  ;;  %v3016_v15 = vrot.slane %v2861_v60, 7  ;;  %v2829_v33 = vmul.f32 1.442695, %v2802_v38  ;;  %8474 = vmatpush3.bf16.msra.mxu0 %v8938_v12  ;;  %8382 = vmatpush3.bf16.msra.mxu1 %v8942_v24 }
 0x1cd   : > { %v7211_v31 = vadd.f32 -1.0, %v9065_v52  ;;  %v10507_v45 = vadd.f32 %v10204_v6, %v2747_v36  ;;  %vm2783_vm10 = vcmp.gt.f32.partialorder %v10421_v57, 0.0  ;;  %v10513_v50 = vadd.f32 %v10196_v10, %v2732_v32  ;;  %8475 = vmatprep.subr.bf16.mxu0 %v8941_v41  ;;  %8383 = vmatprep.subr.bf16.mxu1 %v8945_v42  ;;  %v8946_v24 = vld [vmem:[%s12045_s1 + $0x1d8] sm:$0xff]  }
 0x1ce   : > { %v3304_v4 = vsel %vm231_vm0, %v10496_v39, %v3246_v48  ;;  %9078 = vpow2.f32 %v2947_v56  ;;  %v10516_v19 = vadd.f32 %v10204_v6, %v2748_v30  ;;  %vm2903_vm11 = vcmp.gt.f32.partialorder %v10424_v11, 0.0  ;;  %v10552_v56 = vpop.f32.mrf.mxu0 }
 0x1cf   : > { %v9067_v58 = vpop.eup %9066  ;;  %v7751_v44 = vpack.c.bf16 %v3304_v4, %v3304_v4  ;;  %v2862_v17 = vsel %vm2782_vm8, %v10373_v21, %v7211_v31  ;;  %9080 = vpow2.f32 %v2829_v33  ;;  %v2733_v61 = vadd.f32 %v2705_v53, %v2507_v22  ;;  %v8954_v53 = vld [vmem:[%s12045_s1 + $0x180] sm:$0xff]  }
 0x1d0   : > { %v3017_v0 = vrot.slane %v2862_v17, 7  ;;  %v3058_v54 = vrot.slane %v2862_v17, 6  ;;  %v7229_v26 = vadd.f32 -1.0, %v9067_v58  ;;  %vm2784_vm12 = vcmp.gt.f32.partialorder %v10433_v18, 0.0  ;;  %8476 = vmatpush3.bf16.msra.mxu0 %v8941_v41  ;;  %8384 = vmatpush3.bf16.msra.mxu1 %v8945_v42 }
 0x1d1   : > { %v2922_v21 = vmin.f32 %v10507_v45, 0.0  ;;  %v3074_v55 = vsel %vm231_vm0, %v2861_v60, %v3016_v15  ;;  %3430 = vst [vmem:[#allocation4 + $0x24] sm:$0xf] %v7751_v44  ;;  %vm2904_vm13 = vcmp.gt.f32.partialorder %v10455_v7, 0.0  ;;  %v2803_v16 = vmin.f32 %v10513_v50, 0.0  ;;  %8477 = vmatprep.subr.bf16.mxu0 %v8943_v59  ;;  %8385 = vmatprep.subr.bf16.mxu1 %v8947_v63 }
 0x1d2   : > { %v2923_v49 = vmin.f32 %v10516_v19, 0.0  ;;  %v3018_v23 = vsel %vm231_vm0, %v3016_v15, %v3017_v0  ;;  %v3082_v43 = vsel %vm231_vm0, %v3017_v0, %v3058_v54  ;;  %v2982_v13 = vsel %vm2902_vm9, %v10405_v27, %v7229_v26  ;;  %v8950_v27 = vld [vmem:[%s12045_s1 + $0x188] sm:$0xff]   ;;  %v2713_v54 = vpop.f32.mrf.mxu0 }
 0x1d3   : > { %v2949_v22 = vmul.f32 1.442695, %v2922_v21  ;;  %v7729_v62 = vpack.c.bf16 %v3082_v43, %v3082_v43  ;;  %v7804_v37 = vpack.c.bf16 %v3018_v23, %v3074_v55  ;;  %v3247_v20 = vrot.slane %v2982_v13, 7  ;;  %v10586_v23 = vld [vmem:[%s12045_s1 + $0x3f8] sm:$0xff]  }
 0x1d4   : > { %v3288_v12 = vrot.slane %v2982_v13, 6  ;;  %vm2785_vm14 = vcmp.gt.f32.partialorder %v10458_v34, 0.0  ;;  %v9069_v14 = vpop.eup %9068  ;;  %v2831_v5 = vmul.f32 1.442695, %v2803_v16  ;;  %v2951_v9 = vmul.f32 1.442695, %v2923_v49  ;;  %8478 = vmatpush3.bf16.msra.mxu0 %v8943_v59  ;;  %8386 = vmatpush3.bf16.msra.mxu1 %v8947_v63 }
 0x1d5   : > { %9082 = vpow2.f32 %v2949_v22  ;;  %v10547_v8 = vadd.f32 %v10196_v10, %v2733_v61  ;;  %v9071_v1 = vpop.eup %9070  ;;  %7841 = vst [vmem:[#allocation3 + $0x30] sm:$0xff] %v7804_v37   ;;  %3205 = vst [vmem:[#allocation3 + $0x38] sm:$0x1] %v7729_v62  ;;  %v3248_v60 = vsel %vm231_vm0, %v3246_v48, %v3247_v20  ;;  %v7212_v41 = vadd.f32 -1.0, %v9069_v14  ;;  %8479 = vmatprep.subr.bf16.mxu0 %v8946_v24  ;;  %v8953_v49 = vld [vmem:[%s12045_s1 + $0x1c8] sm:$0xff]  }
 0x1d6   : > { %v3312_v29 = vsel %vm231_vm0, %v3247_v20, %v3288_v12  ;;  %v2749_v39 = vadd.f32 %v2707_v51, %v10298_v40  ;;  %v9073_v38 = vpop.eup %9072  ;;  %v7752_v36 = vpack.c.bf16 %v3248_v60, %v3248_v60  ;;  %v7230_v52 = vadd.f32 -1.0, %v9071_v1  ;;  %v8948_v40 = vld [vmem:[%s12045_s1 + $0x1d0] sm:$0xff]   ;;  %8387 = vmatprep.subr.bf16.mxu1 %v8950_v27 }
 0x1d7   : > { %v7753_v42 = vpack.c.bf16 %v3312_v29, %v3312_v29  ;;  %9084 = vpow2.f32 %v2831_v5  ;;  %v9075_v32 = vpop.eup %9074  ;;  %v2863_v30 = vsel %vm2783_vm10, %v10421_v57, %v7212_v41  ;;  %v7213_v48 = vadd.f32 -1.0, %v9073_v38  ;;  %v8955_v38 = vld [vmem:[%s12045_s1 + $0x1c0] sm:$0xff]  }
 0x1d8   : > { %vm2905_vm15 = vcmp.gt.f32.partialorder %v10476_v28, 0.0  ;;  %9086 = vpow2.f32 %v2951_v9  ;;  %v9077_v15 = vpop.eup %9076  ;;  %3431 = vst [vmem:[#allocation4 + $0x28] sm:$0xf] %v7752_v36  ;;  %v3019_v31 = vrot.slane %v2863_v30, 7  ;;  %v2983_v57 = vsel %vm2903_vm11, %v10424_v11, %v7230_v52  ;;  %8480 = vmatpush3.bf16.msra.mxu0 %v8946_v24  ;;  %8388 = vmatpush3.bf16.msra.mxu1 %v8950_v27  ;;  %v2715_v9 = vpop.f32.mrf.mxu0 }
 0x1d9   : > { %3432 = vst [vmem:[#allocation4 + $0x2c] sm:$0x1] %v7753_v42  ;;  %v7231_v33 = vadd.f32 -1.0, %v9075_v32  ;;  %vm2786_vm1 = vcmp.gt.f32.partialorder %v10479_v2, 0.0  ;;  %v2804_v4 = vmin.f32 %v10547_v8, 0.0  ;;  %v3249_v58 = vrot.slane %v2983_v57, 7  ;;  %8481 = vmatprep.subr.bf16.mxu0 %v8948_v40  ;;  %8389 = vmatprep.subr.bf16.mxu1 %v8954_v53 }
 0x1da   : > { %v2864_v44 = vsel %vm2784_vm12, %v10433_v18, %v7213_v48  ;;  %v7214_v17 = vadd.f32 -1.0, %v9077_v15  ;;  %v10573_v61 = vadd.f32 %v10204_v6, %v2749_v39  ;;  %v3075_v59 = vsel %vm231_vm0, %v2863_v30, %v3019_v31 }
 0x1db   : > { %v3020_v63 = vrot.slane %v2864_v44, 7  ;;  %v3059_v0 = vrot.slane %v2864_v44, 6  ;;  %v2984_v11 = vsel %vm2904_vm13, %v10455_v7, %v7231_v33  ;;  %v9079_v26 = vpop.eup %9078  ;;  %v7730_v21 = vpack.c.bf16 %v3075_v59, %v3075_v59 }
 0x1dc   : > { %v3305_v55 = vsel %vm231_vm0, %v2983_v57, %v3249_v58  ;;  %v3250_v18 = vrot.slane %v2984_v11, 7  ;;  %v3289_v16 = vrot.slane %v2984_v11, 6  ;;  %v9081_v7 = vpop.eup %9080  ;;  %v2865_v22 = vsel %vm2785_vm14, %v10458_v34, %v7214_v17  ;;  %v10593_v62 = vld [vmem:[#allocation3 + $0x30] sm:$0xff]   ;;  %8482 = vmatpush3.bf16.msra.mxu0 %v8948_v40  ;;  %8390 = vmatpush3.bf16.msra.mxu1 %v8954_v53 }
 0x1dd   : > { %v3021_v43 = vsel %vm231_vm0, %v3019_v31, %v3020_v63  ;;  %v3083_v13 = vsel %vm231_vm0, %v3020_v63, %v3059_v0  ;;  %v7232_v51 = vadd.f32 -1.0, %v9079_v26  ;;  %3206 = vst [vmem:[#allocation3 + $0x3c] sm:$0xf] %v7730_v21  ;;  %vm2906_vm2 = vcmp.gt.f32.partialorder %v10507_v45, 0.0  ;;  %8364 = vmatmul.mubr.bf16.gmra.mxu1 %v10593_v62  ;;  %8427 = vmatprep.mubr.bf16.mxu0 %v10593_v62  ;;  %v2717_v21 = vpop.f32.mrf.mxu0 }
 0x1de   : > { %v7731_v37 = vpack.c.bf16 %v3021_v43, %v3021_v43  ;;  %v7732_v20 = vpack.c.bf16 %v3083_v13, %v3083_v13  ;;  %v3251_v12 = vsel %vm231_vm0, %v3249_v58, %v3250_v18  ;;  %v3313_v24 = vsel %vm231_vm0, %v3250_v18, %v3289_v16  ;;  %8483 = vmatprep.subr.bf16.mxu0 %v8953_v49 }
 0x1df   : > { %v7756_v27 = vpack.c.bf16 %v3313_v24, %v3313_v24  ;;  %v7829_v14 = vpack.c.bf16 %v3251_v12, %v3305_v55  ;;  %v2985_v5 = vsel %vm2905_vm15, %v10476_v28, %v7232_v51  ;;  %v3022_v34 = vrot.slane %v2865_v22, 7  ;;  %8439 = vmatprep.subr.bf16.mxu1 %v10586_v23  ;;  %v12104_v55 = vld [vmem:[#allocation14_spill] sm:$0xff] }
 0x1e0   : > { %3207 = vst [vmem:[#allocation3 + $0x40] sm:$0xf] %v7731_v37  ;;  %3208 = vst [vmem:[#allocation3 + $0x44] sm:$0x1] %v7732_v20  ;;  %v3252_v1 = vrot.slane %v2985_v5, 7  ;;  %v7215_v60 = vadd.f32 -1.0, %v9081_v7  ;;  %v2734_v41 = vadd.f32 %v10552_v56, %v10445_v35  ;;  %v2750_v39 = vadd.f32 %v2713_v54, %v10179_v47  ;;  %8484 = vmatpush3.bf16.msra.mxu0 %v8953_v49 }
 0x1e1   : > { %v2833_v29 = vmul.f32 1.442695, %v2804_v4  ;;  %7845 = vst [vmem:[#allocation4 + $0x30] sm:$0xff] %v7829_v14   ;;  %3435 = vst [vmem:[#allocation4 + $0x38] sm:$0x1] %v7756_v27  ;;  %vm2787_vm4 = vcmp.gt.f32.partialorder %v10513_v50, 0.0  ;;  %v2735_v32 = vadd.f32 %v2715_v9, %v10451_v3  ;;  %v3076_v40 = vsel %vm231_vm0, %v2865_v22, %v3022_v34  ;;  %8485 = vmatprep.subr.bf16.mxu0 %v8955_v38 }
 0x1e2   : > { %v2924_v28 = vmin.f32 %v10573_v61, 0.0  ;;  %v9083_v36 = vpop.eup %9082  ;;  %v3306_v42 = vsel %vm231_vm0, %v2985_v5, %v3252_v1  ;;  %v2866_v52 = vsel %vm2786_vm1, %v10479_v2, %v7215_v60  ;;  %v10619_v15 = vadd.f32 %v10196_v10, %v2734_v41  ;;  %v4269_v20 = vld [vmem:[#allocation3] sm:$0xf]  ;;  %v9133_v27 = vld [vmem:[%s12047_s3 + $0x1] ss:$0 sm:$0xff] }
 0x1e3   : > { %9088 = vpow2.f32 %v2833_v29  ;;  %v7757_v35 = vpack.c.bf16 %v3306_v42, %v3306_v42  ;;  %v3023_v56 = vrot.slane %v2866_v52, 7  ;;  %v3060_v47 = vrot.slane %v2866_v52, 6  ;;  %v10664_v5 = vld [vmem:[#allocation3 + $0x4] sm:$0xf] }
 0x1e4   : > { %v7233_v30 = vadd.f32 -1.0, %v9083_v36  ;;  %v9085_v48 = vpop.eup %9084  ;;  %v2953_v53 = vmul.f32 1.442695, %v2924_v28  ;;  %v10622_v31 = vadd.f32 %v10204_v6, %v2750_v39  ;;  %v10632_v6 = vld [vmem:[%s12045_s1 + $0x378] sm:$0xff]   ;;  %8486 = vmatpush3.bf16.msra.mxu0 %v8955_v38  ;;  %v2000_v18 = vadd.f32 %v10188_v46, %v12104_v55 }
 0x1e5   : > { %v9087_v57 = vpop.eup %9086  ;;  %3436 = vst [vmem:[#allocation4 + $0x3c] sm:$0xf] %v7757_v35  ;;  %v3024_v2 = vsel %vm231_vm0, %v3022_v34, %v3023_v56  ;;  %v3084_v3 = vsel %vm231_vm0, %v3023_v56, %v3060_v47  ;;  %v7216_v4 = vadd.f32 -1.0, %v9085_v48  ;;  %8535 = vmatprep.subr.bf16.mxu0 %v10632_v6  ;;  %vm2907_vm5 = vcmp.gt.f32.partialorder %v10516_v19, 0.0  ;;  %v4272_v35 = vld [vmem:[#allocation3 + $0xc] sm:$0xf] }
 0x1e6   : > { %v2986_v33 = vsel %vm2906_vm2, %v10507_v45, %v7233_v30  ;;  %v7735_v58 = vpack.c.bf16 %v3084_v3, %v3084_v3  ;;  %v7809_v44 = vpack.c.bf16 %v3024_v2, %v3076_v40  ;;  %9090 = vpow2.f32 %v2953_v53  ;;  %v9132_v45 = vld [vmem:[%s12047_s3] ss:$0 sm:$0xff] }
 0x1e7   : > { %v3253_v10 = vrot.slane %v2986_v33, 7  ;;  %v3290_v17 = vrot.slane %v2986_v33, 6  ;;  %v10637_v59 = vsel %vm2787_vm4, %v10513_v50, %v7216_v4  ;;  %v10642_v63 = vadd.f32 %v9132_v45, %v2735_v32  ;;  %v10644_v0 = vld [vmem:[#allocation3 + $0x3c] sm:$0xff]   ;;  %v10684_v33 = vld [vmem:[#allocation3 + $0x8] sm:$0x1] }
 0x1e8   : > { %7842 = vst [vmem:[#allocation3 + $0x48] sm:$0xff] %v7809_v44   ;;  %3211 = vst [vmem:[#allocation3 + $0x50] sm:$0x1] %v7735_v58  ;;  %v3025_v26 = vrot.slane %v10637_v59, 7  ;;  %v2805_v50 = vmin.f32 %v10619_v15, 0.0  ;;  %8367 = vmatprep.mubr.bf16.mxu1 %v10644_v0  ;;  %8428 = vmatmul.mubr.bf16.gmra.mxu0 %v10644_v0  ;;  %v2925_v13 = vmin.f32 %v10622_v31, 0.0  ;;  %v2751_v46 = vadd.f32 %v2717_v21, %v2000_v18 }
 0x1e9   : > { %v3254_v11 = vsel %vm231_vm0, %v3252_v1, %v3253_v10  ;;  %v3314_v54 = vsel %vm231_vm0, %v3253_v10, %v3290_v17  ;;  %v2806_v51 = vmin.f32 %v10642_v63, 0.0  ;;  %v7234_v12 = vadd.f32 -1.0, %v9087_v57  ;;  %v10689_v58 = vld [vmem:[#allocation3 + $0x10] sm:$0xf] }
 0x1ea   : > { %v7758_v16 = vpack.c.bf16 %v3254_v11, %v3254_v11  ;;  %v7759_v49 = vpack.c.bf16 %v3314_v54, %v3314_v54  ;;  %v3077_v7 = vsel %vm231_vm0, %v10637_v59, %v3025_v26  ;;  %v2835_v43 = vmul.f32 1.442695, %v2805_v50  ;;  %v4275_v50 = vld [vmem:[#allocation3 + $0x18] sm:$0xf] }
 0x1eb   : > { %v7736_v22 = vpack.c.bf16 %v3077_v7, %v3077_v7  ;;  %v2955_v37 = vmul.f32 1.442695, %v2925_v13  ;;  %v2837_v24 = vmul.f32 1.442695, %v2806_v51  ;;  %v10662_v14 = vadd.f32 %v9133_v27, %v2751_v46 }
 0x1ec   : > { %3437 = vst [vmem:[#allocation4 + $0x40] sm:$0xf] %v7758_v16  ;;  %3438 = vst [vmem:[#allocation4 + $0x44] sm:$0x1] %v7759_v49  ;;  %9092 = vpow2.f32 %v2835_v43  ;;  %v4300_v29 = vshrl.u32 %v4269_v20, 16  ;;  %v4303_v28 = vshll.u32 %v4269_v20, 16  ;;  %v2987_v39 = vsel %vm2907_vm5, %v10516_v19, %v7234_v12 }
 0x1ed   : > { %3212 = vst [vmem:[#allocation3 + $0x54] sm:$0xf] %v7736_v22  ;;  %9094 = vpow2.f32 %v2955_v37  ;;  %v2926_v34 = vmin.f32 %v10662_v14, 0.0  ;;  %v4309_v41 = vshll.u32 %v10664_v5, 16  ;;  %vm2788_vm7 = vcmp.gt.f32.partialorder %v10547_v8, 0.0 }
 0x1ee   : > { %9096 = vpow2.f32 %v2837_v24  ;;  %v4313_v36 = vshrl.u32 %v10664_v5, 16  ;;  %v3255_v47 = vrot.slane %v2987_v39, 7  ;;  %v4302_v30 = vrot.slane %v4300_v29, 4  ;;  %v10700_v49 = vld [vmem:[#allocation3 + $0x1c] sm:$0xf] }
 0x1ef   : > { %v10668_v60 = vld [vmem:[#allocation3 + $0x48] sm:$0xff]   ;;  %v2957_v38 = vmul.f32 1.442695, %v2926_v34  ;;  %v4305_v48 = vrot.slane %v4303_v28, 5  ;;  %v10677_v19 = vrot.slane %v4309_v41, 5  ;;  %vm2908_vm8 = vcmp.gt.f32.partialorder %v10573_v61, 0.0 }
 0x1f0   : > { %v9089_v9 = vpop.eup %9088  ;;  %8368 = vmatmul.mubr.bf16.gmra.mxu1 %v10668_v60  ;;  %8431 = vmatprep.mubr.bf16.mxu0 %v10668_v60  ;;  %vm2789_vm9 = vcmp.gt.f32.partialorder %v10619_v15, 0.0  ;;  %vm2909_vm10 = vcmp.gt.f32.partialorder %v10622_v31, 0.0  ;;  %v4324_v44 = vshrl.u32 %v4272_v35, 16  ;;  %vm2790_vm11 = vcmp.gt.f32.partialorder %v10642_v63, 0.0 }
 0x1f1   : > { %v7217_v1 = vadd.f32 -1.0, %v9089_v9  ;;  %9098 = vpow2.f32 %v2957_v38  ;;  %v4306_v59 = vor.u32 %v4305_v48, %v4302_v30  ;;  %v3307_v11 = vsel %vm231_vm0, %v2987_v39, %v3255_v47 }
 0x1f2   : > { %v4319_v54 = vshll.u32 %v10684_v33, 16  ;;  %vm2910_vm12 = vcmp.gt.f32.partialorder %v10662_v14, 0.0  ;;  %v4333_v16 = vshll.u32 %v10689_v58, 16  ;;  %v10702_v22 = vrot.slane %v4324_v44, 4 }
 0x1f3   : > { %v2868_v42 = vsel %vm2788_vm7, %v10547_v8, %v7217_v1  ;;  %v9091_v56 = vpop.eup %9090  ;;  %v10681_v8 = vrot.slane %v4313_v36, 4  ;;  %v4337_v51 = vshrl.u32 %v10689_v58, 16  ;;  %v10708_v12 = vrot.slane %v4306_v59, 4 }
 0x1f4   : > { %v3026_v52 = vrot.slane %v2868_v42, 7  ;;  %v3061_v32 = vrot.slane %v2868_v42, 6  ;;  %v7235_v57 = vadd.f32 -1.0, %v9091_v56  ;;  %v4348_v24 = vshrl.u32 %v4275_v50, 16 }
 0x1f5   : > { %v4351_v34 = vshll.u32 %v4275_v50, 16  ;;  %v4357_v1 = vshll.u32 %v10700_v49, 16  ;;  %v10714_v41 = vrot.slane %v4333_v16, 5 }
 0x1f6   : > { %v3027_v40 = vsel %vm231_vm0, %v3025_v26, %v3026_v52  ;;  %v3085_v53 = vsel %vm231_vm0, %v3026_v52, %v3061_v32  ;;  %v2988_v4 = vsel %vm2908_vm8, %v10573_v61, %v7235_v57  ;;  %v4316_v61 = vor.u32 %v10681_v8, %v10677_v19 }
 0x1f7   : > { %v7737_v2 = vpack.c.bf16 %v3027_v40, %v3027_v40  ;;  %v7738_v3 = vpack.c.bf16 %v3085_v53, %v3085_v53  ;;  %v3256_v10 = vrot.slane %v2988_v4, 7  ;;  %v3291_v17 = vrot.slane %v2988_v4, 6 }
 0x1f8   : > { %v4327_v26 = vshll.u32 %v4272_v35, 16  ;;  %v4339_v52 = vrot.slane %v4337_v51, 4  ;;  %v4353_v40 = vrot.slane %v4351_v34, 5  ;;  %v10726_v53 = vrot.slane %v4357_v1, 5  ;;  %v10745_v51 = vld [vmem:[#allocation3 + $0x28] sm:$0xf] }
 0x1f9   : > { %3213 = vst [vmem:[#allocation3 + $0x58] sm:$0xf] %v7737_v2  ;;  %3214 = vst [vmem:[#allocation3 + $0x5c] sm:$0x1] %v7738_v3  ;;  %v9093_v45 = vpop.eup %9092  ;;  %v3257_v21 = vsel %vm231_vm0, %v3255_v47, %v3256_v10  ;;  %v3315_v55 = vsel %vm231_vm0, %v3256_v10, %v3291_v17  ;;  %v10730_v2 = vld [vmem:[#allocation3 + $0x14] sm:$0x1] }
 0x1fa   : > { %v7218_v18 = vadd.f32 -1.0, %v9093_v45  ;;  %v9095_v7 = vpop.eup %9094  ;;  %v7762_v43 = vpack.c.bf16 %v3315_v55, %v3315_v55  ;;  %v7834_v13 = vpack.c.bf16 %v3257_v21, %v3307_v11  ;;  %v4329_v28 = vrot.slane %v4327_v26, 5 }
 0x1fb   : > { %v9097_v46 = vpop.eup %9096  ;;  %v7236_v20 = vadd.f32 -1.0, %v9095_v7  ;;  %v4317_v11 = vrot.slane %v4316_v61, 4  ;;  %v4340_v50 = vor.u32 %v4339_v52, %v10714_v41  ;;  %v4343_v21 = vshll.u32 %v10730_v2, 16  ;;  %v10742_v7 = vld [vmem:[#allocation3 + $0x20] sm:$0x1] }
 0x1fc   : > { %v2869_v37 = vsel %vm2789_vm9, %v10619_v15, %v7218_v18  ;;  %7846 = vst [vmem:[#allocation4 + $0x48] sm:$0xff] %v7834_v13   ;;  %3441 = vst [vmem:[#allocation4 + $0x50] sm:$0x1] %v7762_v43  ;;  %v7219_v9 = vadd.f32 -1.0, %v9097_v46  ;;  %v4361_v15 = vshrl.u32 %v10700_v49, 16  ;;  %v4330_v26 = vor.u32 %v4329_v28, %v10702_v22  ;;  %v9020_v46 = vld [vmem:[%s12045_s1 + $0x478] sm:$0xff]  }
 0x1fd   : > { %v3028_v27 = vrot.slane %v2869_v37, 7  ;;  %v2989_v29 = vsel %vm2909_vm10, %v10622_v31, %v7236_v20  ;;  %v4350_v31 = vrot.slane %v4348_v24, 4  ;;  %v4278_v22 = vld [vmem:[#allocation3 + $0x24] sm:$0xf]  ;;  %v4345_v34 = vrot.slane %v4343_v21, 5 }
 0x1fe   : > { %v3258_v38 = vrot.slane %v2989_v29, 7  ;;  %v2870_v36 = vsel %vm2790_vm11, %v10642_v63, %v7219_v9  ;;  %v9099_v32 = vpop.eup %9098  ;;  %v4363_v3 = vrot.slane %v4361_v15, 4  ;;  %v4331_v24 = vrot.slane %v4330_v26, 4 }
 0x1ff   : > { %v3078_v39 = vsel %vm231_vm0, %v2869_v37, %v3028_v27  ;;  %v3029_v56 = vrot.slane %v2870_v36, 7  ;;  %v3062_v47 = vrot.slane %v2870_v36, 6  ;;  %v7237_v48 = vadd.f32 -1.0, %v9099_v32 }
 0x200   : > { %v10721_v42 = vld [vmem:[#allocation3 + $0x54] sm:$0xff]   ;;  %v7739_v35 = vpack.c.bf16 %v3078_v39, %v3078_v39  ;;  %v3308_v30 = vsel %vm231_vm0, %v2989_v29, %v3258_v38  ;;  %v4354_v55 = vor.u32 %v4353_v40, %v4350_v31  ;;  %v4364_v13 = vor.u32 %v4363_v3, %v10726_v53  ;;  %v10765_v40 = vld [vmem:[#allocation3 + $0x40] sm:$0xf] }
 0x201   : > { %8371 = vmatprep.mubr.bf16.mxu1 %v10721_v42  ;;  %8432 = vmatmul.mubr.bf16.gmra.mxu0 %v10721_v42  ;;  %v7763_v63 = vpack.c.bf16 %v3308_v30, %v3308_v30  ;;  %v3030_v57 = vsel %vm231_vm0, %v3028_v27, %v3029_v56  ;;  %v3086_v8 = vsel %vm231_vm0, %v3029_v56, %v3062_v47  ;;  %v4281_v27 = vld [vmem:[#allocation3 + $0x30] sm:$0xf]  ;;  %v4341_v9 = vrot.slane %v4340_v50, 4 }
 0x202   : > { %3218 = vst [vmem:[#allocation3 + $0x6c] sm:$0xf] %v7739_v35  ;;  %v7740_v4 = vpack.c.bf16 %v3030_v57, %v3030_v57  ;;  %v7741_v44 = vpack.c.bf16 %v3086_v8, %v3086_v8  ;;  %v7814_v10 = vpack.c.bf16 %v3030_v57, %v3078_v39  ;;  %v2990_v17 = vsel %vm2910_vm12, %v10662_v14, %v7237_v48  ;;  %v10763_v48 = vld [vmem:[#allocation3 + $0x2c] sm:$0x1] }
 0x203   : > { %3442 = vst [vmem:[#allocation4 + $0x54] sm:$0xf] %v7763_v63  ;;  %v3259_v59 = vrot.slane %v2990_v17, 7  ;;  %v3292_v45 = vrot.slane %v2990_v17, 6  ;;  %v4321_v14 = vrot.slane %v4319_v54, 5  ;;  %v4312_v37 = vsel %vm9382_vm3, %v10708_v12, %v10677_v19  ;;  %v8951_v12 = vld [vmem:[#allocation3] sm:$0xff]  }
 0x204   : > { %7843 = vst [vmem:[#allocation3 + $0x60] sm:$0xff] %v7814_v10   ;;  %3217 = vst [vmem:[#allocation3 + $0x68] sm:$0x1] %v7741_v44  ;;  %v10753_v54 = vld [vmem:[#allocation3 + $0x34] sm:$0xf]  ;;  %v4355_v1 = vrot.slane %v4354_v55, 4  ;;  %v4336_v30 = vsel %vm9382_vm3, %v4331_v24, %v10714_v41  ;;  %v4346_v63 = vsel %vm9382_vm3, %v4341_v9, %v4345_v34 }
 0x205   : > { %3219 = vst [vmem:[#allocation3 + $0x70] sm:$0xf] %v7740_v4  ;;  %3220 = vst [vmem:[#allocation3 + $0x74] sm:$0x1] %v7741_v44  ;;  %v3260_v18 = vsel %vm231_vm0, %v3258_v38, %v3259_v59  ;;  %v3316_v16 = vsel %vm231_vm0, %v3259_v59, %v3292_v45  ;;  %v4322_v20 = vsel %vm9382_vm3, %v4317_v11, %v4321_v14  ;;  %v4367_v29 = vshll.u32 %v10742_v7, 16 }
 0x206   : > { %v7764_v61 = vpack.c.bf16 %v3260_v18, %v3260_v18  ;;  %v7765_v43 = vpack.c.bf16 %v3316_v16, %v3316_v16  ;;  %v4372_v28 = vshrl.u32 %v4278_v22, 16  ;;  %v4375_v15 = vshll.u32 %v4278_v22, 16  ;;  %v4284_v4 = vld [vmem:[#allocation3 + $0x3c] sm:$0xf]  ;;  %v4287_v44 = vld [vmem:[#allocation3 + $0x48] sm:$0xf] }
 0x207   : > { %v4381_v39 = vshll.u32 %v10745_v51, 16  ;;  %v4385_v19 = vshrl.u32 %v10745_v51, 16  ;;  %v4365_v38 = vrot.slane %v4364_v13, 4  ;;  %v4396_v36 = vshrl.u32 %v4281_v27, 16  ;;  %v10774_v45 = vld [vmem:[#allocation3 + $0x4c] sm:$0xf] }
 0x208   : > { %3443 = vst [vmem:[#allocation4 + $0x58] sm:$0xf] %v7764_v61  ;;  %3444 = vst [vmem:[#allocation4 + $0x5c] sm:$0x1] %v7765_v43  ;;  %v4399_v52 = vshll.u32 %v4281_v27, 16  ;;  %v4405_v32 = vshll.u32 %v10753_v54, 16  ;;  %v7416_v31 = vcombine.low %v4312_v37, %v4322_v20  ;;  %v4360_v41 = vsel %vm9382_vm3, %v4355_v1, %v10726_v53 }
 0x209   : > { %v4409_v56 = vshrl.u32 %v10753_v54, 16  ;;  %v4369_v57 = vrot.slane %v4367_v29, 5  ;;  %v10769_v8 = vrot.slane %v4381_v39, 5  ;;  %v4387_v3 = vrot.slane %v4385_v19, 4  ;;  %v10780_v55 = vld [vmem:[#allocation3 + $0x38] sm:$0x1] }
 0x20a   : > { %v4374_v10 = vrot.slane %v4372_v28, 4  ;;  %v4398_v17 = vrot.slane %v4396_v36, 4  ;;  %v4401_v59 = vrot.slane %v4399_v52, 5  ;;  %v4377_v26 = vrot.slane %v4375_v15, 5  ;;  %v4290_v9 = vld [vmem:[#allocation3 + $0x54] sm:$0xf] }
 0x20b   : > { %v8949_v35 = vld [vmem:[#allocation3 + $0x60] sm:$0xff]   ;;  %v4370_v11 = vsel %vm9382_vm3, %v4365_v38, %v4369_v57  ;;  %v10778_v50 = vrot.slane %v4405_v32, 5  ;;  %v4411_v21 = vrot.slane %v4409_v56, 4  ;;  %v4429_v18 = vshll.u32 %v10765_v40, 16  ;;  %v8958_v1 = vld [vmem:[%s12045_s1 + $0x3f0] sm:$0xff]   ;;  %v9134_v52 = vld [vmem:[#allocation3 + $0xc] sm:$0xff]  }
 0x20c   : > { %v8952_v47 = vld [vmem:[#allocation3 + $0x6c] sm:$0xff]   ;;  %8372 = vmatmul.mubr.bf16.gmra.mxu1 %v8949_v35  ;;  %8435 = vmatprep.mubr.bf16.mxu0 %v8949_v35  ;;  %v4433_v16 = vshrl.u32 %v10765_v40, 16  ;;  %v4444_v53 = vshrl.u32 %v4287_v44, 16  ;;  %v4447_v14 = vshll.u32 %v4287_v44, 16  ;;  %v10784_v61 = vcombine.low %v4336_v30, %v4346_v63  ;;  %v10799_v36 = vld [vmem:[#allocation3 + $0x58] sm:$0xf] }
 0x20d   : > { %8391 = vmatprep.mubr.bf16.mxu1 %v8951_v12  ;;  %8436 = vmatmul.mubr.bf16.gmra.mxu0 %v8952_v47  ;;  %v4388_v43 = vor.u32 %v4387_v3, %v10769_v8  ;;  %v4391_v13 = vshll.u32 %v10763_v48, 16  ;;  %v4453_v22 = vshll.u32 %v10774_v45, 16  ;;  %v4402_v37 = vor.u32 %v4401_v59, %v4398_v17  ;;  %v8959_v32 = vld [vmem:[%s12045_s1 + $0x370] sm:$0xff]   ;;  %v8960_v44 = vld [vmem:[%s12045_s1 + $0x3e8] sm:$0xff]  }
 0x20e   : > { %8487 = vmatprep.mubr.bf16.mxu0 %v7416_v31  ;;  %v4420_v20 = vshrl.u32 %v4284_v4, 16  ;;  %v4423_v24 = vshll.u32 %v4284_v4, 16  ;;  %v4457_v27 = vshrl.u32 %v10774_v45, 16  ;;  %v10790_v34 = vcombine.low %v4360_v41, %v4370_v11  ;;  %v9135_v30 = vld [vmem:[#allocation3 + $0x18] sm:$0xff]  }
 0x20f   : > { %v4378_v29 = vor.u32 %v4377_v26, %v4374_v10  ;;  %v4412_v28 = vor.u32 %v4411_v21, %v10778_v50  ;;  %v4415_v15 = vshll.u32 %v10780_v55, 16  ;;  %v10797_v39 = vrot.slane %v4429_v18, 5  ;;  %v10811_v10 = vld [vmem:[#allocation3 + $0x44] sm:$0x1]  ;;  %v10818_v18 = vld [vmem:[#allocation3 + $0x50] sm:$0x1] }
 0x210   : > { %v4435_v19 = vrot.slane %v4433_v16, 4  ;;  %v4446_v12 = vrot.slane %v4444_v53, 4  ;;  %v4449_v38 = vrot.slane %v4447_v14, 5  ;;  %v10804_v35 = vrot.slane %v4453_v22, 5  ;;  %v8961_v16 = vld [vmem:[%s12045_s1 + $0x368] sm:$0xff]  }
 0x211   : > { %v4459_v56 = vrot.slane %v4457_v27, 4  ;;  %v4468_v47 = vshrl.u32 %v4290_v9, 16  ;;  %v4471_v31 = vshll.u32 %v4290_v9, 16  ;;  %v4389_v63 = vrot.slane %v4388_v43, 4  ;;  %v8962_v27 = vld [vmem:[%s12045_s1 + $0x3e0] sm:$0xff]  }
 0x212   : > { %v4403_v57 = vrot.slane %v4402_v37, 4  ;;  %v4422_v3 = vrot.slane %v4420_v20, 4  ;;  %v4425_v4 = vrot.slane %v4423_v24, 5  ;;  %v4413_v41 = vrot.slane %v4412_v28, 4 }
 0x213   : > { %v4477_v17 = vshll.u32 %v10799_v36, 16  ;;  %v4481_v59 = vshrl.u32 %v10799_v36, 16  ;;  %v4393_v11 = vrot.slane %v4391_v13, 5  ;;  %v4417_v26 = vrot.slane %v4415_v15, 5  ;;  %v10841_v15 = vld [vmem:[#allocation3 + $0x5c] sm:$0x1] }
 0x214   : > { %8392 = vmatmul.mubr.bf16.vlgmr.msra.gmra.mxu1 %v9134_v52  ;;  %v4436_v21 = vor.u32 %v4435_v19, %v10797_v39  ;;  %v4450_v53 = vor.u32 %v4449_v38, %v4446_v12  ;;  %v4460_v14 = vor.u32 %v4459_v56, %v10804_v35  ;;  %v4470_v43 = vrot.slane %v4468_v47, 4  ;;  %v8963_v12 = vld [vmem:[%s12045_s1 + $0x360] sm:$0xff]  }
 0x215   : > { %8395 = vmatprep.mubr.bf16.mxu1 %v9135_v30  ;;  %8440 = vmatpush3.bf16.msra.mxu1 %v10586_v23  ;;  %v4379_v23 = vrot.slane %v4378_v29, 4  ;;  %v4473_v22 = vrot.slane %v4471_v31, 5  ;;  %v4408_v13 = vsel %vm9382_vm3, %v4403_v57, %v10778_v50  ;;  %v4426_v37 = vor.u32 %v4425_v4, %v4422_v3  ;;  %v5539_v57 = vld [vmem:[#allocation3] sm:$0xe] }
 0x216   : > { %8488 = vmatmul.mubr.bf16.vlgmr.msra.gmra.mxu0 %v10784_v61  ;;  %8441 = vmatprep.subr.bf16.mxu1 %v8958_v1  ;;  %v4439_v20 = vshll.u32 %v10811_v10, 16  ;;  %v4418_v24 = vsel %vm9382_vm3, %v4413_v41, %v4417_v26  ;;  %v4463_v9 = vshll.u32 %v10818_v18, 16  ;;  %v4483_v29 = vrot.slane %v4481_v59, 4  ;;  %v8965_v3 = vld [vmem:[%s12045_s1 + $0x358] sm:$0xff]   ;;  %v5541_v26 = vld [vmem:[#allocation3 + $0x18] sm:$0xe] }
 0x217   : > { %8491 = vmatprep.mubr.bf16.mxu0 %v10790_v34  ;;  %8536 = vmatpush3.bf16.msra.mxu0 %v10632_v6  ;;  %v4394_v6 = vsel %vm9382_vm3, %v4389_v63, %v4393_v11  ;;  %v4384_v50 = vsel %vm9382_vm3, %v4379_v23, %v10769_v8  ;;  %v4437_v28 = vrot.slane %v4436_v21, 4  ;;  %v4451_v38 = vrot.slane %v4450_v53, 4  ;;  %v5540_v11 = vld [vmem:[#allocation3 + $0xc] sm:$0xe] }
 0x218   : > { %8537 = vmatprep.subr.bf16.mxu0 %v8959_v32  ;;  %v10844_v19 = vcombine.low %v4384_v50, %v4394_v6  ;;  %v4461_v52 = vrot.slane %v4460_v14, 4  ;;  %v4474_v56 = vor.u32 %v4473_v22, %v4470_v43  ;;  %v4427_v8 = vrot.slane %v4426_v37, 4 }
 0x219   : > { %8442 = vmatpush3.bf16.msra.mxu1 %v8958_v1  ;;  %v10836_v1 = vrot.slane %v4477_v17, 5  ;;  %v4441_v47 = vrot.slane %v4439_v20, 5  ;;  %v4465_v31 = vrot.slane %v4463_v9, 5  ;;  %v4487_v63 = vshll.u32 %v10841_v15, 16  ;;  %v5542_v9 = vld [vmem:[#allocation3 + $0x24] sm:$0xe] }
 0x21a   : > { %8443 = vmatprep.subr.bf16.mxu1 %v8960_v44  ;;  %v4456_v4 = vsel %vm9382_vm3, %v4451_v38, %v10804_v35  ;;  %v4475_v41 = vrot.slane %v4474_v56, 4  ;;  %v4432_v17 = vsel %vm9382_vm3, %v4427_v8, %v10797_v39  ;;  %v7514_v59 = vrot.slane %v5539_v57, 9  ;;  %v8966_v35 = vld [vmem:[%s12045_s1 + $0x3d0] sm:$0xff]  }
 0x21b   : > { %8538 = vmatpush3.bf16.msra.mxu0 %v8959_v32  ;;  %v10850_v32 = vcombine.low %v4408_v13, %v4418_v24  ;;  %v4484_v30 = vor.u32 %v4483_v29, %v10836_v1  ;;  %v5581_v23 = vrot.slane %v10664_v5, 5  ;;  %v4489_v53 = vrot.slane %v4487_v63, 5  ;;  %v8967_v5 = vld [vmem:[%s12045_s1 + $0x350] sm:$0xff]  }
 0x21c   : > { %8396 = vmatmul.mubr.bf16.gmra.mxu1 %v10467_v25  ;;  %8539 = vmatprep.subr.bf16.mxu0 %v8961_v16  ;;  %v8964_v25 = vld [vmem:[%s12045_s1 + $0x3d8] sm:$0xff]   ;;  %v5584_v39 = vrot.slane %v10684_v33, 5  ;;  %v5588_v22 = vrot.slane %v10689_v58, 5  ;;  %v4480_v6 = vsel %vm9382_vm3, %v4475_v41, %v10836_v1  ;;  %v7515_v13 = vrot.slane %v5540_v11, 9 }
 0x21d   : > { %8399 = vmatprep.mubr.bf16.mxu1 %v10593_v62  ;;  %8444 = vmatpush3.bf16.msra.mxu1 %v8960_v44  ;;  %v4442_v62 = vsel %vm9382_vm3, %v4437_v28, %v4441_v47  ;;  %v4466_v44 = vsel %vm9382_vm3, %v4461_v52, %v4465_v31  ;;  %v5583_v43 = vrot.slane %v5581_v23, 4  ;;  %v7516_v37 = vrot.slane %v5541_v26, 9  ;;  %v5543_v28 = vld [vmem:[#allocation3 + $0x30] sm:$0xe]  ;;  %v5544_v31 = vld [vmem:[#allocation3 + $0x3c] sm:$0xe] }
 0x21e   : > { %8492 = vmatmul.mubr.bf16.gmra.mxu0 %v10844_v19  ;;  %8445 = vmatprep.subr.bf16.mxu1 %v8962_v27  ;;  %v10873_v21 = vcombine.low %v4432_v17, %v4442_v62  ;;  %v10878_v14 = vcombine.low %v4456_v4, %v4466_v44  ;;  %v5595_v20 = vrot.slane %v10700_v49, 5  ;;  %v10893_v58 = vsel %vm9529_vm6, %v7514_v59, %v5581_v23  ;;  %v5545_v62 = vld [vmem:[#allocation3 + $0x48] sm:$0xe]  ;;  %v8969_v17 = vld [vmem:[#allocation4] sm:$0xff]  }
 0x21f   : > { %8495 = vmatprep.mubr.bf16.mxu0 %v10850_v32  ;;  %8540 = vmatpush3.bf16.msra.mxu0 %v8961_v16  ;;  %v4485_v16 = vrot.slane %v4484_v30, 4  ;;  %v5590_v24 = vrot.slane %v5588_v22, 4  ;;  %v5598_v50 = vrot.slane %v10742_v7, 5  ;;  %v5602_v52 = vrot.slane %v10745_v51, 5  ;;  %v8970_v7 = vld [vmem:[%s12045_s1 + $0x348] sm:$0xff]   ;;  %v8971_v4 = vld [vmem:[%s12045_s1 + $0x3c0] sm:$0xff]  }
 0x220   : > { %8541 = vmatprep.subr.bf16.mxu0 %v8963_v12  ;;  %v5597_v29 = vrot.slane %v5595_v20, 4  ;;  %v5596_v38 = vsel %vm9529_vm6, %v7516_v37, %v5595_v20  ;;  %v7517_v47 = vrot.slane %v5542_v9, 9  ;;  %v7518_v57 = vrot.slane %v5543_v28, 9  ;;  %v8972_v26 = vld [vmem:[%s12045_s1 + $0x340] sm:$0xff]   ;;  %v8976_v20 = vld [vmem:[%s12045_s1 + $0x238] sm:$0xff]  }
 0x221   : > { %8446 = vmatpush3.bf16.msra.mxu1 %v8962_v27  ;;  %v5591_v27 = vrot.slane %v10730_v2, 5  ;;  %v4490_v49 = vsel %vm9382_vm3, %v4485_v16, %v4489_v53  ;;  %v5589_v2 = vsel %vm9529_vm6, %v7515_v13, %v5588_v22  ;;  %v5604_v63 = vrot.slane %v5602_v52, 4  ;;  %v10963_v13 = vld [vmem:[#allocation3 + $0x64] sm:$0xf]  ;;  %v5546_v9 = vld [vmem:[#allocation3 + $0x54] sm:$0xe] }
 0x222   : > { %8447 = vmatprep.subr.bf16.mxu1 %v8964_v25  ;;  %v5599_v8 = vsel %vm9529_vm6, %v5597_v29, %v5598_v50  ;;  %v5609_v51 = vrot.slane %v10753_v54, 5  ;;  %v5603_v44 = vsel %vm9529_vm6, %v7517_v47, %v5602_v52  ;;  %v5616_v41 = vrot.slane %v10765_v40, 5  ;;  %v8973_v29 = vld [vmem:[#allocation4 + $0xc] sm:$0xff]   ;;  %v8977_v50 = vld [vmem:[%s12045_s1 + $0x2b0] sm:$0xff]  }
 0x223   : > { %8542 = vmatpush3.bf16.msra.mxu0 %v8963_v12  ;;  %v5592_v12 = vsel %vm9529_vm6, %v5590_v24, %v5591_v27  ;;  %v10925_v30 = vcombine.low %v5596_v38, %v5599_v8  ;;  %v7519_v23 = vrot.slane %v5544_v31, 9  ;;  %v5619_v11 = vrot.slane %v10811_v10, 5  ;;  %v8975_v38 = vld [vmem:[#allocation4 + $0x18] sm:$0xff]  }
 0x224   : > { %8400 = vmatmul.mubr.bf16.gmra.mxu1 %v10644_v0  ;;  %8543 = vmatprep.subr.bf16.mxu0 %v8965_v3  ;;  %v10897_v0 = vsel %vm9529_vm6, %v5583_v43, %v5584_v39  ;;  %v10920_v56 = vcombine.low %v5589_v2, %v5592_v12  ;;  %v5611_v59 = vrot.slane %v5609_v51, 4  ;;  %v7520_v40 = vrot.slane %v5545_v62, 9  ;;  %v8974_v43 = vld [vmem:[%s12045_s1 + $0x2b8] sm:$0xff]   ;;  %v10996_v62 = vld [vmem:[#allocation3 + $0x70] sm:$0xf] }
 0x225   : > { %8403 = vmatprep.mubr.bf16.mxu1 %v10668_v60  ;;  %8448 = vmatpush3.bf16.msra.mxu1 %v8964_v25  ;;  %v8968_v60 = vld [vmem:[%s12045_s1 + $0x3c8] sm:$0xff]   ;;  %v7540_v1 = vcombine.low %v10893_v58, %v10897_v0  ;;  %v5605_v25 = vrot.slane %v10763_v48, 5  ;;  %v5612_v48 = vrot.slane %v10780_v55, 5  ;;  %v5618_v55 = vrot.slane %v5616_v41, 4  ;;  %v4293_v39 = vld [vmem:[#allocation3 + $0x60] sm:$0xf] }
 0x226   : > { %8496 = vmatmul.mubr.bf16.gmra.mxu0 %v10873_v21  ;;  %8449 = vmatprep.subr.bf16.mxu1 %v8966_v35  ;;  %v5623_v16 = vrot.slane %v10774_v45, 5  ;;  %v5610_v53 = vsel %vm9529_vm6, %v7518_v57, %v5609_v51  ;;  %v4495_v28 = vshll.u32 %v4293_v39, 16  ;;  %v4501_v2 = vshll.u32 %v10963_v13, 16 }
 0x227   : > { %8499 = vmatprep.mubr.bf16.mxu0 %v10878_v14  ;;  %8544 = vmatpush3.bf16.msra.mxu0 %v8965_v3  ;;  %v10928_v3 = vcombine.low %v4480_v6, %v4490_v49  ;;  %v5606_v54 = vsel %vm9529_vm6, %v5604_v63, %v5605_v25  ;;  %v5613_v10 = vsel %vm9529_vm6, %v5611_v59, %v5612_v48  ;;  %v5626_v6 = vrot.slane %v10818_v18, 5  ;;  %v4296_v48 = vld [vmem:[#allocation3 + $0x6c] sm:$0xf]  ;;  %v8979_v59 = vld [vmem:[#allocation4 + $0x24] sm:$0xff]  }
 0x228   : > { %8545 = vmatprep.subr.bf16.mxu0 %v8967_v5  ;;  %v10957_v45 = vcombine.low %v5610_v53, %v5613_v10  ;;  %v5620_v22 = vsel %vm9529_vm6, %v5618_v55, %v5619_v11  ;;  %v5624_v24 = vsel %vm9529_vm6, %v7520_v40, %v5623_v16  ;;  %v4492_v18 = vshrl.u32 %v4293_v39, 16  ;;  %v8981_v55 = vld [vmem:[#allocation4 + $0x30] sm:$0xff]   ;;  %v8986_v39 = vld [vmem:[%s12045_s1 + $0x298] sm:$0xff]  }
 0x229   : > { %8450 = vmatpush3.bf16.msra.mxu1 %v8966_v35  ;;  %v10944_v35 = vcombine.low %v5603_v44, %v5606_v54  ;;  %v5630_v49 = vrot.slane %v10799_v36, 5  ;;  %v4505_v12 = vshrl.u32 %v10963_v13, 16  ;;  %v7521_v52 = vrot.slane %v5546_v9, 9  ;;  %v8978_v36 = vld [vmem:[%s12045_s1 + $0x230] sm:$0xff]   ;;  %v8982_v44 = vld [vmem:[%s12045_s1 + $0x228] sm:$0xff]   ;;  %v8984_v53 = vld [vmem:[%s12045_s1 + $0x220] sm:$0xff]  }
 0x22a   : > { %8451 = vmatprep.subr.bf16.mxu1 %v8968_v60  ;;  %v5633_v8 = vrot.slane %v10841_v15, 5  ;;  %v4494_v47 = vrot.slane %v4492_v18, 4  ;;  %v8980_v15 = vld [vmem:[%s12045_s1 + $0x2a8] sm:$0xff]   ;;  %v4497_v63 = vrot.slane %v4495_v28, 5  ;;  %v10994_v57 = vrot.slane %v4501_v2, 5 }
 0x22b   : > { %8546 = vmatpush3.bf16.msra.mxu0 %v8967_v5  ;;  %v5625_v5 = vrot.slane %v5623_v16, 4  ;;  %v5631_v25 = vsel %vm9529_vm6, %v7521_v52, %v5630_v49  ;;  %v4507_v51 = vrot.slane %v4505_v12, 4  ;;  %v4529_v54 = vshrl.u32 %v10996_v62, 16  ;;  %v11026_v18 = vld [vmem:[#allocation3 + $0x74] sm:$0x1]  ;;  %v8989_v52 = vld [vmem:[%s12045_s1 + $0x290] sm:$0xff]  }
 0x22c   : > { %8404 = vmatmul.mubr.bf16.gmra.mxu1 %v10721_v42  ;;  %8547 = vmatprep.subr.bf16.mxu0 %v8970_v7  ;;  %v5617_v42 = vsel %vm9529_vm6, %v7519_v23, %v5616_v41  ;;  %v11004_v41 = vld [vmem:[#allocation3 + $0x68] sm:$0x1]  ;;  %v4498_v11 = vor.u32 %v4497_v63, %v4494_v47  ;;  %v4516_v40 = vshrl.u32 %v4296_v48, 16  ;;  %v4519_v16 = vshll.u32 %v4296_v48, 16  ;;  %v8985_v2 = vld [vmem:[#allocation4 + $0x3c] sm:$0xff]  }
 0x22d   : > { %8452 = vmatpush3.bf16.msra.mxu1 %v8968_v60  ;;  %8455 = vmatprep.mubr.bf16.mxu1 %v8969_v17  ;;  %v10965_v37 = vcombine.low %v5617_v42, %v5620_v22  ;;  %v5627_v27 = vsel %vm9529_vm6, %v5625_v5, %v5626_v6  ;;  %v4525_v17 = vshll.u32 %v10996_v62, 16  ;;  %v8983_v23 = vld [vmem:[%s12045_s1 + $0x2a0] sm:$0xff]   ;;  %v4511_v10 = vshll.u32 %v11004_v41, 16  ;;  %v5113_v6 = vld [vmem:[#allocation4] sm:$0xf] }
 0x22e   : > { %8500 = vmatmul.mubr.bf16.gmra.mxu0 %v10928_v3  ;;  %8453 = vmatprep.subr.bf16.mxu1 %v8971_v4  ;;  %v10974_v60 = vcombine.low %v5624_v24, %v5627_v27  ;;  %v4499_v22 = vrot.slane %v4498_v11, 4  ;;  %v4521_v24 = vrot.slane %v4519_v16, 5  ;;  %v8988_v27 = vld [vmem:[%s12045_s1 + $0x218] sm:$0xff]   ;;  %v5141_v28 = vshll.u32 %v5113_v6, 16  ;;  %v8990_v47 = vld [vmem:[%s12045_s1 + $0x210] sm:$0xff]   ;;  %v8991_v16 = vld [vmem:[#allocation4 + $0x54] sm:$0xff]  }
 0x22f   : > { %8548 = vmatpush3.bf16.msra.mxu0 %v8970_v7  ;;  %8551 = vmatprep.mubr.bf16.mxu0 %v10790_v34  ;;  %v5632_v7 = vrot.slane %v5630_v49, 4  ;;  %v11016_v42 = vrot.slane %v4525_v17, 5  ;;  %v4513_v9 = vrot.slane %v4511_v10, 5 }
 0x230   : > { %8549 = vmatprep.subr.bf16.mxu0 %v8972_v26  ;;  %v4504_v12 = vsel %vm9382_vm3, %v4499_v22, %v10994_v57  ;;  %v11067_v22 = vld [vmem:[#allocation4 + $0x10] sm:$0xf] }
 0x231   : > { %8454 = vmatpush3.bf16.msra.mxu1 %v8971_v4  ;;  %v5634_v31 = vsel %vm9529_vm6, %v5632_v7, %v5633_v8  ;;  %v8987_v7 = vld [vmem:[#allocation4 + $0x48] sm:$0xff]  }
 0x232   : > { %8503 = vmatprep.subr.bf16.mxu1 %v8974_v43  ;;  %v10998_v4 = vcombine.low %v5631_v25, %v5634_v31 }
 0x233   : > { %8550 = vmatpush3.bf16.msra.mxu0 %v8972_v26  ;;  %v4508_v26 = vor.u32 %v4507_v51, %v10994_v57  ;;  %v5143_v51 = vrot.slane %v5141_v28, 5  ;;  %v11081_v28 = vld [vmem:[#allocation4 + $0x14] sm:$0x1] }
 0x234   : > { %8456 = vmatmul.mubr.bf16.vlgmr.msra.gmra.mxu1 %v8973_v29  ;;  %8599 = vmatprep.subr.bf16.mxu0 %v8976_v20  ;;  %v11029_v29 = vld [vmem:[#allocation4 + $0x4] sm:$0xf] }
 0x235   : > { %8459 = vmatprep.mubr.bf16.mxu1 %v8975_v38  ;;  %8504 = vmatpush3.bf16.msra.mxu1 %v8974_v43  ;;  %v4531_v43 = vrot.slane %v4529_v54, 4  ;;  %v4509_v5 = vrot.slane %v4508_v26, 4  ;;  %v5147_v25 = vshll.u32 %v11029_v29, 16  ;;  %v5151_v31 = vshrl.u32 %v11029_v29, 16  ;;  %v5116_v54 = vld [vmem:[#allocation4 + $0xc] sm:$0xf] }
 0x236   : > { %8552 = vmatmul.mubr.bf16.vlgmr.msra.gmra.mxu0 %v10844_v19  ;;  %8505 = vmatprep.subr.bf16.mxu1 %v8977_v50  ;;  %v5162_v10 = vshrl.u32 %v5116_v54, 16 }
 0x237   : > { %8555 = vmatprep.mubr.bf16.mxu0 %v10850_v32  ;;  %8600 = vmatpush3.bf16.msra.mxu0 %v8976_v20  ;;  %v4518_v20 = vrot.slane %v4516_v40, 4  ;;  %v4532_v49 = vor.u32 %v4531_v43, %v11016_v42  ;;  %v4514_v38 = vsel %vm9382_vm3, %v4509_v5, %v4513_v9  ;;  %v5153_v11 = vrot.slane %v5151_v31, 4  ;;  %v5547_v43 = vld [vmem:[#allocation3 + $0x60] sm:$0xe]  ;;  %v8998_v31 = vld [vmem:[%s12045_s1 + $0x430] sm:$0xff]  }
 0x238   : > { %8601 = vmatprep.subr.bf16.mxu0 %v8978_v36  ;;  %v5165_v5 = vshll.u32 %v5116_v54, 16 }
 0x239   : > { %8506 = vmatpush3.bf16.msra.mxu1 %v8977_v50  ;;  %v5138_v50 = vshrl.u32 %v5113_v6, 16  ;;  %v4522_v8 = vor.u32 %v4521_v24, %v4518_v20  ;;  %v4533_v63 = vrot.slane %v4532_v49, 4  ;;  %v8995_v20 = vld [vmem:[%s12045_s1 + $0x200] sm:$0xff]   ;;  %v5637_v49 = vrot.slane %v10963_v13, 5 }
 0x23a   : > { %8507 = vmatprep.subr.bf16.mxu1 %v8980_v15  ;;  %v5175_v13 = vshrl.u32 %v11067_v22, 16 }
 0x23b   : > { %8602 = vmatpush3.bf16.msra.mxu0 %v8978_v36  ;;  %v4535_v36 = vshll.u32 %v11026_v18, 16  ;;  %v5140_v57 = vrot.slane %v5138_v50, 4  ;;  %v4523_v48 = vrot.slane %v4522_v8, 4  ;;  %v8996_v50 = vld [vmem:[%s12045_s1 + $0x438] sm:$0xff]  }
 0x23c   : > { %8460 = vmatmul.mubr.bf16.gmra.mxu1 %v8979_v59  ;;  %8603 = vmatprep.subr.bf16.mxu0 %v8982_v44  ;;  %v8993_v59 = vld [vmem:[%s12045_s1 + $0x208] sm:$0xff]   ;;  %v8997_v8 = vld [vmem:[%s12045_s1 + $0x3b8] sm:$0xff]   ;;  %v11123_v54 = vrot.slane %v5175_v13, 4 }
 0x23d   : > { %8463 = vmatprep.mubr.bf16.mxu1 %v8981_v55  ;;  %8508 = vmatpush3.bf16.msra.mxu1 %v8980_v15  ;;  %v11045_v15 = vcombine.low %v4504_v12, %v4514_v38  ;;  %v4537_v17 = vrot.slane %v4535_v36, 5  ;;  %v11059_v55 = vld [vmem:[#allocation4 + $0x8] sm:$0x1]  ;;  %v5144_v40 = vor.u32 %v5143_v51, %v5140_v57  ;;  %v5171_v12 = vshll.u32 %v11067_v22, 16  ;;  %v11092_v38 = vld [vmem:[#allocation4 + $0x18] sm:$0xf] }
 0x23e   : > { %8556 = vmatmul.mubr.bf16.gmra.mxu0 %v10873_v21  ;;  %8509 = vmatprep.subr.bf16.mxu1 %v8983_v23  ;;  %v5157_v9 = vshll.u32 %v11059_v55, 16  ;;  %v11116_v51 = vld [vmem:[#allocation4 + $0x1c] sm:$0xf]  ;;  %v11241_v57 = vld [vmem:[#allocation4 + $0x58] sm:$0xf] }
 0x23f   : > { %8559 = vmatprep.mubr.bf16.mxu0 %v10878_v14  ;;  %8604 = vmatpush3.bf16.msra.mxu0 %v8982_v44  ;;  %v8992_v44 = vld [vmem:[%s12045_s1 + $0x288] sm:$0xff]   ;;  %v4538_v26 = vsel %vm9382_vm3, %v4533_v63, %v4537_v17  ;;  %v11113_v63 = vrot.slane %v5171_v12, 5  ;;  %v6264_v12 = vrot.slane %v11067_v22, 5 }
 0x240   : > { %8605 = vmatprep.subr.bf16.mxu0 %v8984_v53  ;;  %v11104_v0 = vrot.slane %v5157_v9, 5 }
 0x241   : > { %8510 = vmatpush3.bf16.msra.mxu1 %v8983_v23  ;;  %v11055_v23 = vrot.slane %v5147_v25, 5  ;;  %v6223_v25 = vld [vmem:[#allocation4] sm:$0xe] }
 0x242   : > { %8511 = vmatprep.subr.bf16.mxu1 %v8986_v39 }
 0x243   : > { %8606 = vmatpush3.bf16.msra.mxu0 %v8984_v53  ;;  %v8994_v53 = vld [vmem:[%s12045_s1 + $0x280] sm:$0xff]   ;;  %v5154_v24 = vor.u32 %v5153_v11, %v11055_v23  ;;  %v5644_v11 = vrot.slane %v10996_v62, 5 }
 0x244   : > { %8464 = vmatmul.mubr.bf16.gmra.mxu1 %v8985_v2  ;;  %8607 = vmatprep.subr.bf16.mxu0 %v8988_v27  ;;  %v11083_v2 = vrot.slane %v5162_v10, 4  ;;  %v7606_v10 = vrot.slane %v6223_v25, 9 }
 0x245   : > { %8467 = vmatprep.mubr.bf16.mxu1 %v8987_v7  ;;  %8512 = vmatpush3.bf16.msra.mxu1 %v8986_v39  ;;  %v4528_v39 = vsel %vm9382_vm3, %v4523_v48, %v11016_v42  ;;  %v7522_v42 = vrot.slane %v5547_v43, 9  ;;  %v5640_v7 = vrot.slane %v11004_v41, 5  ;;  %v11098_v36 = vrot.slane %v5154_v24, 4  ;;  %v11144_v24 = vld [vmem:[#allocation4 + $0x20] sm:$0x1] }
 0x246   : > { %8560 = vmatmul.mubr.bf16.gmra.mxu0 %v10928_v3  ;;  %8513 = vmatprep.subr.bf16.mxu1 %v8989_v52  ;;  %v7473_v6 = vcombine.low %v4528_v39, %v4538_v26  ;;  %v6224_v26 = vld [vmem:[#allocation4 + $0xc] sm:$0xe]  ;;  %v6257_v43 = vrot.slane %v11029_v29, 5  ;;  %v6225_v39 = vld [vmem:[#allocation4 + $0x18] sm:$0xe] }
 0x247   : > { %8563 = vmatprep.mubr.bf16.mxu0 %v11045_v15  ;;  %8608 = vmatpush3.bf16.msra.mxu0 %v8988_v27  ;;  %v11074_v27 = vrot.slane %v5144_v40, 4  ;;  %v8999_v40 = vld [vmem:[%s12045_s1 + $0x3b0] sm:$0xff]   ;;  %v7608_v13 = vrot.slane %v6225_v39, 9 }
 0x248   : > { %8609 = vmatprep.subr.bf16.mxu0 %v8990_v47  ;;  %v6259_v9 = vrot.slane %v6257_v43, 4 }
 0x249   : > { %8514 = vmatpush3.bf16.msra.mxu1 %v8989_v52  ;;  %v5639_v52 = vrot.slane %v5637_v49, 4  ;;  %v12115_v33 = vsel %vm9382_vm3, %v11074_v27, %v11055_v23  ;;  %v9010_v23 = vld [vmem:[%s12045_s1 + $0x400] sm:$0xff]  }
 0x24a   : > { %8515 = vmatprep.subr.bf16.mxu1 %v8992_v44 }
 0x24b   : > { %8610 = vmatpush3.bf16.msra.mxu0 %v8990_v47  ;;  %v5641_v41 = vsel %vm9529_vm6, %v5639_v52, %v5640_v7  ;;  %v5548_v47 = vld [vmem:[#allocation3 + $0x6c] sm:$0xe]  ;;  %v11164_v52 = vld [vmem:[#allocation4 + $0x2c] sm:$0x1]  ;;  %v6228_v7 = vld [vmem:[#allocation4 + $0x3c] sm:$0xe] }
 0x24c   : > { %8468 = vmatmul.mubr.bf16.gmra.mxu1 %v8991_v16  ;;  %8611 = vmatprep.subr.bf16.mxu0 %v8993_v59  ;;  %v6281_v17 = vrot.slane %v11164_v52, 5 }
 0x24d   : > { %8516 = vmatpush3.bf16.msra.mxu1 %v8992_v44  ;;  %8519 = vmatprep.mubr.bf16.mxu1 %v10784_v61  ;;  %v11089_v61 = vrot.slane %v5165_v5, 5  ;;  %v5186_v44 = vshrl.u32 %v11092_v38, 16  ;;  %v5646_v5 = vrot.slane %v5644_v11, 4 }
 0x24e   : > { %8564 = vmatmul.mubr.bf16.gmra.mxu0 %v7473_v6  ;;  %8517 = vmatprep.subr.bf16.mxu1 %v8994_v53  ;;  %v5647_v6 = vrot.slane %v11026_v18, 5  ;;  %v11154_v18 = vld [vmem:[#allocation4 + $0x28] sm:$0xf] }
 0x24f   : > { %8612 = vmatpush3.bf16.msra.mxu0 %v8993_v59  ;;  %8615 = vmatprep.mubr.bf16.mxu0 %v7540_v1  ;;  %v5638_v1 = vsel %vm9529_vm6, %v7522_v42, %v5637_v49  ;;  %v5189_v59 = vshll.u32 %v11092_v38, 16  ;;  %v11146_v29 = vrot.slane %v5186_v44, 4  ;;  %v6260_v42 = vrot.slane %v11059_v55, 5  ;;  %v9001_v38 = vld [vmem:[%s12045_s1 + $0x3a8] sm:$0xff]   ;;  %v11166_v55 = vld [vmem:[#allocation4 + $0x34] sm:$0xf] }
 0x250   : > { %8613 = vmatprep.subr.bf16.mxu0 %v8995_v20  ;;  %v11119_v48 = vcombine.low %v5638_v1, %v5641_v41  ;;  %v11158_v49 = vsel %vm9529_vm6, %v5646_v5, %v5647_v6  ;;  %v6271_v1 = vrot.slane %v11116_v51, 5  ;;  %v6227_v41 = vld [vmem:[#allocation4 + $0x30] sm:$0xe]  ;;  %v6274_v5 = vrot.slane %v11144_v24, 5  ;;  %v11201_v6 = vld [vmem:[#allocation4 + $0x40] sm:$0xf] }
 0x251   : > { %8518 = vmatpush3.bf16.msra.mxu1 %v8994_v53  ;;  %v7523_v53 = vrot.slane %v5548_v47, 9  ;;  %v11176_v22 = vsel %vm9529_vm6, %v6259_v9, %v6260_v42  ;;  %v9002_v47 = vld [vmem:[%s12045_s1 + $0x420] sm:$0xff]   ;;  %v11182_v25 = vrot.slane %v5189_v59, 5  ;;  %v6278_v42 = vrot.slane %v11154_v18, 5 }
 0x252   : > { %8567 = vmatprep.subr.bf16.mxu1 %v8996_v50  ;;  %v6273_v39 = vrot.slane %v6271_v1, 4  ;;  %v7610_v44 = vrot.slane %v6227_v41, 9  ;;  %v11223_v41 = vld [vmem:[#allocation4 + $0x44] sm:$0x1] }
 0x253   : > { %8614 = vmatpush3.bf16.msra.mxu0 %v8995_v20  ;;  %v9000_v20 = vld [vmem:[%s12045_s1 + $0x428] sm:$0xff]  }
 0x254   : > { %8520 = vmatmul.mubr.bf16.vlgmr.msra.gmra.mxu1 %v10790_v34  ;;  %8663 = vmatprep.subr.bf16.mxu0 %v8997_v8  ;;  %v5195_v34 = vshll.u32 %v11116_v51, 16 }
 0x255   : > { %8523 = vmatprep.mubr.bf16.mxu1 %v10844_v19  ;;  %8568 = vmatpush3.bf16.msra.mxu1 %v8996_v50  ;;  %v11150_v19 = vsel %vm9529_vm6, %v7523_v53, %v5644_v11  ;;  %v7607_v50 = vrot.slane %v6224_v26, 9  ;;  %v6266_v11 = vrot.slane %v6264_v12, 4  ;;  %v6267_v26 = vrot.slane %v11081_v28, 5  ;;  %v6226_v53 = vld [vmem:[#allocation4 + $0x24] sm:$0xe] }
 0x256   : > { %8616 = vmatmul.mubr.bf16.vlgmr.msra.gmra.mxu0 %v10920_v56  ;;  %8569 = vmatprep.subr.bf16.mxu1 %v8998_v31 }
 0x257   : > { %8619 = vmatprep.mubr.bf16.mxu0 %v10925_v30  ;;  %8664 = vmatpush3.bf16.msra.mxu0 %v8997_v8  ;;  %v11172_v8 = vsel %vm9529_vm6, %v7606_v10, %v6257_v43  ;;  %v11190_v10 = vld [vmem:[%s12045_s1 + $0x3a0] sm:$0xff]   ;;  %v11194_v43 = vld [vmem:[#allocation4 + $0x38] sm:$0x1]  ;;  %v11198_v59 = vsel %vm9529_vm6, %v7607_v50, %v6264_v12  ;;  %v11205_v9 = vsel %vm9529_vm6, %v6266_v11, %v6267_v26  ;;  %v11213_v50 = vld [vmem:[#allocation4 + $0x4c] sm:$0xf]  ;;  %v7609_v11 = vrot.slane %v6226_v53, 9 }
 0x258   : > { %8665 = vmatprep.subr.bf16.mxu0 %v8999_v40  ;;  %12107 = vst [vmem:[#allocation15_spill] sm:$0xff] %v11198_v59  ;;  %12108 = vst [vmem:[#allocation7_spill] sm:$0xff] %v11205_v9  ;;  %v11219_v12 = vsel %vm9529_vm6, %v6273_v39, %v6274_v5  ;;  %v6280_v26 = vrot.slane %v6278_v42, 4  ;;  %v9004_v53 = vld [vmem:[%s12045_s1 + $0x418] sm:$0xff]   ;;  %v11233_v39 = vld [vmem:[#allocation4 + $0x50] sm:$0x1] }
 0x259   : > { %8570 = vmatpush3.bf16.msra.mxu1 %v8998_v31  ;;  %v11192_v31 = vrot.slane %v5195_v34, 5  ;;  %v11209_v34 = vsel %vm9529_vm6, %v7608_v13, %v6271_v1  ;;  %12110 = vst [vmem:[#allocation23_spill] sm:$0xff] %v11219_v12  ;;  %v6285_v13 = vrot.slane %v11166_v55, 5  ;;  %v6229_v1 = vld [vmem:[#allocation4 + $0x48] sm:$0xe]  ;;  %v7611_v5 = vrot.slane %v6228_v7, 9 }
 0x25a   : > { %8571 = vmatprep.subr.bf16.mxu1 %v9000_v20  ;;  %12109 = vst [vmem:[#allocation17_spill] sm:$0xff] %v11209_v34  ;;  %v11245_v58 = vsel %vm9529_vm6, %v6280_v26, %v6281_v17  ;;  %v7612_v62 = vrot.slane %v6229_v1, 9  ;;  %v9005_v7 = vld [vmem:[%s12045_s1 + $0x398] sm:$0xff]   ;;  %v12113_v1 = vshrl.u32 %v11116_v51, 16  ;;  %v6302_v9 = vrot.slane %v11233_v39, 5 }
 0x25b   : > { %8666 = vmatpush3.bf16.msra.mxu0 %v8999_v40  ;;  %v6288_v40 = vrot.slane %v11194_v43, 5  ;;  %v11249_v16 = vsel %vm9529_vm6, %v7610_v44, %v6285_v13  ;;  %v6230_v59 = vld [vmem:[#allocation4 + $0x54] sm:$0xe]  ;;  %v5192_v12 = vor.u32 %v11182_v25, %v11146_v29  ;;  %v5247_v29 = vshrl.u32 %v11166_v55, 16 }
 0x25c   : > { %8524 = vmatmul.mubr.bf16.gmra.mxu1 %v10850_v32  ;;  %8667 = vmatprep.subr.bf16.mxu0 %v9001_v38  ;;  %v6292_v32 = vrot.slane %v11201_v6, 5  ;;  %12111 = vst [vmem:[#allocation16_spill] sm:$0xff] %v11249_v16  ;;  %v5201_v26 = vrot.slane %v12113_v1, 4  ;;  %v6306_v1 = vrot.slane %v11241_v57, 5  ;;  %v7613_v25 = vrot.slane %v6230_v59, 9 }
 0x25d   : > { %8527 = vmatprep.mubr.bf16.mxu1 %v10873_v21  ;;  %8572 = vmatpush3.bf16.msra.mxu1 %v9000_v20  ;;  %v11237_v21 = vsel %vm9529_vm6, %v7609_v11, %v6278_v42  ;;  %v6287_v20 = vrot.slane %v6285_v13, 4  ;;  %v6299_v42 = vrot.slane %v11213_v50, 5  ;;  %v6295_v13 = vrot.slane %v11223_v41, 5  ;;  %v5122_v11 = vld [vmem:[#allocation4 + $0x24] sm:$0xf] }
 0x25e   : > { %8620 = vmatmul.mubr.bf16.gmra.mxu0 %v10944_v35  ;;  %8573 = vmatprep.subr.bf16.mxu1 %v9002_v47  ;;  %v6294_v44 = vrot.slane %v6292_v32, 4  ;;  %v11277_v51 = vsel %vm9529_vm6, %v7611_v5, %v6292_v32  ;;  %v6308_v5 = vrot.slane %v6306_v1, 4  ;;  %v5223_v59 = vshrl.u32 %v11154_v18, 16 }
 0x25f   : > { %8623 = vmatprep.mubr.bf16.mxu0 %v10957_v45  ;;  %8668 = vmatpush3.bf16.msra.mxu0 %v9001_v38  ;;  %v11256_v38 = vld [vmem:[#allocation4 + $0x5c] sm:$0x1]  ;;  %v11262_v17 = vsel %vm9529_vm6, %v6287_v20, %v6288_v40  ;;  %v6301_v34 = vrot.slane %v6299_v42, 4  ;;  %v9006_v40 = vld [vmem:[%s12045_s1 + $0x410] sm:$0xff]   ;;  %v5178_v20 = vor.u32 %v11123_v54, %v11113_v63  ;;  %v11291_v16 = vsel %vm9529_vm6, %v7612_v62, %v6299_v42 }
 0x260   : > { %8669 = vmatprep.subr.bf16.mxu0 %v11190_v10  ;;  %12112 = vst [vmem:[#allocation8_spill] sm:$0xff] %v11262_v17  ;;  %v5125_v17 = vld [vmem:[#allocation4 + $0x30] sm:$0xf]  ;;  %v5202_v62 = vor.u32 %v5201_v26, %v11192_v31  ;;  %v9008_v42 = vld [vmem:[%s12045_s1 + $0x408] sm:$0xff]   ;;  %v5243_v26 = vshll.u32 %v11166_v55, 16  ;;  %v12116_v55 = vshll.u32 %v11081_v28, 16 }
 0x261   : > { %8574 = vmatpush3.bf16.msra.mxu1 %v9002_v47  ;;  %v11281_v47 = vsel %vm9529_vm6, %v6294_v44, %v6295_v13  ;;  %v11295_v32 = vsel %vm9529_vm6, %v6301_v34, %v6302_v9  ;;  %v6309_v44 = vrot.slane %v11256_v38, 5  ;;  %v5210_v9 = vshrl.u32 %v5122_v11, 16 }
 0x262   : > { %8575 = vmatprep.subr.bf16.mxu1 %v9004_v53  ;;  %v5213_v34 = vshll.u32 %v5122_v11, 16  ;;  %v5234_v13 = vshrl.u32 %v5125_v17, 16  ;;  %v5237_v11 = vshll.u32 %v5125_v17, 16  ;;  %v9009_v17 = vld [vmem:[%s12045_s1 + $0x388] sm:$0xff]   ;;  %v5203_v27 = vrot.slane %v5202_v62, 4  ;;  %v9012_v62 = vld [vmem:[%s12045_s1 + $0x2f8] sm:$0xff]  }
 0x263   : > { %8670 = vmatpush3.bf16.msra.mxu0 %v11190_v10  ;;  %v9007_v10 = vld [vmem:[%s12045_s1 + $0x390] sm:$0xff]   ;;  %v5212_v54 = vrot.slane %v5210_v9, 4  ;;  %v5225_v28 = vrot.slane %v5223_v59, 4  ;;  %v5267_v59 = vshll.u32 %v11201_v6, 16 }
 0x264   : > { %8528 = vmatmul.mubr.bf16.gmra.mxu1 %v10878_v14  ;;  %8671 = vmatprep.subr.bf16.mxu0 %v9005_v7  ;;  %v5219_v14 = vshll.u32 %v11154_v18, 16  ;;  %v5193_v18 = vrot.slane %v5192_v12, 4 }
 0x265   : > { %8531 = vmatprep.mubr.bf16.mxu1 %v10928_v3  ;;  %8576 = vmatpush3.bf16.msra.mxu1 %v9004_v53  ;;  %v11314_v3 = vsel %vm9529_vm6, %v7613_v25, %v6306_v1  ;;  %v11318_v53 = vsel %vm9529_vm6, %v6308_v5, %v6309_v44  ;;  %v12114_v1 = vsel %vm9382_vm3, %v11098_v36, %v11104_v0  ;;  %v5183_v25 = vrot.slane %v12116_v55, 5 }
 0x266   : > { %8624 = vmatmul.mubr.bf16.gmra.mxu0 %v10965_v37  ;;  %8577 = vmatprep.subr.bf16.mxu1 %v9006_v40  ;;  %v5205_v5 = vshll.u32 %v11144_v24, 16  ;;  %v12117_v44 = vor.u32 %v11089_v61, %v11083_v2  ;;  %v5179_v0 = vrot.slane %v5178_v20, 4  ;;  %v5236_v24 = vrot.slane %v5234_v13, 4  ;;  %v9011_v61 = vld [vmem:[%s12045_s1 + $0x380] sm:$0xff]  }
 0x267   : > { %8627 = vmatprep.mubr.bf16.mxu0 %v10974_v60  ;;  %8672 = vmatpush3.bf16.msra.mxu0 %v9005_v7  ;;  %v7498_v7 = vcombine.low %v12115_v33, %v12114_v1  ;;  %v5215_v1 = vrot.slane %v5213_v34, 5  ;;  %v11347_v33 = vrot.slane %v5219_v14, 5  ;;  %v11349_v55 = vrot.slane %v5243_v26, 5  ;;  %v5128_v14 = vld [vmem:[#allocation4 + $0x3c] sm:$0xf] }
 0x268   : > { %8673 = vmatprep.subr.bf16.mxu0 %v9007_v10  ;;  %v5169_v36 = vrot.slane %v12117_v44, 4  ;;  %v5249_v2 = vrot.slane %v5247_v29, 4  ;;  %v5207_v12 = vrot.slane %v5205_v5, 5  ;;  %v5198_v29 = vsel %vm9382_vm3, %v5193_v18, %v11192_v31 }
 0x269   : > { %8578 = vmatpush3.bf16.msra.mxu1 %v9006_v40  ;;  %v5239_v40 = vrot.slane %v5237_v11, 5  ;;  %v5216_v34 = vor.u32 %v5215_v1, %v5212_v54  ;;  %v5271_v13 = vshrl.u32 %v11201_v6, 16  ;;  %v5291_v18 = vshll.u32 %v11213_v50, 16 }
 0x26a   : > { %8579 = vmatprep.subr.bf16.mxu1 %v9008_v42  ;;  %v5174_v20 = vsel %vm9382_vm3, %v5169_v36, %v11113_v63  ;;  %v5208_v9 = vsel %vm9382_vm3, %v5203_v27, %v5207_v12  ;;  %v5226_v63 = vor.u32 %v5225_v28, %v11347_v33  ;;  %v5250_v31 = vor.u32 %v5249_v2, %v11349_v55  ;;  %v9013_v36 = vld [vmem:[%s12045_s1 + $0x2f0] sm:$0xff]  }
 0x26b   : > { %8674 = vmatpush3.bf16.msra.mxu0 %v9007_v10  ;;  %v5184_v10 = vsel %vm9382_vm3, %v5179_v0, %v5183_v25  ;;  %v5295_v54 = vshrl.u32 %v11213_v50, 16  ;;  %v5258_v25 = vshrl.u32 %v5128_v14, 16  ;;  %v5261_v5 = vshll.u32 %v5128_v14, 16 }
 0x26c   : > { %8532 = vmatmul.mubr.bf16.gmra.mxu1 %v11045_v15  ;;  %8675 = vmatprep.subr.bf16.mxu0 %v9009_v17  ;;  %v5131_v15 = vld [vmem:[#allocation4 + $0x48] sm:$0xf]  ;;  %v7500_v44 = vcombine.low %v5198_v29, %v5208_v9  ;;  %v5217_v6 = vrot.slane %v5216_v34, 4  ;;  %v5227_v0 = vrot.slane %v5226_v63, 4  ;;  %v5253_v27 = vshll.u32 %v11194_v43, 16 }
 0x26d   : > { %8580 = vmatpush3.bf16.msra.mxu1 %v9008_v42  ;;  %8583 = vmatprep.mubr.bf16.mxu1 %v7498_v7  ;;  %v5240_v42 = vor.u32 %v5239_v40, %v5236_v24  ;;  %v5282_v11 = vshrl.u32 %v5131_v15, 16  ;;  %v5285_v26 = vshll.u32 %v5131_v15, 16  ;;  %v7499_v7 = vcombine.low %v5174_v20, %v5184_v10  ;;  %v5134_v15 = vld [vmem:[#allocation4 + $0x54] sm:$0xf] }
 0x26e   : > { %8628 = vmatmul.mubr.bf16.gmra.mxu0 %v10998_v4  ;;  %8581 = vmatprep.subr.bf16.mxu1 %v9010_v23  ;;  %v5251_v28 = vrot.slane %v5250_v31, 4  ;;  %v11381_v50 = vrot.slane %v5267_v59, 5  ;;  %v5293_v40 = vrot.slane %v5291_v18, 5  ;;  %v5297_v2 = vrot.slane %v5295_v54, 4 }
 0x26f   : > { %8676 = vmatpush3.bf16.msra.mxu0 %v9009_v17  ;;  %8679 = vmatprep.mubr.bf16.mxu0 %v10925_v30  ;;  %v5229_v17 = vshll.u32 %v11164_v52, 16  ;;  %v5241_v1 = vrot.slane %v5240_v42, 4  ;;  %v5284_v52 = vrot.slane %v5282_v11, 4  ;;  %v5287_v24 = vrot.slane %v5285_v26, 5 }
 0x270   : > { %8677 = vmatprep.subr.bf16.mxu0 %v9011_v61  ;;  %v5260_v20 = vrot.slane %v5258_v25, 4  ;;  %v5263_v10 = vrot.slane %v5261_v5, 5  ;;  %v5222_v43 = vsel %vm9382_vm3, %v5217_v6, %v11347_v33  ;;  %v5255_v29 = vrot.slane %v5253_v27, 5 }
 0x271   : > { %8582 = vmatpush3.bf16.msra.mxu1 %v9010_v23  ;;  %v5273_v23 = vrot.slane %v5271_v13, 4  ;;  %v5231_v12 = vrot.slane %v5229_v17, 5  ;;  %v5315_v34 = vshll.u32 %v11241_v57, 16  ;;  %v5319_v63 = vshrl.u32 %v11241_v57, 16  ;;  %v9015_v57 = vld [vmem:[%s12045_s1 + $0x2e0] sm:$0xff]  }
 0x272   : > { %8631 = vmatprep.subr.bf16.mxu1 %v9012_v62  ;;  %v5246_v33 = vsel %vm9382_vm3, %v5241_v1, %v11349_v55  ;;  %v5256_v14 = vsel %vm9382_vm3, %v5251_v28, %v5255_v29  ;;  %v5288_v42 = vor.u32 %v5287_v24, %v5284_v52  ;;  %v5298_v31 = vor.u32 %v5297_v2, %v5293_v40 }
 0x273   : > { %8678 = vmatpush3.bf16.msra.mxu0 %v9011_v61  ;;  %v9014_v61 = vld [vmem:[%s12045_s1 + $0x2e8] sm:$0xff]   ;;  %v5274_v9 = vor.u32 %v5273_v23, %v11381_v50  ;;  %v5264_v59 = vor.u32 %v5263_v10, %v5260_v20  ;;  %v5277_v13 = vshll.u32 %v11223_v41, 16  ;;  %v5306_v11 = vshrl.u32 %v5134_v15, 16  ;;  %v9017_v10 = vld [vmem:[%s12045_s1 + $0x2d0] sm:$0xff]  }
 0x274   : > { %8584 = vmatmul.mubr.bf16.vlgmr.msra.gmra.mxu1 %v7499_v7  ;;  %v5309_v26 = vshll.u32 %v5134_v15, 16  ;;  %v5301_v54 = vshll.u32 %v11233_v39, 16  ;;  %v7502_v55 = vcombine.low %v5246_v33, %v5256_v14  ;;  %v5317_v17 = vrot.slane %v5315_v34, 5  ;;  %v9016_v39 = vld [vmem:[%s12045_s1 + $0x2d8] sm:$0xff]  }
 0x275   : > { %8587 = vmatprep.mubr.bf16.mxu1 %v7500_v44  ;;  %8632 = vmatpush3.bf16.msra.mxu1 %v9012_v62  ;;  %v5232_v62 = vsel %vm9382_vm3, %v5227_v0, %v5231_v12  ;;  %v5275_v7 = vrot.slane %v5274_v9, 4  ;;  %v5321_v25 = vrot.slane %v5319_v63, 4  ;;  %v5289_v5 = vrot.slane %v5288_v42, 4  ;;  %v9019_v9 = vld [vmem:[%s12045_s1 + $0x2c0] sm:$0xff]   ;;  %v9021_v63 = vld [vmem:[%s12045_s1 + $0x470] sm:$0xff]  }
 0x276   : > { %8680 = vmatmul.mubr.bf16.vlgmr.msra.gmra.mxu0 %v10944_v35  ;;  %8633 = vmatprep.subr.bf16.mxu1 %v9013_v36  ;;  %v7501_v18 = vcombine.low %v5222_v43, %v5232_v62  ;;  %v5299_v44 = vrot.slane %v5298_v31, 4  ;;  %v5265_v41 = vrot.slane %v5264_v59, 4  ;;  %v5308_v6 = vrot.slane %v5306_v11, 4 }
 0x277   : > { %8683 = vmatprep.mubr.bf16.mxu0 %v10957_v45  ;;  %v5311_v0 = vrot.slane %v5309_v26, 5  ;;  %v5303_v27 = vrot.slane %v5301_v54, 5  ;;  %v5322_v28 = vor.u32 %v5321_v25, %v5317_v17  ;;  %v5294_v23 = vsel %vm9382_vm3, %v5289_v5, %v5293_v40  ;;  %v12121_v54 = vld [vmem:[#allocation7_spill] sm:$0xff] }
 0x278   : > { %v5270_v24 = vsel %vm9382_vm3, %v5265_v41, %v11381_v50  ;;  %v5325_v12 = vshll.u32 %v11256_v38, 16  ;;  %v9018_v38 = vld [vmem:[%s12045_s1 + $0x2c8] sm:$0xff]   ;;  %v12118_v34 = vcombine.low %v11150_v19, %v11158_v49  ;;  %v9023_v19 = vld [vmem:[%s12045_s1 + $0x460] sm:$0xff]   ;;  %v9025_v49 = vld [vmem:[%s12045_s1 + $0x450] sm:$0xff]  }
 0x279   : > { %8634 = vmatpush3.bf16.msra.mxu1 %v9013_v36  ;;  %v5279_v36 = vrot.slane %v5277_v13, 5  ;;  %v5304_v52 = vsel %vm9382_vm3, %v5299_v44, %v5303_v27  ;;  %v5312_v2 = vor.u32 %v5311_v0, %v5308_v6  ;;  %v12128_v6 = vld [vmem:[#allocation8_spill] sm:$0xff] }
 0x27a   : > { %8635 = vmatprep.subr.bf16.mxu1 %v9014_v61  ;;  %v7504_v43 = vcombine.low %v5294_v23, %v5304_v52  ;;  %v5327_v29 = vrot.slane %v5325_v12, 5  ;;  %v12130_v23 = vcombine.low %v11277_v51, %v11281_v47  ;;  %v12131_v52 = vcombine.low %v11291_v16, %v11295_v32 }
 0x27b   : > { %v5280_v1 = vsel %vm9382_vm3, %v5275_v7, %v5279_v36  ;;  %v5313_v40 = vrot.slane %v5312_v2, 4  ;;  %v12123_v7 = vld [vmem:[#allocation17_spill] sm:$0xff]  ;;  %v12127_v36 = vld [vmem:[#allocation16_spill] sm:$0xff] }
 0x27c   : > { %8588 = vmatmul.mubr.bf16.gmra.mxu1 %v7501_v18  ;;  %v7503_v20 = vcombine.low %v5270_v24, %v5280_v1  ;;  %v12129_v0 = vcombine.low %v12127_v36, %v12128_v6 }
 0x27d   : > { %8591 = vmatprep.mubr.bf16.mxu1 %v7502_v55  ;;  %8636 = vmatpush3.bf16.msra.mxu1 %v9014_v61  ;;  %v5323_v61 = vrot.slane %v5322_v28, 4  ;;  %v5318_v15 = vsel %vm9382_vm3, %v5313_v40, %v5317_v17  ;;  %v12124_v17 = vld [vmem:[#allocation23_spill] sm:$0xff] }
 0x27e   : > { %8684 = vmatmul.mubr.bf16.gmra.mxu0 %v10965_v37  ;;  %8637 = vmatprep.subr.bf16.mxu1 %v9015_v57  ;;  %v12125_v25 = vcombine.low %v12123_v7, %v12124_v17 }
 0x27f   : > { %8687 = vmatprep.mubr.bf16.mxu0 %v10974_v60  ;;  %v5328_v50 = vsel %vm9382_vm3, %v5323_v61, %v5327_v29 }
 0x280   : > { %v7505_v62 = vcombine.low %v5318_v15, %v5328_v50 }
 0x281   : > { %8638 = vmatpush3.bf16.msra.mxu1 %v9015_v57  ;;  %v12120_v57 = vld [vmem:[#allocation15_spill] sm:$0xff] }
 0x282   : > { %8639 = vmatprep.subr.bf16.mxu1 %v9016_v39  ;;  %v12122_v55 = vcombine.low %v12120_v57, %v12121_v54 }
 0x284   : > { %8592 = vmatmul.mubr.bf16.gmra.mxu1 %v7503_v20  ;;  %v12132_v20 = vcombine.low %v11314_v3, %v11318_v53 }
 0x285   : > { %8595 = vmatprep.mubr.bf16.mxu1 %v7504_v43  ;;  %8640 = vmatpush3.bf16.msra.mxu1 %v9016_v39 }
 0x286   : > { %8688 = vmatmul.mubr.bf16.gmra.mxu0 %v10998_v4  ;;  %8641 = vmatprep.subr.bf16.mxu1 %v9017_v10 }
 0x287   : > { %8691 = vmatprep.mubr.bf16.mxu0 %v11119_v48  ;;  %v11464_v33 = vpop.f32.mrf.mxu0 }
 0x289   : > { %8642 = vmatpush3.bf16.msra.mxu1 %v9017_v10  ;;  %v11473_v14 = vpop.f32.mrf.mxu0 }
 0x28a   : > { %8643 = vmatprep.subr.bf16.mxu1 %v9018_v38 }
 0x28b   : > { %v11480_v31 = vpop.f32.mrf.mxu0 }
 0x28c   : > { %8596 = vmatmul.mubr.bf16.gmra.mxu1 %v7505_v62 }
 0x28d   : > { %8644 = vmatpush3.bf16.msra.mxu1 %v9018_v38  ;;  %8647 = vmatprep.mubr.bf16.mxu1 %v10920_v56  ;;  %v9022_v56 = vld [vmem:[%s12045_s1 + $0x468] sm:$0xff]   ;;  %v3951_v13 = vpop.f32.mrf.mxu0 }
 0x28e   : > { %8692 = vmatmul.mubr.bf16.gmra.mxu0 %v12118_v34  ;;  %8645 = vmatprep.subr.bf16.mxu1 %v9019_v9 }
 0x291   : > { %8646 = vmatpush3.bf16.msra.mxu1 %v9019_v9 }
 0x292   : > { %8695 = vmatprep.subr.bf16.mxu1 %v9020_v46 }
 0x294   : > { %8648 = vmatmul.mubr.bf16.vlgmr.msra.gmra.mxu1 %v10925_v30  ;;  %v9024_v30 = vld [vmem:[%s12045_s1 + $0x458] sm:$0xff]  }
 0x295   : > { %8651 = vmatprep.mubr.bf16.mxu1 %v10944_v35  ;;  %8696 = vmatpush3.bf16.msra.mxu1 %v9020_v46  ;;  %v11459_v35 = vpop.f32.mrf.mxu1 }
 0x296   : > { %8697 = vmatprep.subr.bf16.mxu1 %v9021_v63 }
 0x299   : > { %8698 = vmatpush3.bf16.msra.mxu1 %v9021_v63 }
 0x29a   : > { %8699 = vmatprep.subr.bf16.mxu1 %v9022_v56 }
 0x29c   : > { %8652 = vmatmul.mubr.bf16.gmra.mxu1 %v10957_v45  ;;  %v11468_v45 = vpop.f32.mrf.mxu1 }
 0x29d   : > { %8655 = vmatprep.mubr.bf16.mxu1 %v10965_v37  ;;  %8700 = vmatpush3.bf16.msra.mxu1 %v9022_v56  ;;  %v9026_v37 = vld [vmem:[%s12045_s1 + $0x448] sm:$0xff]  }
 0x29e   : > { %8701 = vmatprep.subr.bf16.mxu1 %v9023_v19  ;;  %v11475_v42 = vpop.f32.mrf.mxu1 }
 0x2a0   : > { %v3632_v59 = vpop.f32.mrf.mxu1 }
 0x2a1   : > { %8702 = vmatpush3.bf16.msra.mxu1 %v9023_v19 }
 0x2a2   : > { %8703 = vmatprep.subr.bf16.mxu1 %v9024_v30  ;;  %v8365_v11 = vpop.f32.mrf.mxu1 }
 0x2a4   : > { %8656 = vmatmul.mubr.bf16.gmra.mxu1 %v10974_v60  ;;  %v9027_v60 = vld [vmem:[%s12045_s1 + $0x440] sm:$0xff]   ;;  %v3645_v18 = vpop.f32.mrf.mxu1 }
 0x2a5   : > { %8659 = vmatprep.mubr.bf16.mxu1 %v10998_v4  ;;  %8704 = vmatpush3.bf16.msra.mxu1 %v9024_v30  ;;  %v12119_v4 = vcombine.low %v11172_v8, %v11176_v22  ;;  %v12126_v22 = vcombine.low %v11237_v21, %v11245_v58 }
 0x2a6   : > { %8705 = vmatprep.subr.bf16.mxu1 %v9025_v49  ;;  %v8366_v5 = vpop.f32.mrf.mxu1 }
 0x2a8   : > { %v8429_v26 = vpop.f32.mrf.mxu0  ;;  %v3648_v8 = vpop.f32.mrf.mxu1 }
 0x2a9   : > { %8706 = vmatpush3.bf16.msra.mxu1 %v9025_v49 }
 0x2aa   : > { %8707 = vmatprep.subr.bf16.mxu1 %v9026_v37 }
 0x2ac   : > { %8660 = vmatmul.mubr.bf16.gmra.mxu1 %v11119_v48  ;;  %v3964_v48 = vpop.f32.mrf.mxu0 }
 0x2ad   : > { %8708 = vmatpush3.bf16.msra.mxu1 %v9026_v37  ;;  %8711 = vmatprep.mubr.bf16.mxu1 %v12119_v4 }
 0x2ae   : > { %8709 = vmatprep.subr.bf16.mxu1 %v9027_v60  ;;  %v8430_v44 = vpop.f32.mrf.mxu0 }
 0x2b0   : > { %v3967_v41 = vpop.f32.mrf.mxu0  ;;  %v8369_v39 = vpop.f32.mrf.mxu1 }
 0x2b1   : > { %8710 = vmatpush3.bf16.msra.mxu1 %v9027_v60 }
 0x2b2   : > { %v3661_v28 = vpop.f32.mrf.mxu1 }
 0x2b4   : > { %8712 = vmatmul.mubr.bf16.vlgmr.msra.gmra.mxu1 %v12122_v55  ;;  %v8370_v58 = vpop.f32.mrf.mxu1 }
 0x2b5   : > { %8715 = vmatprep.mubr.bf16.mxu1 %v12125_v25 }
 0x2b6   : > { %v3664_v2 = vpop.f32.mrf.mxu1 }
 0x2bc   : > { %8716 = vmatmul.mubr.bf16.gmra.mxu1 %v12126_v22 }
 0x2bd   : > { %8719 = vmatprep.mubr.bf16.mxu1 %v12129_v0 }
 0x2c1   : > { %v8433_v27 = vpop.f32.mrf.mxu0 }
 0x2c3   : > { %v3980_v1 = vpop.f32.mrf.mxu0 }
 0x2c4   : > { %8720 = vmatmul.mubr.bf16.gmra.mxu1 %v12130_v23  ;;  %v9030_v23 = vld [vmem:[%s12045_s1 + $0x4a8] sm:$0xff]  }
 0x2c5   : > { %8723 = vmatprep.mubr.bf16.mxu1 %v12131_v52  ;;  %v8434_v24 = vpop.f32.mrf.mxu0 }
 0x2c7   : > { %v11504_v21 = vpop.f32.mrf.mxu0 }
 0x2cc   : > { %v8373_v12 = vpop.f32.mrf.mxu1  ;;  %8724 = vmatmul.mubr.bf16.gmra.mxu1 %v12132_v20 }
 0x2cd   : > { %v11509_v10 = vpop.f32.mrf.mxu0 }
 0x2ce   : > { %v11511_v43 = vpop.f32.mrf.mxu1 }
 0x2cf   : > { %v11513_v51 = vpop.f32.mrf.mxu0 }
 0x2d0   : > { %v11515_v47 = vpop.f32.mrf.mxu1 }
 0x2d1   : > { %v11517_v16 = vpop.f32.mrf.mxu0 }
 0x2d2   : > { %v11519_v32 = vpop.f32.mrf.mxu1 }
 0x2d3   : > { %v11521_v61 = vpop.f32.mrf.mxu0 }
 0x2d4   : > { %v8393_v40 = vpop.f32.mrf.mxu1 }
 0x2d6   : > { %v11523_v29 = vpop.f32.mrf.mxu0  ;;  %v11525_v38 = vpop.f32.mrf.mxu1 }
 0x2d8   : > { %v11527_v3 = vpop.f32.mrf.mxu0  ;;  %v11529_v53 = vpop.f32.mrf.mxu1 }
 0x2da   : > { %v11531_v50 = vpop.f32.mrf.mxu0  ;;  %v3783_v15 = vpop.f32.mrf.mxu1 }
 0x2db   : > { %v3784_v62 = vadd.f32 %v3783_v15, %v3632_v59 }
 0x2dc   : > { %v11533_v9 = vpop.f32.mrf.mxu0  ;;  %v8397_v34 = vpop.f32.mrf.mxu1 }
 0x2dd   : > { %v3805_v46 = vadd.f32 %v8397_v34, %v8365_v11  ;;  %v11535_v63 = vadd.f32 %v3951_v13, %v3784_v62  ;;  %v9028_v13 = vld [vmem:[%s12045_s1 + $0x4b8] sm:$0xff]  }
 0x2de   : > { %v11537_v56 = vpop.f32.mrf.mxu0  ;;  %v3796_v19 = vpop.f32.mrf.mxu1  ;;  %8727 = vmatprep.subr.bf16.mxu0 %v9028_v13  ;;  %8759 = vmatprep.subr.bf16.mxu1 %v9028_v13 }
 0x2df   : > { %v3797_v30 = vadd.f32 %v3796_v19, %v3645_v18  ;;  %v11539_v49 = vadd.f32 %v8429_v26, %v3805_v46  ;;  %8728 = vmatpush3.bf16.msra.mxu0 %v9028_v13  ;;  %8767 = vmatpush3.bf16.msra.mxu1 %v9028_v13  ;;  %v3781_v19 = vadd.f32 %v11525_v38, %v11468_v45 }
 0x2e0   : > { %v11541_v37 = vpop.f32.mrf.mxu0  ;;  %v8398_v60 = vpop.f32.mrf.mxu1 }
 0x2e1   : > { %v3808_v4 = vadd.f32 %v8398_v60, %v8366_v5  ;;  %v11543_v57 = vadd.f32 %v3964_v48, %v3797_v30 }
 0x2e2   : > { %v11545_v54 = vpop.f32.mrf.mxu0  ;;  %v3799_v59 = vpop.f32.mrf.mxu1 }
 0x2e3   : > { %v3800_v55 = vadd.f32 %v3799_v59, %v3648_v8  ;;  %v11547_v7 = vadd.f32 %v8430_v44, %v3808_v4  ;;  %v9029_v8 = vld [vmem:[%s12045_s1 + $0x4b0] sm:$0xff]  }
 0x2e4   : > { %v11552_v11 = vpop.f32.mrf.mxu0  ;;  %v8401_v26 = vpop.f32.mrf.mxu1  ;;  %8729 = vmatprep.subr.bf16.mxu0 %v9029_v8  ;;  %8760 = vmatprep.subr.bf16.mxu1 %v9029_v8 }
 0x2e5   : > { %v3821_v18 = vadd.f32 %v8401_v26, %v8369_v39  ;;  %v11554_v17 = vadd.f32 %v3967_v41, %v3800_v55  ;;  %8730 = vmatpush3.bf16.msra.mxu0 %v9029_v8  ;;  %8768 = vmatpush3.bf16.msra.mxu1 %v9029_v8  ;;  %v4011_v55 = vadd.f32 %v11473_v14, %v3781_v19 }
 0x2e6   : > { %v11556_v25 = vpop.f32.mrf.mxu0  ;;  %v3812_v48 = vpop.f32.mrf.mxu1  ;;  %8731 = vmatprep.subr.bf16.mxu0 %v9030_v23  ;;  %8761 = vmatprep.subr.bf16.mxu1 %v9030_v23 }
 0x2e7   : > { %v3813_v5 = vadd.f32 %v3812_v48, %v3661_v28  ;;  %v11558_v44 = vadd.f32 %v8433_v27, %v3821_v18  ;;  %v9033_v48 = vld [vmem:[%s12045_s1 + $0x490] sm:$0xff]  }
 0x2e8   : > { %v11563_v22 = vpop.f32.mrf.mxu0  ;;  %v8402_v36 = vpop.f32.mrf.mxu1 }
 0x2e9   : > { %v3824_v6 = vadd.f32 %v8402_v36, %v8370_v58  ;;  %v11565_v41 = vadd.f32 %v3980_v1, %v3813_v5  ;;  %8732 = vmatpush3.bf16.msra.mxu0 %v9030_v23  ;;  %8769 = vmatpush3.bf16.msra.mxu1 %v9030_v23 }
 0x2ea   : > { %v11567_v0 = vpop.f32.mrf.mxu0  ;;  %v3815_v39 = vpop.f32.mrf.mxu1 }
 0x2eb   : > { %v3816_v28 = vadd.f32 %v3815_v39, %v3664_v2  ;;  %v11569_v27 = vadd.f32 %v8434_v24, %v3824_v6  ;;  %v3789_v24 = vadd.f32 %v8393_v40, %v11459_v35 }
 0x2ec   : > { %v11574_v52 = vpop.f32.mrf.mxu0  ;;  %v8405_v20 = vpop.f32.mrf.mxu1 }
 0x2ed   : > { %v3837_v58 = vadd.f32 %v8405_v20, %v8373_v12  ;;  %v11577_v1 = vadd.f32 %v11504_v21, %v3816_v28  ;;  %v9031_v12 = vld [vmem:[%s12045_s1 + $0x4a0] sm:$0xff]   ;;  %v4013_v4 = vadd.f32 %v11464_v33, %v3789_v24  ;;  %v9034_v28 = vld [vmem:[%s12045_s1 + $0x488] sm:$0xff]  }
 0x2ee   : > { %v11579_v15 = vpop.f32.mrf.mxu0  ;;  %v3828_v62 = vpop.f32.mrf.mxu1  ;;  %8733 = vmatprep.subr.bf16.mxu0 %v9031_v12  ;;  %8762 = vmatprep.subr.bf16.mxu1 %v9031_v12  ;;  %v9035_v24 = vld [vmem:[%s12045_s1 + $0x480] sm:$0xff]  }
 0x2ef   : > { %v3829_v2 = vadd.f32 %v3828_v62, %v11511_v43  ;;  %v11584_v34 = vadd.f32 %v11509_v10, %v3837_v58  ;;  %8734 = vmatpush3.bf16.msra.mxu0 %v9031_v12  ;;  %8770 = vmatpush3.bf16.msra.mxu1 %v9031_v12  ;;  %v3792_v43 = vadd.f32 %v11529_v53, %v11475_v42 }
 0x2f0   : > { %v11589_v21 = vpop.f32.mrf.mxu0  ;;  %v8406_v46 = vpop.f32.mrf.mxu1 }
 0x2f1   : > { %v3840_v30 = vadd.f32 %v8406_v46, %v11515_v47  ;;  %v11595_v60 = vadd.f32 %v11513_v51, %v3829_v2  ;;  %v9032_v51 = vld [vmem:[%s12045_s1 + $0x498] sm:$0xff]  }
 0x2f2   : > { %v11597_v35 = vpop.f32.mrf.mxu0  ;;  %v3831_v10 = vpop.f32.mrf.mxu1  ;;  %8735 = vmatprep.subr.bf16.mxu0 %v9032_v51  ;;  %8763 = vmatprep.subr.bf16.mxu1 %v9032_v51 }
 0x2f3   : > { %v3832_v40 = vadd.f32 %v3831_v10, %v11519_v32  ;;  %v11604_v45 = vadd.f32 %v11517_v16, %v3840_v30  ;;  %8736 = vmatpush3.bf16.msra.mxu0 %v9032_v51  ;;  %8771 = vmatpush3.bf16.msra.mxu1 %v9032_v51  ;;  %v4014_v32 = vadd.f32 %v11480_v31, %v3792_v43 }
 0x2f4   : > { %v11609_v47 = vpop.f32.mrf.mxu0  ;;  %v8457_v38 = vpop.f32.mrf.mxu1  ;;  %8737 = vmatprep.subr.bf16.mxu0 %v9033_v48  ;;  %8764 = vmatprep.subr.bf16.mxu1 %v9033_v48 }
 0x2f5   : > { %v4255_v59 = vadd.f32 %v8457_v38, %v4013_v4  ;;  %v11613_v13 = vadd.f32 %v11521_v61, %v3832_v40 }
 0x2f6   : > { %v11615_v42 = vpop.f32.mrf.mxu0  ;;  %v4190_v33 = vpop.f32.mrf.mxu1 }
 0x2f7   : > { %v4253_v16 = vadd.f32 %v4190_v33, %v4011_v55  ;;  %v11619_v53 = vadd.f32 %v11523_v29, %v4255_v59  ;;  %8738 = vmatpush3.bf16.msra.mxu0 %v9033_v48  ;;  %8772 = vmatpush3.bf16.msra.mxu1 %v9033_v48 }
 0x2f8   : > { %v11621_v26 = vpop.f32.mrf.mxu0  ;;  %v8458_v18 = vpop.f32.mrf.mxu1  ;;  %8739 = vmatprep.subr.bf16.mxu0 %v9034_v28  ;;  %8765 = vmatprep.subr.bf16.mxu1 %v9034_v28 }
 0x2f9   : > { %v4256_v14 = vadd.f32 %v8458_v18, %v4014_v32  ;;  %v11624_v61 = vadd.f32 %v11527_v3, %v4253_v16 }
 0x2fa   : > { %v11629_v5 = vpop.f32.mrf.mxu0  ;;  %v4193_v8 = vpop.f32.mrf.mxu1 }
 0x2fb   : > { %v4254_v36 = vadd.f32 %v4193_v8, %v11535_v63  ;;  %v11633_v31 = vadd.f32 %v11531_v50, %v4256_v14  ;;  %8740 = vmatpush3.bf16.msra.mxu0 %v9034_v28  ;;  %8773 = vmatpush3.bf16.msra.mxu1 %v9034_v28 }
 0x2fc   : > { %v11635_v29 = vpop.f32.mrf.mxu0  ;;  %v8461_v6 = vpop.f32.mrf.mxu1  ;;  %8741 = vmatprep.subr.bf16.mxu0 %v9035_v24  ;;  %8766 = vmatprep.subr.bf16.mxu1 %v9035_v24 }
 0x2fd   : > { %v4259_v3 = vadd.f32 %v8461_v6, %v11539_v49  ;;  %v11639_v39 = vadd.f32 %v11533_v9, %v4254_v36 }
 0x2fe   : > { %v11644_v63 = vpop.f32.mrf.mxu0  ;;  %v4206_v50 = vpop.f32.mrf.mxu1 }
 0x2ff   : > { %v4257_v23 = vadd.f32 %v4206_v50, %v11543_v57  ;;  %v11648_v20 = vadd.f32 %v11537_v56, %v4259_v3  ;;  %8742 = vmatpush3.bf16.msra.mxu0 %v9035_v24  ;;  %8774 = vmatpush3.bf16.msra.mxu1 %v9035_v24 }
 0x300   : > { %v11650_v58 = vpop.f32.mrf.mxu0  ;;  %v8462_v49 = vpop.f32.mrf.mxu1 }
 0x301   : > { %v4260_v9 = vadd.f32 %v8462_v49, %v11547_v7  ;;  %v4737_v62 = vadd.f32 %v11541_v37, %v4257_v23 }
 0x302   : > { %v11657_v2 = vpop.f32.mrf.mxu0  ;;  %v4209_v57 = vpop.f32.mrf.mxu1 }
 0x303   : > { %v4258_v56 = vadd.f32 %v4209_v57, %v11554_v17  ;;  %v4740_v12 = vadd.f32 %v11545_v54, %v4260_v9 }
 0x304   : > { %v11661_v46 = vpop.f32.mrf.mxu0  ;;  %v8465_v19 = vpop.f32.mrf.mxu1 }
 0x305   : > { %v4263_v37 = vadd.f32 %v8465_v19, %v11558_v44  ;;  %v4738_v7 = vadd.f32 %v11552_v11, %v4258_v56 }
 0x306   : > { %v11665_v30 = vpop.f32.mrf.mxu0  ;;  %v4222_v10 = vpop.f32.mrf.mxu1 }
 0x307   : > { %v4261_v43 = vadd.f32 %v4222_v10, %v11565_v41  ;;  %v4743_v17 = vadd.f32 %v11556_v25, %v4263_v37 }
 0x308   : > { %v11669_v40 = vpop.f32.mrf.mxu0  ;;  %v8466_v54 = vpop.f32.mrf.mxu1 }
 0x309   : > { %v4264_v4 = vadd.f32 %v8466_v54, %v11569_v27  ;;  %v4741_v51 = vadd.f32 %v11563_v22, %v4261_v43 }
 0x30a   : > { %v11673_v38 = vpop.f32.mrf.mxu0  ;;  %v4225_v59 = vpop.f32.mrf.mxu1 }
 0x30b   : > { %v4262_v44 = vadd.f32 %v4225_v59, %v11577_v1  ;;  %v4744_v11 = vadd.f32 %v11567_v0, %v4264_v4 }
 0x30c   : > { %v11677_v55 = vpop.f32.mrf.mxu0  ;;  %v8469_v33 = vpop.f32.mrf.mxu1 }
 0x30d   : > { %12133 = vst [vmem:[#allocation19_spill] sm:$0xff] %v11677_v55  ;;  %v4267_v41 = vadd.f32 %v8469_v33, %v11584_v34  ;;  %v4742_v25 = vadd.f32 %v11574_v52, %v4262_v44 }
 0x30e   : > { %v11681_v16 = vpop.f32.mrf.mxu0  ;;  %v4238_v32 = vpop.f32.mrf.mxu1 }
 0x30f   : > { %12134 = vst [vmem:[#allocation18_spill] sm:$0xff] %v11681_v16  ;;  %v4265_v27 = vadd.f32 %v4238_v32, %v11595_v60  ;;  %v4747_v22 = vadd.f32 %v11579_v15, %v4267_v41 }
 0x310   : > { %v11685_v18 = vpop.f32.mrf.mxu0  ;;  %v8470_v14 = vpop.f32.mrf.mxu1 }
 0x311   : > { %12135 = vst [vmem:[#allocation21_spill] sm:$0xff] %v11685_v18  ;;  %v4268_v1 = vadd.f32 %v8470_v14, %v11604_v45  ;;  %v4745_v0 = vadd.f32 %v11589_v21, %v4265_v27 }
 0x312   : > { %v11689_v48 = vpop.f32.mrf.mxu0  ;;  %v4241_v8 = vpop.f32.mrf.mxu1 }
 0x313   : > { %12136 = vst [vmem:[#allocation9_spill] sm:$0xff] %v11689_v48  ;;  %v4266_v34 = vadd.f32 %v4241_v8, %v11613_v13  ;;  %v4748_v52 = vadd.f32 %v11597_v35, %v4268_v1 }
 0x314   : > { %v11693_v36 = vpop.f32.mrf.mxu0  ;;  %v8521_v6 = vpop.f32.mrf.mxu1 }
 0x315   : > { %12137 = vst [vmem:[#allocation24_spill] sm:$0xff] %v11693_v36  ;;  %v11696_v60 = vadd.f32 %v8521_v6, %v11619_v53  ;;  %v4746_v15 = vadd.f32 %v11609_v47, %v4266_v34 }
 0x316   : > { %v11699_v3 = vpop.f32.mrf.mxu0  ;;  %v4852_v45 = vpop.f32.mrf.mxu1 }
 0x317   : > { %v11702_v21 = vadd.f32 %v4852_v45, %v11624_v61  ;;  %v5099_v16 = vadd.f32 %v11615_v42, %v11696_v60 }
 0x318   : > { %v11704_v28 = vpop.f32.mrf.mxu0  ;;  %v8522_v50 = vpop.f32.mrf.mxu1 }
 0x319   : > { %v11707_v13 = vadd.f32 %v8522_v50, %v11633_v31 }
 0x31a   : > { %v4855_v35 = vpop.f32.mrf.mxu1  ;;  %v11712_v53 = vpop.f32.mrf.mxu0 }
 0x31b   : > { %v11710_v23 = vadd.f32 %v4855_v35, %v11639_v39 }
 0x31c   : > { %v8525_v49 = vpop.f32.mrf.mxu1  ;;  %v11719_v61 = vpop.f32.mrf.mxu0 }
 0x31d   : > { %v11715_v47 = vadd.f32 %v8525_v49, %v11648_v20 }
 0x31e   : > { %v4868_v9 = vpop.f32.mrf.mxu1  ;;  %v11725_v37 = vpop.f32.mrf.mxu0 }
 0x31f   : > { %v11717_v24 = vadd.f32 %v4868_v9, %v4737_v62 }
 0x320   : > { %v8526_v57 = vpop.f32.mrf.mxu1  ;;  %v11731_v20 = vpop.f32.mrf.mxu0 }
 0x321   : > { %v11721_v56 = vadd.f32 %v8526_v57, %v4740_v12 }
 0x322   : > { %v4871_v31 = vpop.f32.mrf.mxu1  ;;  %v11737_v12 = vpop.f32.mrf.mxu0 }
 0x323   : > { %v11723_v19 = vadd.f32 %v4871_v31, %v4738_v7 }
 0x324   : > { %v8529_v39 = vpop.f32.mrf.mxu1 }
 0x325   : > { %v11727_v10 = vadd.f32 %v8529_v39, %v4743_v17  ;;  %v11743_v17 = vpop.f32.mrf.mxu0 }
 0x326   : > { %v4884_v43 = vpop.f32.mrf.mxu1 }
 0x327   : > { %v11729_v54 = vadd.f32 %v4884_v43, %v4741_v51 }
 0x328   : > { %v8530_v62 = vpop.f32.mrf.mxu1 }
 0x329   : > { %v11733_v4 = vadd.f32 %v8530_v62, %v4744_v11  ;;  %v11749_v11 = vpop.f32.mrf.mxu0 }
 0x32a   : > { %v4887_v59 = vpop.f32.mrf.mxu1  ;;  %12142 = vst [vmem:[#allocation12_spill] sm:$0xff] %v11749_v11 }
 0x32b   : > { %v11735_v44 = vadd.f32 %v4887_v59, %v4742_v25  ;;  %v11751_v34 = vpop.f32.mrf.mxu0 }
 0x32c   : > { %v8533_v7 = vpop.f32.mrf.mxu1  ;;  %12143 = vst [vmem:[#allocation22_spill] sm:$0xff] %v11751_v34 }
 0x32d   : > { %v11739_v33 = vadd.f32 %v8533_v7, %v4747_v22  ;;  %v11753_v45 = vpop.f32.mrf.mxu0 }
 0x32e   : > { %v4900_v41 = vpop.f32.mrf.mxu1  ;;  %12144 = vst [vmem:[#allocation13_spill] sm:$0xff] %v11753_v45 }
 0x32f   : > { %12138 = vst [vmem:[#allocation10_spill] sm:$0xff] %v11739_v33  ;;  %v11741_v32 = vadd.f32 %v4900_v41, %v4745_v0  ;;  %v11755_v35 = vpop.f32.mrf.mxu0 }
 0x330   : > { %v8534_v51 = vpop.f32.mrf.mxu1  ;;  %12145 = vst [vmem:[#allocation26_spill] sm:$0xff] %v11755_v35 }
 0x331   : > { %12139 = vst [vmem:[#allocation25_spill] sm:$0xff] %v11741_v32  ;;  %v11745_v27 = vadd.f32 %v8534_v51, %v4748_v52  ;;  %v11759_v9 = vpop.f32.mrf.mxu0 }
 0x332   : > { %v4903_v14 = vpop.f32.mrf.mxu1  ;;  %12146 = vst [vmem:[#allocation14_spill] sm:$0xff] %v11759_v9 }
 0x333   : > { %12140 = vst [vmem:[#allocation20_spill] sm:$0xff] %v11745_v27  ;;  %v11747_v1 = vadd.f32 %v4903_v14, %v4746_v15  ;;  %v11765_v31 = vpop.f32.mrf.mxu0 }
 0x334   : > { %v8585_v25 = vpop.f32.mrf.mxu1  ;;  %12147 = vst [vmem:[#allocation5_spill] sm:$0xff] %v11765_v31 }
 0x335   : > { %12141 = vst [vmem:[#allocation11_spill] sm:$0xff] %v11747_v1  ;;  %v11771_v62 = vpop.f32.mrf.mxu0  ;;  %v5525_v11 = vadd.f32 %v8585_v25, %v5099_v16 }
 0x336   : > { %v5460_v8 = vpop.f32.mrf.mxu1  ;;  %12149 = vst [vmem:[#allocation15_spill] sm:$0xff] %v11771_v62 }
 0x337   : > { %v11777_v41 = vpop.f32.mrf.mxu0  ;;  %v5845_v16 = vadd.f32 %v11699_v3, %v5525_v11  ;;  %v5104_v3 = vadd.f32 %v11657_v2, %v11721_v56 }
 0x338   : > { %v8586_v6 = vpop.f32.mrf.mxu1  ;;  %12152 = vst [vmem:[#allocation23_spill] sm:$0xff] %v11777_v41 }
 0x339   : > { %v8681_v9 = vpop.f32.mrf.mxu0 }
 0x33a   : > { %v5463_v22 = vpop.f32.mrf.mxu1 }
 0x33b   : > { %v6144_v31 = vpop.f32.mrf.mxu0 }
 0x33c   : > { %v8589_v0 = vpop.f32.mrf.mxu1 }
 0x33d   : > { %v8682_v27 = vpop.f32.mrf.mxu0 }
 0x33e   : > { %v5476_v50 = vpop.f32.mrf.mxu1 }
 0x33f   : > { %v6147_v62 = vpop.f32.mrf.mxu0 }
 0x340   : > { %v8590_v49 = vpop.f32.mrf.mxu1 }
 0x342   : > { %v11757_v52 = vpop.f32.mrf.mxu1 }
 0x344   : > { %v11761_v15 = vpop.f32.mrf.mxu1 }
 0x346   : > { %v11763_v57 = vpop.f32.mrf.mxu1 }
 0x348   : > { %v11767_v39 = vpop.f32.mrf.mxu1 }
 0x34a   : > { %v11769_v43 = vpop.f32.mrf.mxu1 }
 0x34b   : > { %12148 = vst [vmem:[#allocation6_spill] sm:$0xff] %v11769_v43  ;;  %v5097_v43 = vadd.f32 %v11621_v26, %v11702_v21  ;;  %v5103_v26 = vadd.f32 %v11644_v63, %v11715_v47 }
 0x34c   : > { %v11773_v59 = vpop.f32.mrf.mxu1 }
 0x34d   : > { %12150 = vst [vmem:[#allocation7_spill] sm:$0xff] %v11773_v59 }
 0x34e   : > { %v11775_v7 = vpop.f32.mrf.mxu1 }
 0x34f   : > { %12151 = vst [vmem:[#allocation17_spill] sm:$0xff] %v11775_v7  ;;  %v11785_v7 = vpop.f32.mrf.mxu0 }
 0x350   : > { %v11779_v51 = vpop.f32.mrf.mxu1  ;;  %12156 = vst [vmem:[#allocation28_spill] sm:$0xff] %v11785_v7 }
 0x351   : > { %12153 = vst [vmem:[#allocation16_spill] sm:$0xff] %v11779_v51 }
 0x352   : > { %v11781_v14 = vpop.f32.mrf.mxu1 }
 0x353   : > { %12154 = vst [vmem:[#allocation8_spill] sm:$0xff] %v11781_v14  ;;  %v11791_v14 = vpop.f32.mrf.mxu0 }
 0x354   : > { %v8649_v36 = vpop.f32.mrf.mxu1  ;;  %12159 = vst [vmem:[#allocation31_spill] sm:$0xff] %v11791_v14 }
 0x355   : > { %v11803_v7 = vpop.f32.mrf.mxu0  ;;  %v6027_v21 = vadd.f32 %v8649_v36, %v5845_v16  ;;  %v5102_v36 = vadd.f32 %v11661_v46, %v11723_v19  ;;  %v5105_v46 = vadd.f32 %v11669_v40, %v11729_v54  ;;  %v5108_v40 = vadd.f32 %v11673_v38, %v11733_v4 }
 0x356   : > { %v5962_v1 = vpop.f32.mrf.mxu1 }
 0x357   : > { %v11814_v60 = vpop.f32.mrf.mxu0  ;;  %v12162_v16 = vld [vmem:[#allocation28_spill] sm:$0xff] }
 0x358   : > { %v8650_v35 = vpop.f32.mrf.mxu1 }
 0x35a   : > { %v5965_v48 = vpop.f32.mrf.mxu1 }
 0x35c   : > { %v8653_v45 = vpop.f32.mrf.mxu1 }
 0x35e   : > { %v5978_v34 = vpop.f32.mrf.mxu1 }
 0x360   : > { %v8654_v18 = vpop.f32.mrf.mxu1 }
 0x362   : > { %v11783_v59 = vpop.f32.mrf.mxu1 }
 0x363   : > { %12155 = vst [vmem:[#allocation27_spill] sm:$0xff] %v11783_v59  ;;  %v5100_v59 = vadd.f32 %v11629_v5, %v11707_v13 }
 0x364   : > { %v11787_v41 = vpop.f32.mrf.mxu1 }
 0x365   : > { %12157 = vst [vmem:[#allocation29_spill] sm:$0xff] %v11787_v41  ;;  %v5526_v14 = vadd.f32 %v8586_v6, %v5100_v59  ;;  %v5530_v6 = vadd.f32 %v8590_v49, %v5104_v3  ;;  %v12166_v3 = vld [vmem:[#allocation31_spill] sm:$0xff] }
 0x366   : > { %v11789_v51 = vpop.f32.mrf.mxu1 }
 0x367   : > { %12158 = vst [vmem:[#allocation30_spill] sm:$0xff] %v11789_v51  ;;  %v5523_v51 = vadd.f32 %v5460_v8, %v5097_v43  ;;  %v5846_v25 = vadd.f32 %v11712_v53, %v5526_v14  ;;  %v5529_v8 = vadd.f32 %v8589_v0, %v5103_v26  ;;  %v6209_v0 = vadd.f32 %v8681_v9, %v6027_v21 }
 0x368   : > { %v11793_v32 = vpop.f32.mrf.mxu1  ;;  %v5850_v49 = vadd.f32 %v11737_v12, %v5530_v6  ;;  %v5531_v12 = vadd.f32 %v11763_v57, %v5105_v46  ;;  %v5534_v14 = vadd.f32 %v11767_v39, %v5108_v40  ;;  %v12169_v6 = vld [vmem:[#allocation25_spill] sm:$0xff]  ;;  %v12178_v40 = vld [vmem:[#allocation26_spill] sm:$0xff] }
 0x369   : > { %12160 = vst [vmem:[#allocation32_spill] sm:$0xff] %v11793_v32  ;;  %v5098_v32 = vadd.f32 %v11635_v29, %v11710_v23  ;;  %v5843_v13 = vadd.f32 %v11704_v28, %v5523_v51  ;;  %v5101_v29 = vadd.f32 %v11650_v58, %v11717_v24  ;;  %v6028_v63 = vadd.f32 %v8650_v35, %v5846_v25  ;;  %v11829_v28 = vpop.f32.mrf.mxu0  ;;  %v11843_v35 = vld [vmem:[%s12047_s3 + $0x2] ss:$0 sm:$0xff] }
 0x36a   : > { %v11797_v33 = vpop.f32.mrf.mxu1  ;;  %v5528_v58 = vadd.f32 %v11757_v52, %v5102_v36  ;;  %v5849_v24 = vadd.f32 %v11725_v37, %v5529_v8  ;;  %v12165_v8 = vld [vmem:[#allocation12_spill] sm:$0xff]  ;;  %v12168_v36 = vld [vmem:[#allocation18_spill] sm:$0xff] }
 0x36b   : > { %v5524_v42 = vadd.f32 %v5463_v22, %v5098_v32  ;;  %v6025_v32 = vadd.f32 %v5962_v1, %v5843_v13  ;;  %v5527_v11 = vadd.f32 %v5476_v50, %v5101_v29  ;;  %v6210_v1 = vadd.f32 %v8682_v27, %v6028_v63  ;;  %v11837_v19 = vpop.f32.mrf.mxu0  ;;  %v12164_v13 = vld [vmem:[#allocation6_spill] sm:$0xff] }
 0x36c   : > { %v11805_v41 = vpop.f32.mrf.mxu1  ;;  %v6031_v50 = vadd.f32 %v8653_v45, %v5849_v24  ;;  %v5848_v54 = vadd.f32 %v11743_v17, %v5528_v58  ;;  %v6032_v45 = vadd.f32 %v8654_v18, %v5850_v49  ;;  %v12171_v58 = vld [vmem:[#allocation29_spill] sm:$0xff]  ;;  %v12175_v49 = vld [vmem:[#allocation20_spill] sm:$0xff] }
 0x36d   : > { %v5844_v47 = vadd.f32 %v11719_v61, %v5524_v42  ;;  %v6207_v56 = vadd.f32 %v6144_v31, %v6025_v32  ;;  %v5107_v61 = vadd.f32 %v11665_v30, %v11727_v10 }
 0x36e   : > { %v11809_v55 = vpop.f32.mrf.mxu1  ;;  %v6213_v38 = vadd.f32 %v12162_v16, %v6031_v50  ;;  %v12182_v16 = vld [vmem:[#allocation11_spill] sm:$0xff] }
 0x36f   : > { %v6026_v22 = vadd.f32 %v5965_v48, %v5844_v47  ;;  %v5847_v48 = vadd.f32 %v11731_v20, %v5527_v11  ;;  %v5533_v30 = vadd.f32 %v11761_v15, %v5107_v61  ;;  %v12161_v15 = vld [vmem:[#allocation19_spill] sm:$0xff]  ;;  %v12167_v11 = vld [vmem:[#allocation10_spill] sm:$0xff] }
 0x370   : > { %v11816_v5 = vpop.f32.mrf.mxu1  ;;  %v5106_v42 = vadd.f32 %v12161_v15, %v11735_v44  ;;  %v6214_v44 = vadd.f32 %v11803_v7, %v6032_v45  ;;  %v12181_v15 = vld [vmem:[#allocation16_spill] sm:$0xff] }
 0x371   : > { %v6208_v9 = vadd.f32 %v6147_v62, %v6026_v22  ;;  %v6029_v10 = vadd.f32 %v5978_v34, %v5847_v48  ;;  %v8690_v62 = vpop.f32.mrf.mxu0  ;;  %v12163_v34 = vld [vmem:[#allocation27_spill] sm:$0xff]  ;;  %v5853_v57 = vadd.f32 %v12165_v8, %v5533_v30  ;;  %v12170_v22 = vld [vmem:[#allocation21_spill] sm:$0xff] }
 0x372   : > { %v11822_v23 = vpop.f32.mrf.mxu1  ;;  %v6030_v17 = vadd.f32 %v12163_v34, %v5848_v54  ;;  %v5532_v25 = vadd.f32 %v12164_v13, %v5106_v42  ;;  %v12174_v48 = vld [vmem:[#allocation7_spill] sm:$0xff] }
 0x373   : > { %v6211_v32 = vadd.f32 %v12166_v3, %v6029_v10  ;;  %v6179_v47 = vpop.f32.mrf.mxu0  ;;  %v6035_v24 = vadd.f32 %v12171_v58, %v5853_v57  ;;  %v12185_v57 = vld [vmem:[#allocation14_spill] sm:$0xff] }
 0x374   : > { %v8713_v53 = vpop.f32.mrf.mxu1  ;;  %v6212_v7 = vadd.f32 %v11814_v60, %v6030_v17  ;;  %v5852_v10 = vadd.f32 %v12178_v40, %v5532_v25  ;;  %v12180_v60 = vld [vmem:[#allocation17_spill] sm:$0xff]  ;;  %v12184_v25 = vld [vmem:[#allocation8_spill] sm:$0xff] }
 0x375   : > { %v6507_v2 = vadd.f32 %v8713_v53, %v6209_v0  ;;  %v5111_v53 = vadd.f32 %v12168_v36, %v12167_v11  ;;  %v5109_v0 = vadd.f32 %v12170_v22, %v12169_v6  ;;  %v6217_v34 = vadd.f32 %v11829_v28, %v6035_v24  ;;  %v12186_v36 = vld [vmem:[#allocation5_spill] sm:$0xff]  ;;  %v12187_v6 = vld [vmem:[#allocation15_spill] sm:$0xff] }
 0x376   : > { %v6442_v43 = vpop.f32.mrf.mxu1 }
 0x377   : > { %v6505_v27 = vadd.f32 %v6442_v43, %v6207_v56  ;;  %v6531_v31 = vadd.f32 %v11843_v35, %v6507_v2  ;;  %v12172_v43 = vld [vmem:[#allocation22_spill] sm:$0xff] }
 0x378   : > { %v8714_v37 = vpop.f32.mrf.mxu1  ;;  %v5851_v2 = vadd.f32 %v12172_v43, %v5531_v12  ;;  %v8693_v12 = vpop.f32.mrf.mxu0 }
 0x379   : > { %v6508_v52 = vadd.f32 %v8714_v37, %v6210_v1  ;;  %v6529_v18 = vadd.f32 %v11843_v35, %v6505_v27  ;;  %v12173_v1 = vld [vmem:[#allocation13_spill] sm:$0xff]  ;;  %v5537_v37 = vadd.f32 %v12174_v48, %v5111_v53 }
 0x37a   : > { %v6445_v20 = vpop.f32.mrf.mxu1  ;;  %v5854_v61 = vadd.f32 %v12173_v1, %v5534_v14  ;;  %v12176_v27 = vld [vmem:[#allocation9_spill] sm:$0xff]  ;;  %v5535_v14 = vadd.f32 %v12180_v60, %v5109_v0  ;;  %v6192_v11 = vpop.f32.mrf.mxu0 }
 0x37b   : > { %v6532_v59 = vadd.f32 %v11843_v35, %v6508_v52  ;;  %v6506_v51 = vadd.f32 %v6445_v20, %v6208_v9  ;;  %v5112_v52 = vadd.f32 %v12176_v27, %v12175_v49  ;;  %v12177_v9 = vld [vmem:[#allocation30_spill] sm:$0xff]  ;;  %v12179_v20 = vld [vmem:[#allocation32_spill] sm:$0xff] }
 0x37c   : > { %v8717_v4 = vpop.f32.mrf.mxu1  ;;  %v6033_v30 = vadd.f32 %v12177_v9, %v5851_v2  ;;  %v6036_v45 = vadd.f32 %v12179_v20, %v5854_v61  ;;  %v12188_v2 = vld [vmem:[#allocation23_spill] sm:$0xff] }
 0x37d   : > { %v6546_v26 = vpack.c.bf16 %v6532_v59, %v6531_v31  ;;  %v6530_v21 = vadd.f32 %v11843_v35, %v6506_v51  ;;  %v6511_v39 = vadd.f32 %v8717_v4, %v6213_v38  ;;  %v5538_v42 = vadd.f32 %v12181_v15, %v5112_v52  ;;  %v12183_v38 = vld [vmem:[#allocation24_spill] sm:$0xff]  ;;  %v11909_v15 = vld [vmem:[%s12047_s3 + $0x3] ss:$0 sm:$0xff] }
 0x37e   : > { %v6458_v29 = vpop.f32.mrf.mxu1  ;;  %v5110_v4 = vadd.f32 %v12183_v38, %v12182_v16  ;;  %v6725_v16 = vld [vmem:[%s9216_s14 + $0x10] sm:$0xff] }
 0x37f   : > { %v6545_v63 = vpack.c.bf16 %v6530_v21, %v6529_v18  ;;  %v6509_v46 = vadd.f32 %v6458_v29, %v6211_v32  ;;  %v6535_v31 = vadd.f32 %v11843_v35, %v6511_v39  ;;  %v6034_v18 = vadd.f32 %v11797_v33, %v5852_v10 }
 0x380   : > { %v8718_v56 = vpop.f32.mrf.mxu1  ;;  %v5536_v8 = vadd.f32 %v12184_v25, %v5110_v4  ;;  %v5857_v29 = vadd.f32 %v12185_v57, %v5537_v37  ;;  %v6215_v32 = vadd.f32 %v11837_v19, %v6033_v30  ;;  %v5855_v33 = vadd.f32 %v12186_v36, %v5535_v14 }
 0x381   : > { %v6512_v50 = vadd.f32 %v8718_v56, %v6214_v44  ;;  %8743 = vmatprep.mubr.bf16.mxu0 %v6545_v63  ;;  %v6218_v44 = vadd.f32 %v8690_v62, %v6036_v45  ;;  %v5858_v22 = vadd.f32 %v12187_v6, %v5538_v42  ;;  %v6216_v24 = vadd.f32 %v6179_v47, %v6034_v18  ;;  %v6727_v6 = vld [vmem:[%s9216_s14 + $0x20] sm:$0xff] }
 0x382   : > { %v6461_v54 = vpop.f32.mrf.mxu1  ;;  %8744 = vmatmul.mubr.bf16.vlgmr.msra.gmra.mxu0 %v6546_v26  ;;  %v6533_v26 = vadd.f32 %v11843_v35, %v6509_v46  ;;  %v6039_v28 = vadd.f32 %v11805_v41, %v5857_v29  ;;  %v6037_v43 = vadd.f32 %v11809_v55, %v5855_v33  ;;  %v5856_v56 = vadd.f32 %v12188_v2, %v5536_v8  ;;  %v8694_v46 = vpop.f32.mrf.mxu0  ;;  %v6730_v2 = vld [vmem:[%s9216_s14 + $0x38] sm:$0xff] }
 0x383   : > { %v6536_v59 = vadd.f32 %v11843_v35, %v6512_v50  ;;  %v6510_v51 = vadd.f32 %v6461_v54, %v6212_v7  ;;  %v6040_v19 = vadd.f32 %v11816_v5, %v5858_v22 }
 0x384   : > { %v8721_v17 = vpop.f32.mrf.mxu1  ;;  %v6221_v50 = vadd.f32 %v8693_v12, %v6039_v28  ;;  %v6038_v48 = vadd.f32 %v11822_v23, %v5856_v56  ;;  %v6219_v52 = vadd.f32 %v6192_v11, %v6037_v43  ;;  %v6195_v30 = vpop.f32.mrf.mxu0  ;;  %v6729_v28 = vld [vmem:[%s9216_s14 + $0x30] sm:$0xff] }
 0x385   : > { %v6548_v21 = vpack.c.bf16 %v6536_v59, %v6535_v31  ;;  %v6534_v13 = vadd.f32 %v11843_v35, %v6510_v51  ;;  %v6515_v3 = vadd.f32 %v8721_v17, %v6217_v34  ;;  %v6222_v9 = vadd.f32 %v8694_v46, %v6040_v19  ;;  %v6723_v34 = vld [vmem:[%s9216_s14] sm:$0xff] }
 0x386   : > { %v6474_v39 = vpop.f32.mrf.mxu1  ;;  %v6220_v20 = vadd.f32 %v6195_v30, %v6038_v48 }
 0x387   : > { %v6547_v63 = vpack.c.bf16 %v6534_v13, %v6533_v26  ;;  %v6513_v0 = vadd.f32 %v6474_v39, %v6215_v32  ;;  %v6539_v62 = vadd.f32 %v11843_v35, %v6515_v3  ;;  %v6726_v26 = vld [vmem:[%s9216_s14 + $0x18] sm:$0xff]  ;;  %v6724_v3 = vld [vmem:[%s9216_s14 + $0x8] sm:$0xff] }
 0x388   : > { %v8722_v53 = vpop.f32.mrf.mxu1 }
 0x389   : > { %v6516_v58 = vadd.f32 %v8722_v53, %v6218_v44  ;;  %8747 = vmatprep.mubr.bf16.mxu0 %v6547_v63  ;;  %v6537_v47 = vadd.f32 %v11843_v35, %v6513_v0 }
 0x38a   : > { %v6477_v1 = vpop.f32.mrf.mxu1  ;;  %8748 = vmatmul.mubr.bf16.gmra.mxu0 %v6548_v21 }
 0x38b   : > { %v6540_v41 = vadd.f32 %v11843_v35, %v6516_v58  ;;  %v6514_v61 = vadd.f32 %v6477_v1, %v6216_v24 }
 0x38c   : > { %v8725_v7 = vpop.f32.mrf.mxu1 }
 0x38d   : > { %v6550_v37 = vpack.c.bf16 %v6540_v41, %v6539_v62  ;;  %v6538_v55 = vadd.f32 %v11843_v35, %v6514_v61  ;;  %v6519_v27 = vadd.f32 %v8725_v7, %v6221_v50  ;;  %v6728_v61 = vld [vmem:[%s9216_s14 + $0x28] sm:$0xff] }
 0x38e   : > { %v6490_v49 = vpop.f32.mrf.mxu1 }
 0x38f   : > { %v6549_v5 = vpack.c.bf16 %v6538_v55, %v6537_v47  ;;  %v6517_v10 = vadd.f32 %v6490_v49, %v6219_v52  ;;  %v6543_v23 = vadd.f32 %v11843_v35, %v6519_v27  ;;  %v6733_v27 = vld [vmem:[%s9216_s14 + $0x50] sm:$0xff] }
 0x390   : > { %v8726_v40 = vpop.f32.mrf.mxu1 }
 0x391   : > { %v6520_v54 = vadd.f32 %v8726_v40, %v6222_v9  ;;  %8751 = vmatprep.mubr.bf16.mxu1 %v6549_v5  ;;  %v6541_v51 = vadd.f32 %v11843_v35, %v6517_v10  ;;  %v6731_v40 = vld [vmem:[%s9216_s14 + $0x40] sm:$0xff] }
 0x392   : > { %v6493_v45 = vpop.f32.mrf.mxu1  ;;  %8752 = vmatmul.mubr.bf16.vlgmr.msra.gmra.mxu1 %v6550_v37 }
 0x393   : > { %v6544_v31 = vadd.f32 %v11843_v35, %v6520_v54  ;;  %v6518_v59 = vadd.f32 %v6493_v45, %v6220_v20  ;;  %v6734_v45 = vld [vmem:[%s9216_s14 + $0x58] sm:$0xff] }
 0x395   : > { %v6552_v12 = vpack.c.bf16 %v6544_v31, %v6543_v23  ;;  %v6542_v60 = vadd.f32 %v11843_v35, %v6518_v59 }
 0x397   : > { %v6551_v14 = vpack.c.bf16 %v6542_v60, %v6541_v51 }
 0x399   : > { %8755 = vmatprep.mubr.bf16.mxu1 %v6551_v14 }
 0x39a   : > { %8756 = vmatmul.mubr.bf16.gmra.mxu1 %v6552_v12 }
 0x442   : > { %v8745_v42 = vpop.f32.mrf.mxu0 }
 0x443   : > { %v6669_v38 = vadd.f32 %v8745_v42, %v11909_v15 }
 0x444   : > { %v6660_v4 = vpop.f32.mrf.mxu0 }
 0x445   : > { %v11914_v17 = vadd.f32 %v6725_v16, %v6669_v38  ;;  %v6661_v18 = vadd.f32 %v11909_v15, %v6660_v4  ;;  %v6732_v38 = vld [vmem:[%s9216_s14 + $0x48] sm:$0xff] }
 0x446   : > { %v8746_v35 = vpop.f32.mrf.mxu0 }
 0x447   : > { %v6773_v21 = vmin.f32 %v11914_v17, 0.0  ;;  %v11919_v13 = vadd.f32 %v6723_v34, %v6661_v18  ;;  %v6672_v25 = vadd.f32 %v8746_v35, %v11909_v15  ;;  %vm6757_vm0 = vcmp.gt.f32.partialorder %v11914_v17, 0.0 }
 0x448   : > { %v6663_v8 = vpop.f32.mrf.mxu0 }
 0x449   : > { %v6791_v57 = vmul.f32 1.442695, %v6773_v21  ;;  %v6771_v29 = vmin.f32 %v11919_v13, 0.0  ;;  %v11923_v39 = vadd.f32 %v6726_v26, %v6672_v25  ;;  %v6664_v32 = vadd.f32 %v11909_v15, %v6663_v8  ;;  %v6737_v8 = vld [vmem:[%s9216_s14 + $0x70] sm:$0xff] }
 0x44a   : > { %v8749_v44 = vpop.f32.mrf.mxu0  ;;  %vm6755_vm3 = vcmp.gt.f32.partialorder %v11919_v13, 0.0 }
 0x44b   : > { %9100 = vpow2.f32 %v6791_v57  ;;  %v6787_v63 = vmul.f32 1.442695, %v6771_v29  ;;  %v6774_v11 = vmin.f32 %v11923_v39, 0.0  ;;  %v11929_v36 = vadd.f32 %v6724_v3, %v6664_v32 }
 0x44c   : > { %v6685_v33 = vadd.f32 %v8749_v44, %v11909_v15  ;;  %v6676_v53 = vpop.f32.mrf.mxu0  ;;  %vm6758_vm6 = vcmp.gt.f32.partialorder %v11923_v39, 0.0 }
 0x44d   : > { %9102 = vpow2.f32 %v6787_v63  ;;  %v6793_v22 = vmul.f32 1.442695, %v6774_v11  ;;  %v6677_v0 = vadd.f32 %v11909_v15, %v6676_v53  ;;  %v6772_v58 = vmin.f32 %v11929_v36, 0.0  ;;  %v6735_v63 = vld [vmem:[%s9216_s14 + $0x60] sm:$0xff] }
 0x44e   : > { %v11935_v24 = vadd.f32 %v6729_v28, %v6685_v33  ;;  %v8750_v43 = vpop.f32.mrf.mxu0  ;;  %vm6756_vm13 = vcmp.gt.f32.partialorder %v11929_v36, 0.0 }
 0x44f   : > { %9104 = vpow2.f32 %v6793_v22  ;;  %v11938_v56 = vadd.f32 %v6727_v6, %v6677_v0  ;;  %v6688_v1 = vadd.f32 %v8750_v43, %v11909_v15  ;;  %v6789_v19 = vmul.f32 1.442695, %v6772_v58  ;;  %v6738_v0 = vld [vmem:[%s9216_s14 + $0x78] sm:$0xff] }
 0x450   : > { %v6777_v62 = vmin.f32 %v11935_v24, 0.0  ;;  %v6679_v41 = vpop.f32.mrf.mxu0  ;;  %vm6761_vm14 = vcmp.gt.f32.partialorder %v11935_v24, 0.0 }
 0x451   : > { %v6775_v46 = vmin.f32 %v11938_v56, 0.0  ;;  %v11944_v50 = vadd.f32 %v6730_v2, %v6688_v1  ;;  %v6680_v7 = vadd.f32 %v11909_v15, %v6679_v41  ;;  %9106 = vpow2.f32 %v6789_v19 }
 0x452   : > { %v6799_v48 = vmul.f32 1.442695, %v6777_v62  ;;  %v8753_v47 = vpop.f32.mrf.mxu1  ;;  %vm6759_vm15 = vcmp.gt.f32.partialorder %v11938_v56, 0.0 }
 0x453   : > { %v6795_v37 = vmul.f32 1.442695, %v6775_v46  ;;  %v6778_v55 = vmin.f32 %v11944_v50, 0.0  ;;  %v11948_v49 = vadd.f32 %v6728_v61, %v6680_v7  ;;  %v6701_v52 = vadd.f32 %v8753_v47, %v11909_v15 }
 0x454   : > { %9108 = vpow2.f32 %v6799_v48  ;;  %v6692_v9 = vpop.f32.mrf.mxu1  ;;  %v6736_v48 = vld [vmem:[%s9216_s14 + $0x68] sm:$0xff]  ;;  %vm6762_vm1 = vcmp.gt.f32.partialorder %v11944_v50, 0.0 }
 0x455   : > { %9110 = vpow2.f32 %v6795_v37  ;;  %v6801_v5 = vmul.f32 1.442695, %v6778_v55  ;;  %v6776_v30 = vmin.f32 %v11948_v49, 0.0  ;;  %v11954_v10 = vadd.f32 %v6733_v27, %v6701_v52 }
 0x456   : > { %v6693_v54 = vadd.f32 %v11909_v15, %v6692_v9  ;;  %v8754_v20 = vpop.f32.mrf.mxu1  ;;  %vm6760_vm2 = vcmp.gt.f32.partialorder %v11948_v49, 0.0 }
 0x457   : > { %9112 = vpow2.f32 %v6801_v5  ;;  %v6797_v23 = vmul.f32 1.442695, %v6776_v30  ;;  %v6704_v31 = vadd.f32 %v8754_v20, %v11909_v15  ;;  %v6781_v51 = vmin.f32 %v11954_v10, 0.0 }
 0x458   : > { %v9101_v59 = vpop.eup %9100  ;;  %v11960_v12 = vadd.f32 %v6731_v40, %v6693_v54  ;;  %v6695_v60 = vpop.f32.mrf.mxu1  ;;  %vm6765_vm4 = vcmp.gt.f32.partialorder %v11954_v10, 0.0 }
 0x459   : > { %v7676_v14 = vadd.f32 -1.0, %v9101_v59  ;;  %9114 = vpow2.f32 %v6797_v23  ;;  %v11969_v42 = vadd.f32 %v6734_v45, %v6704_v31  ;;  %v6696_v16 = vadd.f32 %v11909_v15, %v6695_v60 }
 0x45a   : > { %v9103_v4 = vpop.eup %9102  ;;  %v6807_v34 = vmul.f32 1.442695, %v6781_v51  ;;  %v6779_v18 = vmin.f32 %v11960_v12, 0.0  ;;  %v8757_v35 = vpop.f32.mrf.mxu1  ;;  %vm6763_vm5 = vcmp.gt.f32.partialorder %v11960_v12, 0.0 }
 0x45b   : > { %v6837_v26 = vsel %vm6757_vm0, %v11914_v17, %v7676_v14  ;;  %v7674_v21 = vadd.f32 -1.0, %v9103_v4  ;;  %v6782_v25 = vmin.f32 %v11969_v42, 0.0  ;;  %v11980_v3 = vadd.f32 %v6732_v38, %v6696_v16 }
 0x45c   : > { %v9105_v57 = vpop.eup %9104  ;;  %6853 = vst [vmem:[%s11967_s12 + $0x10] sm:$0xff] %v6837_v26  ;;  %9116 = vpow2.f32 %v6807_v34  ;;  %v6803_v29 = vmul.f32 1.442695, %v6779_v18  ;;  %v6717_v32 = vadd.f32 %v8757_v35, %v11909_v15  ;;  %v6708_v44 = vpop.f32.mrf.mxu1  ;;  %vm6766_vm7 = vcmp.gt.f32.partialorder %v11969_v42, 0.0 }
 0x45d   : > { %v6835_v17 = vsel %vm6755_vm3, %v11919_v13, %v7674_v21  ;;  %v7677_v11 = vadd.f32 -1.0, %v9105_v57  ;;  %v6809_v28 = vmul.f32 1.442695, %v6782_v25  ;;  %v6709_v33 = vadd.f32 %v11909_v15, %v6708_v44 }
 0x45e   : > { %6851 = vst [vmem:[%s11967_s12] sm:$0xff] %v6835_v17  ;;  %9118 = vpow2.f32 %v6803_v29  ;;  %v6780_v53 = vmin.f32 %v11980_v3, 0.0  ;;  %v11989_v6 = vadd.f32 %v6737_v8, %v6717_v32  ;;  %v8758_v22 = vpop.f32.mrf.mxu1  ;;  %v9107_v58 = vpop.eup %9106  ;;  %vm6764_vm8 = vcmp.gt.f32.partialorder %v11980_v3, 0.0 }
 0x45f   : > { %v6838_v43 = vsel %vm6758_vm6, %v11923_v39, %v7677_v11  ;;  %9120 = vpow2.f32 %v6809_v28  ;;  %v11993_v13 = vadd.f32 %v6735_v63, %v6709_v33  ;;  %v6720_v2 = vadd.f32 %v8758_v22, %v11909_v15 }
 0x460   : > { %6854 = vst [vmem:[%s11967_s12 + $0x18] sm:$0xff] %v6838_v43  ;;  %v7675_v1 = vadd.f32 -1.0, %v9107_v58  ;;  %v6805_v19 = vmul.f32 1.442695, %v6780_v53  ;;  %v6785_v62 = vmin.f32 %v11989_v6, 0.0  ;;  %v6711_v41 = vpop.f32.mrf.mxu1  ;;  %vm6769_vm9 = vcmp.gt.f32.partialorder %v11989_v6, 0.0 }
 0x461   : > { %v9109_v61 = vpop.eup %9108  ;;  %v6783_v46 = vmin.f32 %v11993_v13, 0.0  ;;  %v12000_v7 = vadd.f32 %v6738_v0, %v6720_v2  ;;  %v6712_v39 = vadd.f32 %v11909_v15, %v6711_v41  ;;  %vm6767_vm10 = vcmp.gt.f32.partialorder %v11993_v13, 0.0 }
 0x462   : > { %v9111_v47 = vpop.eup %9110  ;;  %v6836_v37 = vsel %vm6756_vm13, %v11929_v36, %v7675_v1  ;;  %v7680_v55 = vadd.f32 -1.0, %v9109_v61  ;;  %9122 = vpow2.f32 %v6805_v19  ;;  %v6815_v27 = vmul.f32 1.442695, %v6785_v62 }
 0x463   : > { %6852 = vst [vmem:[%s11967_s12 + $0x8] sm:$0xff] %v6836_v37  ;;  %v7678_v52 = vadd.f32 -1.0, %v9111_v47  ;;  %v6811_v9 = vmul.f32 1.442695, %v6783_v46  ;;  %v6786_v5 = vmin.f32 %v12000_v7, 0.0  ;;  %v6752_v15 = vadd.f32 %v6736_v48, %v6712_v39 }
 0x464   : > { %v9113_v30 = vpop.eup %9112  ;;  %v6841_v40 = vsel %vm6761_vm14, %v11935_v24, %v7680_v55  ;;  %9124 = vpow2.f32 %v6815_v27  ;;  %vm6770_vm11 = vcmp.gt.f32.partialorder %v12000_v7, 0.0 }
 0x465   : > { %6857 = vst [vmem:[%s11967_s12 + $0x30] sm:$0xff] %v6841_v40  ;;  %v6839_v36 = vsel %vm6759_vm15, %v11938_v56, %v7678_v52  ;;  %v7681_v54 = vadd.f32 -1.0, %v9113_v30  ;;  %9126 = vpow2.f32 %v6811_v9  ;;  %v6817_v20 = vmul.f32 1.442695, %v6786_v5 }
 0x466   : > { %v9115_v45 = vpop.eup %9114  ;;  %6855 = vst [vmem:[%s11967_s12 + $0x20] sm:$0xff] %v6839_v36  ;;  %v6784_v23 = vmin.f32 %v6752_v15, 0.0  ;;  %vm6768_vm12 = vcmp.gt.f32.partialorder %v6752_v15, 0.0 }
 0x467   : > { %v6842_v31 = vsel %vm6762_vm1, %v11944_v50, %v7681_v54  ;;  %v7679_v24 = vadd.f32 -1.0, %v9115_v45  ;;  %9128 = vpow2.f32 %v6817_v20 }
 0x468   : > { %6858 = vst [vmem:[%s11967_s12 + $0x38] sm:$0xff] %v6842_v31  ;;  %v6813_v59 = vmul.f32 1.442695, %v6784_v23 }
 0x469   : > { %v9117_v51 = vpop.eup %9116  ;;  %v6840_v56 = vsel %vm6760_vm2, %v11948_v49, %v7679_v24 }
 0x46a   : > { %6856 = vst [vmem:[%s11967_s12 + $0x28] sm:$0xff] %v6840_v56  ;;  %v7684_v60 = vadd.f32 -1.0, %v9117_v51  ;;  %9130 = vpow2.f32 %v6813_v59 }
 0x46b   : > { %v9119_v14 = vpop.eup %9118 }
 0x46c   : > { %v9121_v16 = vpop.eup %9120  ;;  %v6845_v50 = vsel %vm6765_vm4, %v11954_v10, %v7684_v60  ;;  %v7682_v38 = vadd.f32 -1.0, %v9119_v14 }
 0x46d   : > { %6861 = vst [vmem:[%s11967_s12 + $0x50] sm:$0xff] %v6845_v50  ;;  %v7685_v4 = vadd.f32 -1.0, %v9121_v16 }
 0x46e   : > { %v6843_v34 = vsel %vm6763_vm5, %v11960_v12, %v7682_v38 }
 0x46f   : > { %v9123_v49 = vpop.eup %9122  ;;  %6859 = vst [vmem:[%s11967_s12 + $0x40] sm:$0xff] %v6843_v34  ;;  %v6846_v18 = vsel %vm6766_vm7, %v11969_v42, %v7685_v4 }
 0x470   : > { %6862 = vst [vmem:[%s11967_s12 + $0x58] sm:$0xff] %v6846_v18  ;;  %v7683_v35 = vadd.f32 -1.0, %v9123_v49 }
 0x471   : > { %v9125_v26 = vpop.eup %9124 }
 0x472   : > { %v9127_v10 = vpop.eup %9126  ;;  %v6844_v21 = vsel %vm6764_vm8, %v11980_v3, %v7683_v35  ;;  %v7688_v25 = vadd.f32 -1.0, %v9125_v26 }
 0x473   : > { %6860 = vst [vmem:[%s11967_s12 + $0x48] sm:$0xff] %v6844_v21  ;;  %v7686_v12 = vadd.f32 -1.0, %v9127_v10 }
 0x474   : > { %v9129_v8 = vpop.eup %9128  ;;  %v6849_v57 = vsel %vm6769_vm9, %v11989_v6, %v7688_v25 }
 0x475   : > { %6865 = vst [vmem:[%s11967_s12 + $0x70] sm:$0xff] %v6849_v57  ;;  %v6847_v42 = vsel %vm6767_vm10, %v11993_v13, %v7686_v12  ;;  %v7689_v29 = vadd.f32 -1.0, %v9129_v8 }
 0x476   : > { %6863 = vst [vmem:[%s11967_s12 + $0x60] sm:$0xff] %v6847_v42 }
 0x477   : > { %v9131_v32 = vpop.eup %9130  ;;  %v6850_v3 = vsel %vm6770_vm11, %v12000_v7, %v7689_v29 }
 0x478   : > { %6866 = vst [vmem:[%s11967_s12 + $0x78] sm:$0xff] %v6850_v3  ;;  %v7687_v44 = vadd.f32 -1.0, %v9131_v32 }
 0x47a   : > { %v6848_v63 = vsel %vm6768_vm12, %v6752_v15, %v7687_v44 }
 0x47b   : > { %6864 = vst [vmem:[%s11967_s12 + $0x68] sm:$0xff] %v6848_v63 }
 0x47c PF: > { %s14_s15 = sadd.s32 1, %s9142_s15  }
 0x47d   : > { %p11_p4 = scmp.ge.s32.totalorder %s14_s15, 4  }
 0x47f   :  { %13 = sbr.rel (!%p11_p4) target bundleno = 1 (0x1), region = 89 }

</bundles_post_ra>
